<compile_context>
chip_gen: v5e
topology: v5e:2x2
jax: 0.10.0
libtpu: 0.0.40
codegen_flags: <defaults>
</compile_context>

<pallas_src>
import numpy as np
import jax
import jax.numpy as jnp
from jax.experimental import pallas as pl
from jax.experimental.pallas import tpu as pltpu

# ----------------------------- problem sizes -------------------------------
N = 2              # batch
C_IN = 16          # input channels (small, synthetic)
H = W = 14         # spatial size -> avgpool(k=5, s=3) gives 4x4 (so flatten == 2048)
C_MID = 128        # conv output channels (fixed by the module)
OUT_H = OUT_W = 4
OUT_HW = OUT_H * OUT_W            # 16 pooled spatial positions
HIDDEN = 1024
FLAT = C_MID * OUT_HW             # 2048, must match fc1 in-features
NUM_CLASSES = 10
CLS_PAD = 128                     # lane-dense padded fc2 output width

S_PER = 8                         # pooled spatial rows per grid step (8-aligned slices)
K_TILES = OUT_HW // S_PER         # 2 grid steps; each streams a (8*128, 1024) w1 tile


# -------------------------- constant pooling matrix -------------------------
def _pool_matrix():
    """(OUT_HW, H*W) matrix: row (oh*4+ow) holds 1/25 over its 5x5 window."""
    P = np.zeros((OUT_HW, H * W), dtype=np.float32)
    for oh in range(OUT_H):
        for ow in range(OUT_W):
            r = oh * OUT_W + ow
            for kh in range(5):
                for kw in range(5):
                    P[r, (oh * 3 + kh) * W + (ow * 3 + kw)] = 1.0 / 25.0
    return jnp.asarray(P)


# ------------------------------ fused kernel --------------------------------
def fused_kernel(x_ref, p_ref, wc_ref, bc_ref, w1_ref, b1_ref, w2_ref, b2_ref,
                 o_ref, act_ref, acc_ref):
    # x_ref  : (N, H*W, C_IN)          f32   (same block every step)
    # p_ref  : (OUT_HW, H*W)           f32   constant pooling matrix
    # wc_ref : (C_IN, C_MID)           f32   1x1 conv weight
    # bc_ref : (1, C_MID)              f32
    # w1_ref : (S_PER, C_MID, HIDDEN)  bf16  fc1 weight tile, rows already permuted to (s, c)
    # b1_ref : (1, HIDDEN)             f32
    # w2_ref : (HIDDEN, CLS_PAD)       bf16  zero-padded fc2 weight
    # b2_ref : (1, CLS_PAD)            f32
    # o_ref  : (N, CLS_PAD)            f32
    # act_ref: (N, OUT_HW, C_MID) f32 scratch (pool+conv+relu activations)
    # acc_ref: (N, HIDDEN)        f32 scratch (fc1 accumulator)
    k = pl.program_id(0)

    @pl.when(k == 0)
    def _():
        # avgpool(5,3) as one MXU matmul per batch element, then 1x1 conv + ReLU.
        P = p_ref[...]
        wc = wc_ref[...]
        bc = bc_ref[...]
        for n in range(N):                                             # N == 2, unrolled
            pooled = jnp.dot(P, x_ref[n], preferred_element_type=jnp.float32)   # (16, C_IN)
            conv = jnp.dot(pooled, wc, preferred_element_type=jnp.float32) + bc  # (16, C_MID)
            act_ref[n] = jnp.maximum(conv, 0.0)
        acc_ref[...] = jnp.zeros_like(acc_ref)

    # fc1 partial sum for the S_PER spatial rows owned by this grid step.
    start = pl.multiple_of(k * S_PER, S_PER)
    act_blk = act_ref[:, pl.ds(start, S_PER), :].astype(jnp.bfloat16)   # (N, S_PER, C_MID)
    acc = acc_ref[...]
    for j in range(S_PER):                                              # unrolled
        acc = acc + jnp.dot(act_blk[:, j], w1_ref[j],
                            preferred_element_type=jnp.float32)         # (N, HIDDEN)
    acc_ref[...] = acc

    @pl.when(k == pl.num_programs(0) - 1)
    def _():
        h = jnp.maximum(acc_ref[...] + b1_ref[...], 0.0).astype(jnp.bfloat16)
        out = jnp.dot(h, w2_ref[...], preferred_element_type=jnp.float32) + b2_ref[...]
        o_ref[...] = out.astype(o_ref.dtype)


# ------------------------------ host wrappers --------------------------------
def prepare_params(params):
    """Trace-time prep: fold the NCHW flatten permutation into w1, cast the big
    weights to bf16, pad fc2 to a lane-dense 128-wide output, build the pooling matrix."""
    # w1 rows are indexed by f = c*OUT_HW + s (PyTorch NCHW flatten). Reorder to (s, c).
    w1_3d = (params["w1"].reshape(C_MID, OUT_HW, HIDDEN)
             .transpose(1, 0, 2)                       # (OUT_HW, C_MID, HIDDEN)
             .astype(jnp.bfloat16))
    w2_pad = (jnp.zeros((HIDDEN, CLS_PAD), jnp.float32)
              .at[:, :NUM_CLASSES].set(params["w2"]).astype(jnp.bfloat16))
    b2_pad = jnp.zeros((1, CLS_PAD), jnp.float32).at[:, :NUM_CLASSES].set(params["b2"])
    return {
        "P": _pool_matrix(),
        "w_conv": params["w_conv"],
        "b_conv": params["b_conv"],
        "w1_3d": w1_3d,
        "b1": params["b1"],
        "w2_pad": w2_pad,
        "b2_pad": b2_pad,
    }


@jax.jit
def inception_aux_forward(x_nchw, kp):
    # x_nchw: (N, C_IN, H, W) — PyTorch layout. Convert to (N, H*W, C_IN) for the kernel.
    x = jnp.transpose(x_nchw, (0, 2, 3, 1)).reshape(N, H * W, C_IN)
    out_pad = pl.pallas_call(
        fused_kernel,
        out_shape=jax.ShapeDtypeStruct((N, CLS_PAD), jnp.float32),
        grid=(K_TILES,),
        in_specs=[
            pl.BlockSpec((N, H * W, C_IN), lambda k: (0, 0, 0)),
            pl.BlockSpec((OUT_HW, H * W), lambda k: (0, 0)),
            pl.BlockSpec((C_IN, C_MID), lambda k: (0, 0)),
            pl.BlockSpec((1, C_MID), lambda k: (0, 0)),
            pl.BlockSpec((S_PER, C_MID, HIDDEN), lambda k: (k, 0, 0)),   # K-tiled fc1 weight
            pl.BlockSpec((1, HIDDEN), lambda k: (0, 0)),
            pl.BlockSpec((HIDDEN, CLS_PAD), lambda k: (0, 0)),
            pl.BlockSpec((1, CLS_PAD), lambda k: (0, 0)),
        ],
        out_specs=pl.BlockSpec((N, CLS_PAD), lambda k: (0, 0)),
        scratch_shapes=[
            pltpu.VMEM((N, OUT_HW, C_MID), jnp.float32),   # pool+conv activations
            pltpu.VMEM((N, HIDDEN), jnp.float32),          # fc1 accumulator
        ],
        compiler_params=pltpu.CompilerParams(
            dimension_semantics=("arbitrary",)),
    )(x, kp["P"], kp["w_conv"], kp["b_conv"], kp["w1_3d"], kp["b1"],
      kp["w2_pad"], kp["b2_pad"])
    return out_pad[:, :NUM_CLASSES]


def reference_forward(x_nchw, params):
    # Plain-JAX reference (same math, eval semantics, same bf16 weight quantization).
    x = jnp.transpose(x_nchw, (0, 2, 3, 1))  # NHWC
    pooled = jnp.stack([
        jnp.stack([
            jnp.mean(x[:, oh * 3:oh * 3 + 5, ow * 3:ow * 3 + 5, :], axis=(1, 2))
            for ow in range(OUT_W)], axis=1)
        for oh in range(OUT_H)], axis=1)                      # (N, 4, 4, C_IN)
    conv = jnp.maximum(
        jnp.einsum("nhwc,cd->nhwd", pooled, params["w_conv"]) + params["b_conv"][0], 0.0)
    flat = jnp.transpose(conv, (0, 3, 1, 2)).reshape(N, FLAT)  # PyTorch NCHW flatten
    # dropout(p=0.5) is identity in eval mode.
    h = jnp.dot(flat.astype(jnp.bfloat16), params["w1"].astype(jnp.bfloat16),
                preferred_element_type=jnp.float32) + params["b1"]
    h = jnp.maximum(h, 0.0)
    out = jnp.dot(h.astype(jnp.bfloat16), params["w2"].astype(jnp.bfloat16),
                  preferred_element_type=jnp.float32) + params["b2"]
    return out


if __name__ == "__main__":
    key = jax.random.PRNGKey(0)
    kx, k1, k2, k3, k4, k5, k6 = jax.random.split(key, 7)

    x = jax.random.normal(kx, (N, C_IN, H, W), dtype=jnp.float32)

    params = {
        # 1x1 conv: torch weight is (128, C_IN, 1, 1); stored as (C_IN, 128).
        "w_conv": jax.random.normal(k1, (C_IN, C_MID), jnp.float32) * 0.05,
        "b_conv": jax.random.normal(k2, (1, C_MID), jnp.float32) * 0.05,
        # fc1: torch weight (1024, 2048); stored transposed (2048, 1024).
        "w1": jax.random.normal(k3, (FLAT, HIDDEN), jnp.float32) * 0.02,
        "b1": jax.random.normal(k4, (1, HIDDEN), jnp.float32) * 0.02,
        # fc2: torch weight (num_classes, 1024); stored transposed (1024, num_classes).
        "w2": jax.random.normal(k5, (HIDDEN, NUM_CLASSES), jnp.float32) * 0.02,
        "b2": jax.random.normal(k6, (1, NUM_CLASSES), jnp.float32) * 0.02,
    }

    kparams = prepare_params(params)
    out = jax.block_until_ready(inception_aux_forward(x, kparams))
    ref = jax.block_until_ready(reference_forward(x, params))

    assert out.shape == (N, NUM_CLASSES)
    err = jnp.max(jnp.abs(out - ref))
    assert jnp.allclose(out, ref, atol=2e-3, rtol=2e-3), f"mismatch vs reference: {err}"

    print("KERNEL_OK")
</pallas_src>

<mosaic_0001>
module attributes {stable_mosaic.version = 11 : i64} {
  func.func @fused_kernel(%arg0: i32, %arg1: memref<2x196x16xf32, #tpu.memory_space<vmem>>, %arg2: memref<16x196xf32, #tpu.memory_space<vmem>>, %arg3: memref<16x128xf32, #tpu.memory_space<vmem>>, %arg4: memref<1x128xf32, #tpu.memory_space<vmem>>, %arg5: memref<8x128x1024xbf16, #tpu.memory_space<vmem>>, %arg6: memref<1x1024xf32, #tpu.memory_space<vmem>>, %arg7: memref<1024x128xbf16, #tpu.memory_space<vmem>>, %arg8: memref<1x128xf32, #tpu.memory_space<vmem>>, %arg9: memref<2x128xf32, #tpu.memory_space<vmem>>, %arg10: memref<2x16x128xf32, #tpu.memory_space<vmem>>, %arg11: memref<2x1024xf32, #tpu.memory_space<vmem>>) attributes {dimension_semantics = [#tpu.dimension_semantics<arbitrary>], iteration_bounds = array<i64: 2>, scalar_prefetch = 0 : i64, scratch_operands = 2 : i64, tpu.core_type = #tpu.core_type<tc>, window_params = [{pipeline_mode = #tpu.pipeline_mode<synchronous>, transform_indices = @transform_0, window_bounds = array<i64: 2, 196, 16>}, {pipeline_mode = #tpu.pipeline_mode<synchronous>, transform_indices = @transform_1, window_bounds = array<i64: 16, 196>}, {pipeline_mode = #tpu.pipeline_mode<synchronous>, transform_indices = @transform_2, window_bounds = array<i64: 16, 128>}, {pipeline_mode = #tpu.pipeline_mode<synchronous>, transform_indices = @transform_3, window_bounds = array<i64: 1, 128>}, {transform_indices = @transform_4, window_bounds = array<i64: 8, 128, 1024>}, {pipeline_mode = #tpu.pipeline_mode<synchronous>, transform_indices = @transform_5, window_bounds = array<i64: 1, 1024>}, {pipeline_mode = #tpu.pipeline_mode<synchronous>, transform_indices = @transform_6, window_bounds = array<i64: 1024, 128>}, {pipeline_mode = #tpu.pipeline_mode<synchronous>, transform_indices = @transform_7, window_bounds = array<i64: 1, 128>}, {pipeline_mode = #tpu.pipeline_mode<synchronous>, transform_indices = @transform_8, window_bounds = array<i64: 2, 128>}]} {
    %c0_i32 = arith.constant 0 : i32
    %0 = arith.cmpi eq, %arg0, %c0_i32 : i32
    %1 = arith.extui %0 : i1 to i32
    %c0_i32_0 = arith.constant 0 : i32
    %2 = arith.cmpi ne, %1, %c0_i32_0 : i32
    scf.if %2 {
      %c0_31 = arith.constant 0 : index
      %c0_32 = arith.constant 0 : index
      %61 = vector.load %arg2[%c0_31, %c0_32] : memref<16x196xf32, #tpu.memory_space<vmem>>, vector<16x196xf32>
      %c0_33 = arith.constant 0 : index
      %c0_34 = arith.constant 0 : index
      %62 = vector.load %arg3[%c0_33, %c0_34] : memref<16x128xf32, #tpu.memory_space<vmem>>, vector<16x128xf32>
      %c0_35 = arith.constant 0 : index
      %c0_36 = arith.constant 0 : index
      %63 = vector.load %arg4[%c0_35, %c0_36] : memref<1x128xf32, #tpu.memory_space<vmem>>, vector<1x128xf32>
      %c0_37 = arith.constant 0 : index
      %c0_38 = arith.constant 0 : index
      %c0_39 = arith.constant 0 : index
      %64 = vector.load %arg1[%c0_37, %c0_38, %c0_39] : memref<2x196x16xf32, #tpu.memory_space<vmem>>, vector<1x196x16xf32>
      %65 = vector.shape_cast %64 : vector<1x196x16xf32> to vector<196x16xf32>
      %cst_40 = arith.constant dense<0.000000e+00> : vector<16x16xf32>
      %66 = tpu.matmul %61, %65, %cst_40 {dimension_numbers = #tpu.dot_dimension_numbers<[1], [0], [0], [1], [0, 0, 1, 1], [], []>} : vector<16x196xf32>, vector<196x16xf32>, vector<16x16xf32> -> vector<16x16xf32>
      %cst_41 = arith.constant dense<0.000000e+00> : vector<16x128xf32>
      %67 = tpu.matmul %66, %62, %cst_41 {dimension_numbers = #tpu.dot_dimension_numbers<[1], [0], [0], [1], [0, 0, 1, 1], [], []>} : vector<16x16xf32>, vector<16x128xf32>, vector<16x128xf32> -> vector<16x128xf32>
      %68 = vector.broadcast %63 : vector<1x128xf32> to vector<16x128xf32>
      %69 = arith.addf %67, %68 : vector<16x128xf32>
      %cst_42 = arith.constant 0.000000e+00 : f32
      %70 = vector.broadcast %cst_42 : f32 to vector<16x128xf32>
      %71 = arith.maximumf %69, %70 : vector<16x128xf32>
      %c0_43 = arith.constant 0 : index
      %c0_44 = arith.constant 0 : index
      %c0_45 = arith.constant 0 : index
      %72 = vector.load %arg10[%c0_43, %c0_44, %c0_45] : memref<2x16x128xf32, #tpu.memory_space<vmem>>, vector<1x16x128xf32>
      %73 = vector.shape_cast %72 : vector<1x16x128xf32> to vector<16x128xf32>
      %74 = vector.shape_cast %71 : vector<16x128xf32> to vector<1x16x128xf32>
      tpu.vector_store %arg10[%c0_43, %c0_44, %c0_45], %74 {strides = array<i32>} : memref<2x16x128xf32, #tpu.memory_space<vmem>>, vector<1x16x128xf32>,
      %c1_46 = arith.constant 1 : index
      %c0_47 = arith.constant 0 : index
      %c0_48 = arith.constant 0 : index
      %75 = vector.load %arg1[%c1_46, %c0_47, %c0_48] : memref<2x196x16xf32, #tpu.memory_space<vmem>>, vector<1x196x16xf32>
      %76 = vector.shape_cast %75 : vector<1x196x16xf32> to vector<196x16xf32>
      %cst_49 = arith.constant dense<0.000000e+00> : vector<16x16xf32>
      %77 = tpu.matmul %61, %76, %cst_49 {dimension_numbers = #tpu.dot_dimension_numbers<[1], [0], [0], [1], [0, 0, 1, 1], [], []>} : vector<16x196xf32>, vector<196x16xf32>, vector<16x16xf32> -> vector<16x16xf32>
      %cst_50 = arith.constant dense<0.000000e+00> : vector<16x128xf32>
      %78 = tpu.matmul %77, %62, %cst_50 {dimension_numbers = #tpu.dot_dimension_numbers<[1], [0], [0], [1], [0, 0, 1, 1], [], []>} : vector<16x16xf32>, vector<16x128xf32>, vector<16x128xf32> -> vector<16x128xf32>
      %79 = vector.broadcast %63 : vector<1x128xf32> to vector<16x128xf32>
      %80 = arith.addf %78, %79 : vector<16x128xf32>
      %cst_51 = arith.constant 0.000000e+00 : f32
      %81 = vector.broadcast %cst_51 : f32 to vector<16x128xf32>
      %82 = arith.maximumf %80, %81 : vector<16x128xf32>
      %c1_52 = arith.constant 1 : index
      %c0_53 = arith.constant 0 : index
      %c0_54 = arith.constant 0 : index
      %83 = vector.load %arg10[%c1_52, %c0_53, %c0_54] : memref<2x16x128xf32, #tpu.memory_space<vmem>>, vector<1x16x128xf32>
      %84 = vector.shape_cast %83 : vector<1x16x128xf32> to vector<16x128xf32>
      %85 = vector.shape_cast %82 : vector<16x128xf32> to vector<1x16x128xf32>
      tpu.vector_store %arg10[%c1_52, %c0_53, %c0_54], %85 {strides = array<i32>} : memref<2x16x128xf32, #tpu.memory_space<vmem>>, vector<1x16x128xf32>,
      %cst_55 = arith.constant 0.000000e+00 : f32
      %86 = vector.broadcast %cst_55 : f32 to vector<2x1024xf32>
      %c0_56 = arith.constant 0 : index
      %c0_57 = arith.constant 0 : index
      %87 = vector.load %arg11[%c0_56, %c0_57] : memref<2x1024xf32, #tpu.memory_space<vmem>>, vector<2x1024xf32>
      tpu.vector_store %arg11[%c0_56, %c0_57], %86 {strides = array<i32>} : memref<2x1024xf32, #tpu.memory_space<vmem>>, vector<2x1024xf32>,
    } else {
    }
    %c8_i32 = arith.constant 8 : i32
    %3 = arith.muli %arg0, %c8_i32 : i32
    %4 = tpu.assume_multiple %3, 8 : i32
    %c0 = arith.constant 0 : index
    %5 = arith.index_cast %4 : i32 to index
    %c0_1 = arith.constant 0 : index
    %6 = vector.load %arg10[%c0, %5, %c0_1] : memref<2x16x128xf32, #tpu.memory_space<vmem>>, vector<2x8x128xf32>
    %7 = arith.truncf %6 : vector<2x8x128xf32> to vector<2x8x128xbf16>
    %c0_2 = arith.constant 0 : index
    %c0_3 = arith.constant 0 : index
    %8 = vector.load %arg11[%c0_2, %c0_3] : memref<2x1024xf32, #tpu.memory_space<vmem>>, vector<2x1024xf32>
    %9 = vector.extract_strided_slice %7 {offsets = [0, 0, 0], sizes = [2, 1, 128], strides = [1, 1, 1]} : vector<2x8x128xbf16> to vector<2x1x128xbf16>
    %10 = vector.shape_cast %9 : vector<2x1x128xbf16> to vector<2x128xbf16>
    %c0_4 = arith.constant 0 : index
    %c0_5 = arith.constant 0 : index
    %c0_6 = arith.constant 0 : index
    %11 = vector.load %arg5[%c0_4, %c0_5, %c0_6] : memref<8x128x1024xbf16, #tpu.memory_space<vmem>>, vector<1x128x1024xbf16>
    %12 = vector.shape_cast %11 : vector<1x128x1024xbf16> to vector<128x1024xbf16>
    %cst = arith.constant dense<0.000000e+00> : vector<2x1024xf32>
    %13 = tpu.matmul %10, %12, %cst {dimension_numbers = #tpu.dot_dimension_numbers<[1], [0], [0], [1], [0, 0, 1, 1], [], []>} : vector<2x128xbf16>, vector<128x1024xbf16>, vector<2x1024xf32> -> vector<2x1024xf32>
    %14 = arith.addf %8, %13 : vector<2x1024xf32>
    %15 = vector.extract_strided_slice %7 {offsets = [0, 1, 0], sizes = [2, 1, 128], strides = [1, 1, 1]} : vector<2x8x128xbf16> to vector<2x1x128xbf16>
    %16 = vector.shape_cast %15 : vector<2x1x128xbf16> to vector<2x128xbf16>
    %c1 = arith.constant 1 : index
    %c0_7 = arith.constant 0 : index
    %c0_8 = arith.constant 0 : index
    %17 = vector.load %arg5[%c1, %c0_7, %c0_8] : memref<8x128x1024xbf16, #tpu.memory_space<vmem>>, vector<1x128x1024xbf16>
    %18 = vector.shape_cast %17 : vector<1x128x1024xbf16> to vector<128x1024xbf16>
    %cst_9 = arith.constant dense<0.000000e+00> : vector<2x1024xf32>
    %19 = tpu.matmul %16, %18, %cst_9 {dimension_numbers = #tpu.dot_dimension_numbers<[1], [0], [0], [1], [0, 0, 1, 1], [], []>} : vector<2x128xbf16>, vector<128x1024xbf16>, vector<2x1024xf32> -> vector<2x1024xf32>
    %20 = arith.addf %14, %19 : vector<2x1024xf32>
    %21 = vector.extract_strided_slice %7 {offsets = [0, 2, 0], sizes = [2, 1, 128], strides = [1, 1, 1]} : vector<2x8x128xbf16> to vector<2x1x128xbf16>
    %22 = vector.shape_cast %21 : vector<2x1x128xbf16> to vector<2x128xbf16>
    %c2 = arith.constant 2 : index
    %c0_10 = arith.constant 0 : index
    %c0_11 = arith.constant 0 : index
    %23 = vector.load %arg5[%c2, %c0_10, %c0_11] : memref<8x128x1024xbf16, #tpu.memory_space<vmem>>, vector<1x128x1024xbf16>
    %24 = vector.shape_cast %23 : vector<1x128x1024xbf16> to vector<128x1024xbf16>
    %cst_12 = arith.constant dense<0.000000e+00> : vector<2x1024xf32>
    %25 = tpu.matmul %22, %24, %cst_12 {dimension_numbers = #tpu.dot_dimension_numbers<[1], [0], [0], [1], [0, 0, 1, 1], [], []>} : vector<2x128xbf16>, vector<128x1024xbf16>, vector<2x1024xf32> -> vector<2x1024xf32>
    %26 = arith.addf %20, %25 : vector<2x1024xf32>
    %27 = vector.extract_strided_slice %7 {offsets = [0, 3, 0], sizes = [2, 1, 128], strides = [1, 1, 1]} : vector<2x8x128xbf16> to vector<2x1x128xbf16>
    %28 = vector.shape_cast %27 : vector<2x1x128xbf16> to vector<2x128xbf16>
    %c3 = arith.constant 3 : index
    %c0_13 = arith.constant 0 : index
    %c0_14 = arith.constant 0 : index
    %29 = vector.load %arg5[%c3, %c0_13, %c0_14] : memref<8x128x1024xbf16, #tpu.memory_space<vmem>>, vector<1x128x1024xbf16>
    %30 = vector.shape_cast %29 : vector<1x128x1024xbf16> to vector<128x1024xbf16>
    %cst_15 = arith.constant dense<0.000000e+00> : vector<2x1024xf32>
    %31 = tpu.matmul %28, %30, %cst_15 {dimension_numbers = #tpu.dot_dimension_numbers<[1], [0], [0], [1], [0, 0, 1, 1], [], []>} : vector<2x128xbf16>, vector<128x1024xbf16>, vector<2x1024xf32> -> vector<2x1024xf32>
    %32 = arith.addf %26, %31 : vector<2x1024xf32>
    %33 = vector.extract_strided_slice %7 {offsets = [0, 4, 0], sizes = [2, 1, 128], strides = [1, 1, 1]} : vector<2x8x128xbf16> to vector<2x1x128xbf16>
    %34 = vector.shape_cast %33 : vector<2x1x128xbf16> to vector<2x128xbf16>
    %c4 = arith.constant 4 : index
    %c0_16 = arith.constant 0 : index
    %c0_17 = arith.constant 0 : index
    %35 = vector.load %arg5[%c4, %c0_16, %c0_17] : memref<8x128x1024xbf16, #tpu.memory_space<vmem>>, vector<1x128x1024xbf16>
    %36 = vector.shape_cast %35 : vector<1x128x1024xbf16> to vector<128x1024xbf16>
    %cst_18 = arith.constant dense<0.000000e+00> : vector<2x1024xf32>
    %37 = tpu.matmul %34, %36, %cst_18 {dimension_numbers = #tpu.dot_dimension_numbers<[1], [0], [0], [1], [0, 0, 1, 1], [], []>} : vector<2x128xbf16>, vector<128x1024xbf16>, vector<2x1024xf32> -> vector<2x1024xf32>
    %38 = arith.addf %32, %37 : vector<2x1024xf32>
    %39 = vector.extract_strided_slice %7 {offsets = [0, 5, 0], sizes = [2, 1, 128], strides = [1, 1, 1]} : vector<2x8x128xbf16> to vector<2x1x128xbf16>
    %40 = vector.shape_cast %39 : vector<2x1x128xbf16> to vector<2x128xbf16>
    %c5 = arith.constant 5 : index
    %c0_19 = arith.constant 0 : index
    %c0_20 = arith.constant 0 : index
    %41 = vector.load %arg5[%c5, %c0_19, %c0_20] : memref<8x128x1024xbf16, #tpu.memory_space<vmem>>, vector<1x128x1024xbf16>
    %42 = vector.shape_cast %41 : vector<1x128x1024xbf16> to vector<128x1024xbf16>
    %cst_21 = arith.constant dense<0.000000e+00> : vector<2x1024xf32>
    %43 = tpu.matmul %40, %42, %cst_21 {dimension_numbers = #tpu.dot_dimension_numbers<[1], [0], [0], [1], [0, 0, 1, 1], [], []>} : vector<2x128xbf16>, vector<128x1024xbf16>, vector<2x1024xf32> -> vector<2x1024xf32>
    %44 = arith.addf %38, %43 : vector<2x1024xf32>
    %45 = vector.extract_strided_slice %7 {offsets = [0, 6, 0], sizes = [2, 1, 128], strides = [1, 1, 1]} : vector<2x8x128xbf16> to vector<2x1x128xbf16>
    %46 = vector.shape_cast %45 : vector<2x1x128xbf16> to vector<2x128xbf16>
    %c6 = arith.constant 6 : index
    %c0_22 = arith.constant 0 : index
    %c0_23 = arith.constant 0 : index
    %47 = vector.load %arg5[%c6, %c0_22, %c0_23] : memref<8x128x1024xbf16, #tpu.memory_space<vmem>>, vector<1x128x1024xbf16>
    %48 = vector.shape_cast %47 : vector<1x128x1024xbf16> to vector<128x1024xbf16>
    %cst_24 = arith.constant dense<0.000000e+00> : vector<2x1024xf32>
    %49 = tpu.matmul %46, %48, %cst_24 {dimension_numbers = #tpu.dot_dimension_numbers<[1], [0], [0], [1], [0, 0, 1, 1], [], []>} : vector<2x128xbf16>, vector<128x1024xbf16>, vector<2x1024xf32> -> vector<2x1024xf32>
    %50 = arith.addf %44, %49 : vector<2x1024xf32>
    %51 = vector.extract_strided_slice %7 {offsets = [0, 7, 0], sizes = [2, 1, 128], strides = [1, 1, 1]} : vector<2x8x128xbf16> to vector<2x1x128xbf16>
    %52 = vector.shape_cast %51 : vector<2x1x128xbf16> to vector<2x128xbf16>
    %c7 = arith.constant 7 : index
    %c0_25 = arith.constant 0 : index
    %c0_26 = arith.constant 0 : index
    %53 = vector.load %arg5[%c7, %c0_25, %c0_26] : memref<8x128x1024xbf16, #tpu.memory_space<vmem>>, vector<1x128x1024xbf16>
    %54 = vector.shape_cast %53 : vector<1x128x1024xbf16> to vector<128x1024xbf16>
    %cst_27 = arith.constant dense<0.000000e+00> : vector<2x1024xf32>
    %55 = tpu.matmul %52, %54, %cst_27 {dimension_numbers = #tpu.dot_dimension_numbers<[1], [0], [0], [1], [0, 0, 1, 1], [], []>} : vector<2x128xbf16>, vector<128x1024xbf16>, vector<2x1024xf32> -> vector<2x1024xf32>
    %56 = arith.addf %50, %55 : vector<2x1024xf32>
    %c0_28 = arith.constant 0 : index
    %c0_29 = arith.constant 0 : index
    %57 = vector.load %arg11[%c0_28, %c0_29] : memref<2x1024xf32, #tpu.memory_space<vmem>>, vector<2x1024xf32>
    tpu.vector_store %arg11[%c0_28, %c0_29], %56 {strides = array<i32>} : memref<2x1024xf32, #tpu.memory_space<vmem>>, vector<2x1024xf32>,
    %c1_i32 = arith.constant 1 : i32
    %58 = arith.cmpi eq, %arg0, %c1_i32 : i32
    %59 = arith.extui %58 : i1 to i32
    %c0_i32_30 = arith.constant 0 : i32
    %60 = arith.cmpi ne, %59, %c0_i32_30 : i32
    scf.if %60 {
      %c0_31 = arith.constant 0 : index
      %c0_32 = arith.constant 0 : index
      %61 = vector.load %arg11[%c0_31, %c0_32] : memref<2x1024xf32, #tpu.memory_space<vmem>>, vector<2x1024xf32>
      %c0_33 = arith.constant 0 : index
      %c0_34 = arith.constant 0 : index
      %62 = vector.load %arg6[%c0_33, %c0_34] : memref<1x1024xf32, #tpu.memory_space<vmem>>, vector<1x1024xf32>
      %63 = vector.broadcast %62 : vector<1x1024xf32> to vector<2x1024xf32>
      %64 = arith.addf %61, %63 : vector<2x1024xf32>
      %cst_35 = arith.constant 0.000000e+00 : f32
      %65 = vector.broadcast %cst_35 : f32 to vector<2x1024xf32>
      %66 = arith.maximumf %64, %65 : vector<2x1024xf32>
      %67 = arith.truncf %66 : vector<2x1024xf32> to vector<2x1024xbf16>
      %c0_36 = arith.constant 0 : index
      %c0_37 = arith.constant 0 : index
      %68 = vector.load %arg7[%c0_36, %c0_37] : memref<1024x128xbf16, #tpu.memory_space<vmem>>, vector<1024x128xbf16>
      %cst_38 = arith.constant dense<0.000000e+00> : vector<2x128xf32>
      %69 = tpu.matmul %67, %68, %cst_38 {dimension_numbers = #tpu.dot_dimension_numbers<[1], [0], [0], [1], [0, 0, 1, 1], [], []>} : vector<2x1024xbf16>, vector<1024x128xbf16>, vector<2x128xf32> -> vector<2x128xf32>
      %c0_39 = arith.constant 0 : index
      %c0_40 = arith.constant 0 : index
      %70 = vector.load %arg8[%c0_39, %c0_40] : memref<1x128xf32, #tpu.memory_space<vmem>>, vector<1x128xf32>
      %71 = vector.broadcast %70 : vector<1x128xf32> to vector<2x128xf32>
      %72 = arith.addf %69, %71 : vector<2x128xf32>
      %c0_41 = arith.constant 0 : index
      %c0_42 = arith.constant 0 : index
      %73 = vector.load %arg9[%c0_41, %c0_42] : memref<2x128xf32, #tpu.memory_space<vmem>>, vector<2x128xf32>
      tpu.vector_store %arg9[%c0_41, %c0_42], %72 {strides = array<i32>} : memref<2x128xf32, #tpu.memory_space<vmem>>, vector<2x128xf32>,
    } else {
    }
    return
  }
  func.func @transform_0(%arg0: i32) -> (i32, i32, i32) {
    %c0_i32 = arith.constant 0 : i32
    %c0_i32_0 = arith.constant 0 : i32
    %c0_i32_1 = arith.constant 0 : i32
    %c0_i32_2 = arith.constant 0 : i32
    return %c0_i32, %c0_i32_0, %c0_i32_1 : i32, i32, i32
  }
  func.func @transform_1(%arg0: i32) -> (i32, i32) {
    %c0_i32 = arith.constant 0 : i32
    %c0_i32_0 = arith.constant 0 : i32
    %c0_i32_1 = arith.constant 0 : i32
    return %c0_i32, %c0_i32_0 : i32, i32
  }
  func.func @transform_2(%arg0: i32) -> (i32, i32) {
    %c0_i32 = arith.constant 0 : i32
    %c0_i32_0 = arith.constant 0 : i32
    %c0_i32_1 = arith.constant 0 : i32
    return %c0_i32, %c0_i32_0 : i32, i32
  }
  func.func @transform_3(%arg0: i32) -> (i32, i32) {
    %c0_i32 = arith.constant 0 : i32
    %c0_i32_0 = arith.constant 0 : i32
    %c0_i32_1 = arith.constant 0 : i32
    return %c0_i32, %c0_i32_0 : i32, i32
  }
  func.func @transform_4(%arg0: i32) -> (i32, i32, i32) {
    %c0_i32 = arith.constant 0 : i32
    %c0_i32_0 = arith.constant 0 : i32
    %c0_i32_1 = arith.constant 0 : i32
    return %arg0, %c0_i32, %c0_i32_0 : i32, i32, i32
  }
  func.func @transform_5(%arg0: i32) -> (i32, i32) {
    %c0_i32 = arith.constant 0 : i32
    %c0_i32_0 = arith.constant 0 : i32
    %c0_i32_1 = arith.constant 0 : i32
    return %c0_i32, %c0_i32_0 : i32, i32
  }
  func.func @transform_6(%arg0: i32) -> (i32, i32) {
    %c0_i32 = arith.constant 0 : i32
    %c0_i32_0 = arith.constant 0 : i32
    %c0_i32_1 = arith.constant 0 : i32
    return %c0_i32, %c0_i32_0 : i32, i32
  }
  func.func @transform_7(%arg0: i32) -> (i32, i32) {
    %c0_i32 = arith.constant 0 : i32
    %c0_i32_0 = arith.constant 0 : i32
    %c0_i32_1 = arith.constant 0 : i32
    return %c0_i32, %c0_i32_0 : i32, i32
  }
  func.func @transform_8(%arg0: i32) -> (i32, i32) {
    %c0_i32 = arith.constant 0 : i32
    %c0_i32_0 = arith.constant 0 : i32
    %c0_i32_1 = arith.constant 0 : i32
    return %c0_i32, %c0_i32_0 : i32, i32
  }
}

</mosaic_0001>

<bundles_post_ra>
// kernel: inception_aux_forward.1
= control target key start
LH: loop header
LB: loop body
LE: loop exit
PB: predicated region body
PF: predicated region fallthrough
CT: control target
= control target key end

     0   :  { %13 = vsyncpa [#allocation5], 0  ;;  %s11038_s0 = inlined_call_operand.vmem [shape: f32[2,196,16], index: 0, kind: input, shape index: {}]   ;;  %s11039_s1 = inlined_call_operand.hbm [shape: f32[16,196], index: 1, kind: input, shape index: {}]   ;;  %s11040_s2 = inlined_call_operand.hbm [shape: f32[16,128], index: 2, kind: input, shape index: {}]   ;;  %s11041_s3 = inlined_call_operand.hbm [shape: f32[1,128], index: 3, kind: input, shape index: {}]   ;;  %s11042_s4 = inlined_call_operand.hbm [shape: bf16[16,128,1024], index: 4, kind: input, shape index: {}]   ;;  %s11043_s5 = inlined_call_operand.hbm [shape: f32[1,1024], index: 5, kind: input, shape index: {}]   ;;  %s11044_s6 = inlined_call_operand.hbm [shape: bf16[1024,128], index: 6, kind: input, shape index: {}]   ;;  %s11045_s7 = inlined_call_operand.hbm [shape: f32[1,128], index: 7, kind: input, shape index: {}]   ;;  %s11046_s8 = inlined_call_operand.hbm [shape: f32[2,128], index: 8, kind: output, shape index: {}]  }
   0x1   :  { %14 = vsyncpa [#allocation8], 0 }
   0x2   :  { %15 = vsyncpa [#allocation11], 0 }
   0x3   :  { %17 = vsyncpa [#allocation11 + $0x1], 0 }
   0x4   :  { %18 = vsyncpa [#allocation14], 0 }
   0x5   :  { %19 = vsyncpa [#allocation6], 0  ;;  %s9487_s27 = smov 0   ;;  %s9489_s28 = smov 0  }
   0x6   :  { %s9491_s29 = smov 0   ;;  %s9493_s30 = smov 0  }
   0x7 LB: > { %s252_s11 = sshll.u32 %s11040_s2, 4  ;;  %s9511_s12 = sadd.s32 4294967295, %s9424_s30   ;;  %s9424_s30 = sphi %s9493_s30, %s11054_s30   ;;  %s9420_s29 = sphi %s9491_s29, %s11053_s29   ;;  %s9416_s28 = sphi %s9489_s28, %s11052_s28   ;;  %s9412_s27 = sphi %s9487_s27, %s11051_s27   ;;  %s253_s11 = int_to_ptr.hbm [resolvable:$true] %s252_s11 }
   0x8   : > { %p5618_p0 = scmp.ge.s32.totalorder %s9424_s30, 1  ;;  %p130_p1 = scmp.eq.s32.totalorder %s9511_s12, 0 }
   0x9   : > { %p224_p2 = scmp.lt.s32.totalorder %s9424_s30, 3  ;;  %p5619_p3 = scmp.ne.s32.totalorder %s9511_s12, 0 }
   0xa   : > { %s9426_s14 = smov [#allocation7]   ;;  %s279_s18 = sshll.u32 %s11043_s5, 4  ;;  %s280_s18 = int_to_ptr.hbm [resolvable:$true] %s279_s18 }
   0xb   : > { %p9517_p4 = pnand %p5618_p0, %p224_p2  ;;  %s254_s15 = sshll.u32 %s9426_s14, 4  ;;  %s255_s15 = int_to_ptr.vmem [resolvable:$true] %s254_s15 }
   0xc   : > { %s290_s22 = sshll.u32 %s11044_s6, 4  ;;  %s9427_s23 = smov [#allocation12]   ;;  %s291_s22 = int_to_ptr.hbm [resolvable:$true] %s290_s22 }
   0xd   : > { %p9044_p5 = pneg %p9517_p4  ;;  %s281_s24 = sshll.u32 %s9427_s23, 4  ;;  %s282_s24 = int_to_ptr.vmem [resolvable:$true] %s281_s24 }
   0xe   : > { %s9428_s25 = smov 128   ;;  %s9429_s26 = smov 8  }
   0xf   : > { %p9528_p6 = pnand %p9044_p5, %p130_p1  ;;  %s9430_s9 = smov [#allocation13]  }
  0x10   : > { %s292_s10 = sshll.u32 %s9430_s9, 4  ;;  %s238_s17 = sshll.u32 %s11039_s1, 4  ;;  %s293_s10 = int_to_ptr.vmem [resolvable:$true] %s292_s10  ;;  %s239_s17 = int_to_ptr.hbm [resolvable:$true] %s238_s17 }
  0x11   : > { %9050 = dma.hbm_to_vmem [thread:$0]  (!%p9528_p6), %s253_s11, 256, %s255_s15, [#allocation8], %s9428_s25, %s9428_s25, %s9429_s26  }
  0x12   : > { %9056 = dma.hbm_to_vmem [thread:$0]  (!%p9528_p6), %s280_s18, 128, %s282_s24, [#allocation11]  }
  0x13   : > { %s9431_s20 = smov 64   ;;  %s9432_s21 = smov 4  }
  0x14   : > { %9059 = dma.hbm_to_vmem [thread:$0]  (!%p9528_p6), %s291_s22, 8192, %s293_s10, [#allocation14], %s9431_s20, %s9431_s20, %s9432_s21  }
  0x15   : > { %s9433_s23 = smov [#allocation4]   ;;  %s9434_s15 = smov 256  }
  0x16   : > { %s240_s11 = sshll.u32 %s9433_s23, 4  ;;  %s9435_s18 = smov 16   ;;  %s241_s11 = int_to_ptr.vmem [resolvable:$true] %s240_s11 }
  0x17   : > { %9047 = dma.hbm_to_vmem [thread:$0]  (!%p9528_p6), %s239_s17, 512, %s241_s11, [#allocation5], %s9434_s15, %s9434_s15, %s9435_s18  }
  0x18   : > { %s267_s26 = sshll.u32 %s11041_s3, 4  ;;  %s9436_s22 = smov [#allocation9]   ;;  %s268_s26 = int_to_ptr.hbm [resolvable:$true] %s267_s26 }
  0x19   : > { %s269_s9 = sshll.u32 %s9436_s22, 4  ;;  %s305_s16 = sshll.u32 %s11045_s7, 4  ;;  %s270_s9 = int_to_ptr.vmem [resolvable:$true] %s269_s9  ;;  %s306_s16 = int_to_ptr.hbm [resolvable:$true] %s305_s16 }
  0x1a   : > { %9053 = dma.hbm_to_vmem [thread:$0]  (!%p9528_p6), %s268_s26, 16, %s270_s9, [#allocation8]  }
  0x1b   : > { %s9437_s17 = smov [#allocation15]   ;;  %s9557_s21 = sadd.s32 1, %s9424_s30  }
  0x1c   : > { %s307_s20 = sshll.u32 %s9437_s17, 4  ;;  %s116_s23 = sadd.s32 1, %s9420_s29  ;;  %s308_s20 = int_to_ptr.vmem [resolvable:$true] %s307_s20 }
  0x1d   : > { %9062 = dma.hbm_to_vmem [thread:$0]  (!%p9528_p6), %s306_s16, 16, %s308_s20, [#allocation14]  }
  0x1e   : > { %s113_s11 = ssub.s32 %s9424_s30, %s9557_s21  ;;  %p123_p7 = scmp.ne.s32.totalorder %s9420_s29, %s9416_s28 }
  0x1f   : > { %p114_p8 = scmp.eq.s32.totalorder %s113_s11, 0  ;;  %p124_p9 = scmp.eq.s32.totalorder %s9424_s30, 0 }
  0x20   : > { %p129_p10 = scmp.ne.s32.totalorder %s9416_s28, %s9412_s27  ;;  %p9073_p11 = scmp.lt.s32.totalorder %s9424_s30, 2 }
  0x21   : > { %s9569_s15 = scalar_select %p114_p8, %s9420_s29, %s116_s23  }
  0x22   : > { %p125_p12 = por %p124_p9, %p123_p7  ;;  %p9573_p13 = por %p130_p1, %p129_p10 }
  0x23   : > { %s318_s19 = sand.u32 1, %s9424_s30   ;;  %s320_s24 = sand.u32 1, %s9420_s29  }
  0x24   : > { %s5626_s25 = sshll.u32 %s320_s24, 12  ;;  %s8435_s26 = sshll.u32 %s9424_s30, 12 }
  0x25   : > { %s328_s10 = scalar_lea.hbm %s11042_s4, %s8435_s26  ;;  %s322_s14 = scalar_lea.vmem [#allocation10], %s5626_s25 }
  0x26   : > { %s331_s16 = sshll.u32 %s322_s14, 4  ;;  %s329_s27 = sshll.u32 %s328_s10, 4  ;;  %s332_s16 = int_to_ptr.vmem [resolvable:$true] %s331_s16  ;;  %s330_s27 = int_to_ptr.hbm [resolvable:$true] %s329_s27 }
  0x27   : > { %p9585_p0 = pnand %p9073_p11, %p125_p12  ;;  %s319_s20 = scalar_lea.sflag [#allocation11], %s318_s19 }
  0x28   : > { %s9312_s23 = sshra.s32 %s330_s27, 4  ;;  %s9319_s26 = scalar_lea.hbm %s11042_s4, 8192  ;;  %s9313_s23 = int_to_ptr.hbm [resolvable:$true] %s9312_s23 }
  0x29   : > { %s9314_s11 = scalar_lea.hbm %s9313_s23, 4096  ;;  %p9316_p5 = pneg %p9585_p0 }
  0x2a   : > { %p9315_p2 = scmp.ne.s32.totalorder %s9313_s23, %s9314_s11  ;;  %p9320_p8 = scmp.lt.s32.totalorder %s9313_s23, %s11042_s4 }
  0x2b   : > { %p9321_p9 = scmp.lt.s32.totalorder %s9319_s26, %s9314_s11 }
  0x2c   : > { %p9317_p6 = pnand %p9316_p5, %p9315_p2 }
  0x2d   : > { %p9322_p10 = por %p9321_p9, %p9320_p8 }
  0x2e   : > { %p9318_p7 = pneg %p9317_p6 }
  0x30   : > { %p9323_p11 = pnand %p9322_p10, %p9318_p7 }
  0x32   : > { %9326 = shalt.err (!%p9323_p11)
}
  0x33   : > { %s9438_s19 = smov 512   ;;  %s9439_s9 = smov 32  }
  0x34   : > { %9066 = dma.hbm_to_vmem [thread:$0]  (!%p9585_p0), %s330_s27, 65536, %s332_s16, %s319_s20, %s9438_s19, %s9438_s19, %s9439_s9  }
  0x35   : > { %343 = sbr.rel (%p9517_p4) target bundleno = 1398 (0x576), region = 52 }
  0x3a   : > { %9387 = dma.done.wait (%p130_p1), [#allocation5], 512  }
  0x3b   : > { %9389 = vsyncadd (%p130_p1), [#allocation5], 4294966784 }
  0x3c   : > { %9391 = dma.done.wait (%p130_p1), [#allocation8], 272  }
  0x3d   : > { %9393 = vsyncadd (%p130_p1), [#allocation8], 4294967024  ;;  %s360_s10 = sand.u32 1, %s9511_s12   ;;  %s362_s14 = sand.u32 1, %s9416_s28  }
  0x3e   : > { %s5634_s16 = sshll.u32 %s362_s14, 12  ;;  %s361_s13 = scalar_lea.sflag [#allocation11], %s360_s10 }
  0x3f   : > { %s9611_s27 = scalar_lea.vmem [#allocation10], %s5634_s16 }
  0x40   : > { %9395 = dma.done.wait (%p9573_p13), %s361_s13, 65536  }
  0x41   : > { %9397 = vsyncadd (%p9573_p13), %s361_s13, 4294901760 }
  0x42   : > { %9399 = dma.done.wait (%p130_p1), [#allocation11], 128  }
  0x43   : > { %9401 = vsyncadd (%p130_p1), [#allocation11], 4294967168 }
  0x44   : > { %9403 = dma.done.wait (%p130_p1), [#allocation14], 8208  }
  0x45   : > { %9405 = vsyncadd (%p130_p1), [#allocation14], 4294959088  ;;  %412 = sbr.rel (%p5619_p3) target bundleno = 529 (0x211), region = 84 }
  0x4a   : > { %v435_v0 = vld [vmem:[%s11038_s0 + $0x78] sm:$0xff]  ;;  %v434_v1 = vld [vmem:[%s11038_s0 + $0x70] sm:$0xff]  ;;  %vm452_vm0 = vcmask 1043456   ;;  %v433_v2 = vld [vmem:[%s11038_s0 + $0x68] sm:$0xff]  ;;  %vm445_vm1 = vcmask 556032   ;;  %vm505_vm2 = vcmask 130048  }
  0x4b   : > { %456 = vmatpush.msra.mxu0 %v435_v0  ;;  %v444_v3 = vld [vmem:[%s11038_s0 + $0xc0] sm:$0xf]  ;;  %v443_v4 = vld [vmem:[%s11038_s0 + $0xb8] sm:$0xff]  ;;  %v442_v6 = vld [vmem:[%s11038_s0 + $0xb0] sm:$0xff] }
  0x4c   : > { %5639 = vmatpush.msk.msra.mxu1 %vm452_vm0, %v444_v3  ;;  %v432_v5 = vld [vmem:[%s11038_s0 + $0x60] sm:$0xff]  ;;  %v431_v7 = vld [vmem:[%s11038_s0 + $0x58] sm:$0xff]  ;;  %v441_v8 = vld [vmem:[%s11038_s0 + $0xa8] sm:$0xff] }
  0x4d   : > { %457 = vmatpush.msra.mxu0 %v434_v1  ;;  %v430_v9 = vld [vmem:[%s11038_s0 + $0x50] sm:$0xff]  ;;  %v440_v10 = vld [vmem:[%s11038_s0 + $0xa0] sm:$0xff]  ;;  %v429_v12 = vld [vmem:[%s11038_s0 + $0x48] sm:$0xff] }
  0x4e   : > { %487 = vmatpush.msra.mxu1 %v443_v4  ;;  %v5659_v11 = vld [vmem:[%s11038_s0 + $0x140] sm:$0xff]  ;;  %v439_v13 = vld [vmem:[%s11038_s0 + $0x98] sm:$0xff]  ;;  %v5657_v15 = vld [vmem:[%s11038_s0 + $0x130] sm:$0xff] }
  0x4f   : > { %458 = vmatpush.msra.mxu0 %v433_v2  ;;  %568 = vmatpush.msra.mxu3 %v5659_v11  ;;  %v5658_v14 = vld [vmem:[%s11038_s0 + $0x138] sm:$0xff]  ;;  %v9676_v16 = vld [vmem:[#allocation7 + $0x8] sm:$0xff]  ;;  %v438_v18 = vld [vmem:[%s11038_s0 + $0x90] sm:$0xff]  ;;  %v9440_v11 = vmov 0.0  }
  0x50   : > { %488 = vmatpush.msra.mxu1 %v442_v6  ;;  %v428_v17 = vld [vmem:[%s11038_s0 + $0x40] sm:$0xff]  ;;  %526 = vmatpush.msra.mxu2 %v9676_v16  ;;  %v5656_v19 = vld [vmem:[%s11038_s0 + $0x128] sm:$0xff]  ;;  %v427_v20 = vld [vmem:[%s11038_s0 + $0x38] sm:$0xff]  ;;  %648 = vst [vmem:[#allocation3] sm:$0xff] %v9440_v11 }
  0x51   : > { %459 = vmatpush.msra.mxu0 %v432_v5  ;;  %569 = vmatpush.msra.mxu3 %v5658_v14  ;;  %v437_v21 = vld [vmem:[%s11038_s0 + $0x88] sm:$0xff]  ;;  %v5655_v22 = vld [vmem:[%s11038_s0 + $0x120] sm:$0xff]  ;;  %v426_v23 = vld [vmem:[%s11038_s0 + $0x30] sm:$0xff]  ;;  %649 = vst [vmem:[#allocation3 + $0x8] sm:$0xff] %v9440_v11 }
  0x52   : > { %489 = vmatpush.msra.mxu1 %v441_v8  ;;  %v436_v24 = vld [vmem:[%s11038_s0 + $0x80] sm:$0xff]  ;;  %v5654_v26 = vld [vmem:[%s11038_s0 + $0x118] sm:$0xff]  ;;  %v425_v27 = vld [vmem:[%s11038_s0 + $0x28] sm:$0xff] }
  0x53   : > { %460 = vmatpush.msra.mxu0 %v431_v7  ;;  %570 = vmatpush.msra.mxu3 %v5657_v15  ;;  %v9703_v25 = vld [vmem:[#allocation4 + $0x8] sm:$0xff]  ;;  %v423_v29 = vld [vmem:[%s11038_s0 + $0x18] sm:$0xff]  ;;  %v422_v30 = vld [vmem:[%s11038_s0 + $0x10] sm:$0xff] }
  0x54   : > { %490 = vmatpush.msra.mxu1 %v440_v10  ;;  %v424_v28 = vld [vmem:[%s11038_s0 + $0x20] sm:$0xff]  ;;  %v9723_v31 = vld [vmem:[#allocation4 + $0x18] sm:$0xff]  ;;  %v421_v32 = vld [vmem:[%s11038_s0 + $0x8] sm:$0xff] }
  0x55   : > { %461 = vmatpush.msra.mxu0 %v430_v9  ;;  %571 = vmatpush.msra.mxu3 %v5656_v19  ;;  %v420_v33 = vld [vmem:[%s11038_s0] sm:$0xff]  ;;  %v413_v34 = vld [vmem:[#allocation4] sm:$0xff]  ;;  %v415_v35 = vld [vmem:[#allocation4 + $0x10] sm:$0xff] }
  0x56   : > { %491 = vmatpush.msra.mxu1 %v439_v13  ;;  %v5653_v36 = vld [vmem:[%s11038_s0 + $0x110] sm:$0xff]  ;;  %v417_v37 = vld [vmem:[#allocation7] sm:$0xff]  ;;  %v5652_v38 = vld [vmem:[%s11038_s0 + $0x108] sm:$0xff] }
  0x57   : > { %462 = vmatpush.msra.mxu0 %v429_v12  ;;  %572 = vmatpush.msra.mxu3 %v5655_v22  ;;  %v5668_v39 = vld [vmem:[%s11038_s0 + $0x188] sm:$0xf]  ;;  %v5651_v40 = vld [vmem:[%s11038_s0 + $0x100] sm:$0xff]  ;;  %v5650_v42 = vld [vmem:[%s11038_s0 + $0xf8] sm:$0xff] }
  0x58   : > { %492 = vmatpush.msra.mxu1 %v438_v18  ;;  %527 = vmatpush.msra.mxu2 %v417_v37  ;;  %v5667_v41 = vld [vmem:[%s11038_s0 + $0x180] sm:$0xff]  ;;  %v5666_v43 = vld [vmem:[%s11038_s0 + $0x178] sm:$0xff]  ;;  %v5649_v44 = vld [vmem:[%s11038_s0 + $0xf0] sm:$0xff] }
  0x59   : > { %463 = vmatpush.msra.mxu0 %v428_v17  ;;  %573 = vmatpush.msra.mxu3 %v5654_v26  ;;  %v5665_v45 = vld [vmem:[%s11038_s0 + $0x170] sm:$0xff]  ;;  %v5648_v46 = vld [vmem:[%s11038_s0 + $0xe8] sm:$0xff]  ;;  %v5647_v48 = vld [vmem:[%s11038_s0 + $0xe0] sm:$0xff] }
  0x5a   : > { %493 = vmatpush.msra.mxu1 %v437_v21  ;;  %5669 = vmatpush.msk.msrb.mxu2 %vm452_vm0, %v5668_v39  ;;  %v5664_v47 = vld [vmem:[%s11038_s0 + $0x168] sm:$0xff]  ;;  %v5663_v49 = vld [vmem:[%s11038_s0 + $0x160] sm:$0xff]  ;;  %v5646_v50 = vld [vmem:[%s11038_s0 + $0xd8] sm:$0xff] }
  0x5b   : > { %464 = vmatpush.msra.mxu0 %v427_v20  ;;  %574 = vmatpush.msra.mxu3 %v5653_v36  ;;  %v5662_v51 = vld [vmem:[%s11038_s0 + $0x158] sm:$0xff]  ;;  %v5645_v52 = vld [vmem:[%s11038_s0 + $0xd0] sm:$0xff]  ;;  %v5644_v54 = vld [vmem:[%s11038_s0 + $0xc8] sm:$0xff] }
  0x5c   : > { %494 = vmatpush.msra.mxu1 %v436_v24  ;;  %599 = vmatpush.msrb.mxu2 %v5667_v41  ;;  %v5661_v53 = vld [vmem:[%s11038_s0 + $0x150] sm:$0xff]  ;;  %v5660_v55 = vld [vmem:[%s11038_s0 + $0x148] sm:$0xff] }
  0x5d   : > { %465 = vmatpush.msra.mxu0 %v426_v23  ;;  %5640 = vmatmul.msk.f32.vlgmr.msra.gmra.mxu1 %vm445_vm1, %v9703_v25  ;;  %v9130_v62 = vld [vmem:[#allocation9] ss:$0 sm:$0xff] }
  0x5e   : > { %634 = vmatpush.msrb.mxu1 %v9676_v16  ;;  %575 = vmatpush.msra.mxu3 %v5652_v38 }
  0x5f   : > { %466 = vmatpush.msra.mxu0 %v425_v27  ;;  %600 = vmatpush.msrb.mxu2 %v5666_v43 }
  0x60   : > { %635 = vmatpush.msrb.mxu1 %v417_v37  ;;  %576 = vmatpush.msra.mxu3 %v5651_v40 }
  0x61   : > { %467 = vmatpush.msra.mxu0 %v424_v28  ;;  %601 = vmatpush.msrb.mxu2 %v5665_v45 }
  0x62   : > { %577 = vmatpush.msra.mxu3 %v5650_v42 }
  0x63   : > { %468 = vmatpush.msra.mxu0 %v423_v29  ;;  %602 = vmatpush.msrb.mxu2 %v5664_v47 }
  0x64   : > { %578 = vmatpush.msra.mxu3 %v5649_v44 }
  0x65   : > { %469 = vmatpush.msra.mxu0 %v422_v30  ;;  %5641 = vmatmul.msk.f32.gmra.mxu1 %vm445_vm1, %v9723_v31 }
  0x66   : > { %579 = vmatpush.msra.mxu3 %v5648_v46  ;;  %603 = vmatpush.msrb.mxu2 %v5663_v49 }
  0x67   : > { %470 = vmatpush.msra.mxu0 %v421_v32 }
  0x68   : > { %580 = vmatpush.msra.mxu3 %v5647_v48  ;;  %604 = vmatpush.msrb.mxu2 %v5662_v51 }
  0x69   : > { %471 = vmatpush.msra.mxu0 %v420_v33 }
  0x6a   : > { %472 = vmatmul.f32.vlgmr.msra.gmra.mxu0 %v413_v34  ;;  %581 = vmatpush.msra.mxu3 %v5646_v50 }
  0x6b   : > { %605 = vmatpush.msrb.mxu2 %v5661_v53 }
  0x6c   : > { %582 = vmatpush.msra.mxu3 %v5645_v52 }
  0x6d   : > { %606 = vmatpush.msrb.mxu2 %v5660_v55 }
  0x6e   : > { %583 = vmatpush.msra.mxu3 %v5644_v54 }
  0x6f   : > { %584 = vmatmul.f32.vlgmr.msra.gmra.mxu3 %v413_v34 }
  0x72   : > { %475 = vmatmul.f32.gmra.mxu0 %v415_v35 }
  0x77   : > { %587 = vmatmul.f32.gmra.mxu3 %v415_v35 }
  0xda   : > { %v496_v56 = vpop.f32.mrf.mxu1 }
  0xe2   : > { %v499_v59 = vpop.f32.mrf.mxu1 }
  0xe7   : > { %v473_v57 = vpop.f32.mrf.mxu0 }
  0xe8   : > { %v497_v58 = vadd.f32 %v496_v56, %v473_v57 }
  0xea   : > { %5642 = vmatmul.msk.f32.vlgmr.msra.gmra.mxu2 %vm505_vm2, %v497_v58 }
  0xeb   : > { %9012 = vmatpush.msra.mxu2 %v9676_v16 }
  0xed   : > { %9013 = vmatpush.msra.mxu2 %v417_v37 }
  0xef   : > { %v476_v60 = vpop.f32.mrf.mxu0 }
  0xf0   : > { %v500_v61 = vadd.f32 %v499_v59, %v476_v60 }
  0xf2   : > { %5643 = vmatmul.msk.f32.gmra.mxu2 %vm505_vm2, %v500_v61  ;;  %v585_v5 = vpop.f32.mrf.mxu3 }
  0xfa   : > { %5670 = vmatmul.msk.f32.vlgmr.msrb.gmra.mxu2 %vm445_vm1, %v9703_v25  ;;  %v588_v8 = vpop.f32.mrf.mxu3 }
 0x102   : > { %5671 = vmatmul.msk.f32.gmra.mxu2 %vm445_vm1, %v9723_v31 }
 0x16d   : > { %v529_v63 = vpop.f32.mrf.mxu2 }
 0x16e   : > { %v530_v0 = vadd.f32 %v9130_v62, %v529_v63 }
 0x170   : > { %v535_v1 = vmax.f32 %v530_v0, 0.0 }
 0x172   : > { %537 = vst [vmem:[#allocation2] sm:$0xff] %v535_v1 }
 0x175   : > { %v532_v2 = vpop.f32.mrf.mxu2 }
 0x176   : > { %v533_v3 = vadd.f32 %v9130_v62, %v532_v2 }
 0x178   : > { %v536_v4 = vmax.f32 %v533_v3, 0.0 }
 0x17a   : > { %538 = vst [vmem:[#allocation2 + $0x8] sm:$0xff] %v536_v4 }
 0x17d   : > { %v608_v6 = vpop.f32.mrf.mxu2 }
 0x17e   : > { %v609_v7 = vadd.f32 %v608_v6, %v585_v5 }
 0x180   : > { %5672 = vmatmul.msk.f32.vlgmr.msrb.gmra.mxu1 %vm505_vm2, %v609_v7 }
 0x185   : > { %v611_v9 = vpop.f32.mrf.mxu2 }
 0x186   : > { %v612_v10 = vadd.f32 %v611_v9, %v588_v8 }
 0x188   : > { %5673 = vmatmul.msk.f32.vlgmr.msra.gmra.mxu2 %vm505_vm2, %v612_v10 }
 0x1fd   : > { %v637_v12 = vpop.f32.mrf.mxu1 }
 0x1fe   : > { %v638_v13 = vadd.f32 %v9130_v62, %v637_v12 }
 0x200   : > { %v643_v14 = vmax.f32 %v638_v13, 0.0 }
 0x202   : > { %646 = vst [vmem:[#allocation2 + $0x10] sm:$0xff] %v643_v14 }
 0x20b   : > { %v640_v15 = vpop.f32.mrf.mxu2 }
 0x20c   : > { %v641_v16 = vadd.f32 %v9130_v62, %v640_v15 }
 0x20e   : > { %v644_v17 = vmax.f32 %v641_v16, 0.0 }
 0x210   : > { %647 = vst [vmem:[#allocation2 + $0x18] sm:$0xff] %v644_v17 }
 0x211 PF: > { %v5903_v18 = vld [vmem:[%s9611_s27 + $0x1c0] sm:$0xf]  ;;  %v8492_v20 = vld [vmem:[%s9611_s27 + $0x1c4] sm:$0xf]  ;;  %v5911_v23 = vld [vmem:[%s9611_s27 + $0x1c8] sm:$0xf] }
 0x212   : > { %v8496_v19 = vld [vmem:[%s9611_s27 + $0x1dc] sm:$0xf0]  ;;  %v5905_v22 = vld [vmem:[%s9611_s27 + $0x1e0] sm:$0xf0]  ;;  %v8497_v24 = vld [vmem:[%s9611_s27 + $0x1e4] sm:$0xf0] }
 0x213   : > { %v5904_v21 = vor.u32 %v8496_v19, %v5903_v18  ;;  %v5908_v25 = vor.u32 %v8492_v20, %v5905_v22  ;;  %v5912_v26 = vor.u32 %v8497_v24, %v5911_v23  ;;  %v8493_v27 = vld [vmem:[%s9611_s27 + $0x1cc] sm:$0xf]  ;;  %v5871_v29 = vld [vmem:[%s9611_s27 + $0x180] sm:$0xf]  ;;  %v8484_v32 = vld [vmem:[%s9611_s27 + $0x184] sm:$0xf] }
 0x214   : > { %v5913_v28 = vld [vmem:[%s9611_s27 + $0x1e8] sm:$0xf0]  ;;  %v8488_v31 = vld [vmem:[%s9611_s27 + $0x19c] sm:$0xf0]  ;;  %v5873_v33 = vld [vmem:[%s9611_s27 + $0x1a0] sm:$0xf0] }
 0x215   : > { %1055 = vmatpush.bf16.msra.mxu0 %v5904_v21  ;;  %v5916_v30 = vor.u32 %v8493_v27, %v5913_v28  ;;  %1068 = vmatpush.bf16.msra.mxu1 %v5908_v25  ;;  %v5872_v34 = vor.u32 %v8488_v31, %v5871_v29  ;;  %v5876_v35 = vor.u32 %v8484_v32, %v5873_v33  ;;  %v5879_v36 = vld [vmem:[%s9611_s27 + $0x188] sm:$0xf]  ;;  %v8485_v38 = vld [vmem:[%s9611_s27 + $0x18c] sm:$0xf]  ;;  %v5839_v41 = vld [vmem:[%s9611_s27 + $0x140] sm:$0xf] }
 0x216   : > { %1081 = vmatpush.bf16.msra.mxu2 %v5912_v26  ;;  %v8489_v37 = vld [vmem:[%s9611_s27 + $0x1a4] sm:$0xf0]  ;;  %v5881_v40 = vld [vmem:[%s9611_s27 + $0x1a8] sm:$0xf0]  ;;  %v8480_v42 = vld [vmem:[%s9611_s27 + $0x15c] sm:$0xf0] }
 0x217   : > { %1094 = vmatpush.bf16.msra.mxu3 %v5916_v30  ;;  %v5880_v39 = vor.u32 %v8489_v37, %v5879_v36  ;;  %v5884_v43 = vor.u32 %v8485_v38, %v5881_v40  ;;  %v8476_v44 = vld [vmem:[%s9611_s27 + $0x144] sm:$0xf]  ;;  %v5847_v46 = vld [vmem:[%s9611_s27 + $0x148] sm:$0xf]  ;;  %v5840_v47 = vor.u32 %v8480_v42, %v5839_v41  ;;  %v8477_v49 = vld [vmem:[%s9611_s27 + $0x14c] sm:$0xf] }
 0x218   : > { %v5841_v45 = vld [vmem:[%s9611_s27 + $0x160] sm:$0xf0]  ;;  %v8481_v48 = vld [vmem:[%s9611_s27 + $0x164] sm:$0xf0]  ;;  %v5849_v50 = vld [vmem:[%s9611_s27 + $0x168] sm:$0xf0] }
 0x219   : > { %1056 = vmatpush.bf16.msra.mxu0 %v5872_v34  ;;  %1069 = vmatpush.bf16.msra.mxu1 %v5876_v35  ;;  %v5844_v51 = vor.u32 %v8476_v44, %v5841_v45  ;;  %v5848_v52 = vor.u32 %v8481_v48, %v5847_v46  ;;  %v5807_v53 = vld [vmem:[%s9611_s27 + $0x100] sm:$0xf]  ;;  %v8468_v55 = vld [vmem:[%s9611_s27 + $0x104] sm:$0xf]  ;;  %v5852_v56 = vor.u32 %v8477_v49, %v5849_v50  ;;  %v5815_v58 = vld [vmem:[%s9611_s27 + $0x108] sm:$0xf] }
 0x21a   : > { %1082 = vmatpush.bf16.msra.mxu2 %v5880_v39  ;;  %v8472_v54 = vld [vmem:[%s9611_s27 + $0x11c] sm:$0xf0]  ;;  %v5809_v57 = vld [vmem:[%s9611_s27 + $0x120] sm:$0xf0]  ;;  %v8473_v59 = vld [vmem:[%s9611_s27 + $0x124] sm:$0xf0] }
 0x21b   : > { %1095 = vmatpush.bf16.msra.mxu3 %v5884_v43  ;;  %v8469_v60 = vld [vmem:[%s9611_s27 + $0x10c] sm:$0xf]  ;;  %v5808_v62 = vor.u32 %v8472_v54, %v5807_v53  ;;  %v5812_v63 = vor.u32 %v8468_v55, %v5809_v57  ;;  %v5816_v0 = vor.u32 %v8473_v59, %v5815_v58  ;;  %v5775_v1 = vld [vmem:[%s9611_s27 + $0xc0] sm:$0xf]  ;;  %v8460_v3 = vld [vmem:[%s9611_s27 + $0xc4] sm:$0xf] }
 0x21c   : > { %v5817_v61 = vld [vmem:[%s9611_s27 + $0x128] sm:$0xf0]  ;;  %v8464_v2 = vld [vmem:[%s9611_s27 + $0xdc] sm:$0xf0]  ;;  %v5777_v5 = vld [vmem:[%s9611_s27 + $0xe0] sm:$0xf0] }
 0x21d   : > { %1057 = vmatpush.bf16.msra.mxu0 %v5840_v47  ;;  %1070 = vmatpush.bf16.msra.mxu1 %v5844_v51  ;;  %v5820_v4 = vor.u32 %v8469_v60, %v5817_v61  ;;  %v5783_v6 = vld [vmem:[%s9611_s27 + $0xc8] sm:$0xf]  ;;  %v8461_v8 = vld [vmem:[%s9611_s27 + $0xcc] sm:$0xf]  ;;  %v5776_v10 = vor.u32 %v8464_v2, %v5775_v1  ;;  %v5780_v11 = vor.u32 %v8460_v3, %v5777_v5  ;;  %v5743_v13 = vld [vmem:[%s9611_s27 + $0x80] sm:$0xf] }
 0x21e   : > { %1083 = vmatpush.bf16.msra.mxu2 %v5848_v52  ;;  %v8465_v7 = vld [vmem:[%s9611_s27 + $0xe4] sm:$0xf0]  ;;  %v5785_v9 = vld [vmem:[%s9611_s27 + $0xe8] sm:$0xf0]  ;;  %v8456_v14 = vld [vmem:[%s9611_s27 + $0x9c] sm:$0xf0] }
 0x21f   : > { %1096 = vmatpush.bf16.msra.mxu3 %v5852_v56  ;;  %v5784_v12 = vor.u32 %v8465_v7, %v5783_v6  ;;  %v8452_v15 = vld [vmem:[%s9611_s27 + $0x84] sm:$0xf]  ;;  %v5788_v16 = vor.u32 %v8461_v8, %v5785_v9  ;;  %v5751_v18 = vld [vmem:[%s9611_s27 + $0x88] sm:$0xf]  ;;  %v8453_v20 = vld [vmem:[%s9611_s27 + $0x8c] sm:$0xf]  ;;  %v5744_v22 = vor.u32 %v8456_v14, %v5743_v13 }
 0x220   : > { %v5745_v17 = vld [vmem:[%s9611_s27 + $0xa0] sm:$0xf0]  ;;  %v8457_v19 = vld [vmem:[%s9611_s27 + $0xa4] sm:$0xf0]  ;;  %v5753_v21 = vld [vmem:[%s9611_s27 + $0xa8] sm:$0xf0] }
 0x221   : > { %1058 = vmatpush.bf16.msra.mxu0 %v5808_v62  ;;  %1071 = vmatpush.bf16.msra.mxu1 %v5812_v63  ;;  %v5748_v23 = vor.u32 %v8452_v15, %v5745_v17  ;;  %v5752_v24 = vor.u32 %v8457_v19, %v5751_v18  ;;  %v5711_v25 = vld [vmem:[%s9611_s27 + $0x40] sm:$0xf]  ;;  %v8444_v27 = vld [vmem:[%s9611_s27 + $0x44] sm:$0xf]  ;;  %v5756_v28 = vor.u32 %v8453_v20, %v5753_v21  ;;  %v5719_v30 = vld [vmem:[%s9611_s27 + $0x48] sm:$0xf] }
 0x222   : > { %1084 = vmatpush.bf16.msra.mxu2 %v5816_v0  ;;  %v8448_v26 = vld [vmem:[%s9611_s27 + $0x5c] sm:$0xf0]  ;;  %v5713_v29 = vld [vmem:[%s9611_s27 + $0x60] sm:$0xf0]  ;;  %v8449_v31 = vld [vmem:[%s9611_s27 + $0x64] sm:$0xf0] }
 0x223   : > { %1097 = vmatpush.bf16.msra.mxu3 %v5820_v4  ;;  %v8445_v32 = vld [vmem:[%s9611_s27 + $0x4c] sm:$0xf]  ;;  %v5712_v34 = vor.u32 %v8448_v26, %v5711_v25  ;;  %v5679_v35 = vld [vmem:[%s9611_s27] sm:$0xf]  ;;  %v5716_v37 = vor.u32 %v8444_v27, %v5713_v29  ;;  %v5720_v38 = vor.u32 %v8449_v31, %v5719_v30  ;;  %v8436_v39 = vld [vmem:[%s9611_s27 + $0x4] sm:$0xf] }
 0x224   : > { %v5721_v33 = vld [vmem:[%s9611_s27 + $0x68] sm:$0xf0]  ;;  %v8440_v36 = vld [vmem:[%s9611_s27 + $0x1c] sm:$0xf0]  ;;  %v5681_v40 = vld [vmem:[%s9611_s27 + $0x20] sm:$0xf0] }
 0x225   : > { %1059 = vmatpush.bf16.msra.mxu0 %v5776_v10  ;;  %1072 = vmatpush.bf16.msra.mxu1 %v5780_v11  ;;  %v5687_v41 = vld [vmem:[%s9611_s27 + $0x8] sm:$0xf]  ;;  %v5724_v42 = vor.u32 %v8445_v32, %v5721_v33  ;;  %v8437_v44 = vld [vmem:[%s9611_s27 + $0xc] sm:$0xf]  ;;  %v5919_v46 = vld [vmem:[%s9611_s27 + $0x1d0] sm:$0xf]  ;;  %v5680_v49 = vor.u32 %v8440_v36, %v5679_v35  ;;  %v5684_v53 = vor.u32 %v8436_v39, %v5681_v40 }
 0x226   : > { %1085 = vmatpush.bf16.msra.mxu2 %v5784_v12  ;;  %v8441_v43 = vld [vmem:[%s9611_s27 + $0x24] sm:$0xf0]  ;;  %v5689_v45 = vld [vmem:[%s9611_s27 + $0x28] sm:$0xf0]  ;;  %v8498_v47 = vld [vmem:[%s9611_s27 + $0x1ec] sm:$0xf0] }
 0x227   : > { %1098 = vmatpush.bf16.msra.mxu3 %v5788_v16  ;;  %v8494_v48 = vld [vmem:[%s9611_s27 + $0x1d4] sm:$0xf]  ;;  %v5927_v51 = vld [vmem:[%s9611_s27 + $0x1d8] sm:$0xf]  ;;  %v5688_v54 = vor.u32 %v8441_v43, %v5687_v41  ;;  %v8495_v55 = vld [vmem:[%s9611_s27 + $0x1dc] sm:$0xf]  ;;  %v5692_v57 = vor.u32 %v8437_v44, %v5689_v45  ;;  %v5920_v58 = vor.u32 %v8498_v47, %v5919_v46 }
 0x228   : > { %v5921_v50 = vld [vmem:[%s9611_s27 + $0x1f0] sm:$0xf0]  ;;  %v8499_v52 = vld [vmem:[%s9611_s27 + $0x1f4] sm:$0xf0]  ;;  %v5929_v56 = vld [vmem:[%s9611_s27 + $0x1f8] sm:$0xf0] }
 0x229   : > { %1060 = vmatpush.bf16.msra.mxu0 %v5744_v22  ;;  %1073 = vmatpush.bf16.msra.mxu1 %v5748_v23  ;;  %v5924_v59 = vor.u32 %v8494_v48, %v5921_v50  ;;  %v5928_v60 = vor.u32 %v8499_v52, %v5927_v51  ;;  %v5887_v61 = vld [vmem:[%s9611_s27 + $0x190] sm:$0xf]  ;;  %v8486_v63 = vld [vmem:[%s9611_s27 + $0x194] sm:$0xf]  ;;  %v5932_v0 = vor.u32 %v8495_v55, %v5929_v56  ;;  %v5895_v2 = vld [vmem:[%s9611_s27 + $0x198] sm:$0xf] }
 0x22a   : > { %1086 = vmatpush.bf16.msra.mxu2 %v5752_v24  ;;  %v8490_v62 = vld [vmem:[%s9611_s27 + $0x1ac] sm:$0xf0]  ;;  %v5889_v1 = vld [vmem:[%s9611_s27 + $0x1b0] sm:$0xf0]  ;;  %v8491_v3 = vld [vmem:[%s9611_s27 + $0x1b4] sm:$0xf0] }
 0x22b   : > { %1099 = vmatpush.bf16.msra.mxu3 %v5756_v28  ;;  %v8487_v4 = vld [vmem:[%s9611_s27 + $0x19c] sm:$0xf]  ;;  %v5888_v6 = vor.u32 %v8490_v62, %v5887_v61  ;;  %v5892_v7 = vor.u32 %v8486_v63, %v5889_v1  ;;  %v5896_v8 = vor.u32 %v8491_v3, %v5895_v2  ;;  %v5855_v9 = vld [vmem:[%s9611_s27 + $0x150] sm:$0xf]  ;;  %v8478_v11 = vld [vmem:[%s9611_s27 + $0x154] sm:$0xf] }
 0x22c   : > { %v5897_v5 = vld [vmem:[%s9611_s27 + $0x1b8] sm:$0xf0]  ;;  %v8482_v10 = vld [vmem:[%s9611_s27 + $0x16c] sm:$0xf0]  ;;  %v5857_v13 = vld [vmem:[%s9611_s27 + $0x170] sm:$0xf0] }
 0x22d   : > { %1061 = vmatpush.bf16.msra.mxu0 %v5712_v34  ;;  %1074 = vmatpush.bf16.msra.mxu1 %v5716_v37  ;;  %v5900_v12 = vor.u32 %v8487_v4, %v5897_v5  ;;  %v5863_v14 = vld [vmem:[%s9611_s27 + $0x158] sm:$0xf]  ;;  %v8479_v16 = vld [vmem:[%s9611_s27 + $0x15c] sm:$0xf]  ;;  %v5823_v18 = vld [vmem:[%s9611_s27 + $0x110] sm:$0xf]  ;;  %v5856_v19 = vor.u32 %v8482_v10, %v5855_v9  ;;  %v5860_v22 = vor.u32 %v8478_v11, %v5857_v13 }
 0x22e   : > { %1087 = vmatpush.bf16.msra.mxu2 %v5720_v38  ;;  %v8483_v15 = vld [vmem:[%s9611_s27 + $0x174] sm:$0xf0]  ;;  %v5865_v17 = vld [vmem:[%s9611_s27 + $0x178] sm:$0xf0]  ;;  %v8474_v20 = vld [vmem:[%s9611_s27 + $0x12c] sm:$0xf0] }
 0x22f   : > { %1100 = vmatpush.bf16.msra.mxu3 %v5724_v42  ;;  %v8470_v21 = vld [vmem:[%s9611_s27 + $0x114] sm:$0xf]  ;;  %s5674_s11 = sshll.u32 %s9511_s12, 3  ;;  %v5864_v23 = vor.u32 %v8483_v15, %v5863_v14  ;;  %v5831_v25 = vld [vmem:[%s9611_s27 + $0x118] sm:$0xf]  ;;  %v5868_v26 = vor.u32 %v8479_v16, %v5865_v17  ;;  %v5824_v34 = vor.u32 %v8474_v20, %v5823_v18  ;;  %vm731_vm3 = vcmask 1041409  }
 0x230   : > { %v5825_v24 = vld [vmem:[%s9611_s27 + $0x130] sm:$0xf0]  ;;  %v8475_v27 = vld [vmem:[%s9611_s27 + $0x134] sm:$0xf0]  ;;  %s651_s24 = scalar_lea.vmem [#allocation2], %s5674_s11  ;;  %vm1173_vm4 = vcmask 1041408  }
 0x231   : > { %1062 = vmatpush.bf16.msra.mxu0 %v5680_v49  ;;  %1075 = vmatpush.bf16.msra.mxu1 %v5684_v53  ;;  %v652_v28 = vld [vmem:[%s651_s24] sm:$0xff]  ;;  %v653_v29 = vld [vmem:[%s651_s24 + $0x10] sm:$0xff]  ;;  %v5828_v35 = vor.u32 %v8470_v21, %v5825_v24  ;;  %v5832_v36 = vor.u32 %v8475_v27, %v5831_v25  ;;  %v5791_v37 = vld [vmem:[%s9611_s27 + $0xd0] sm:$0xf]  ;;  %vm1175_vm5 = vcmask 1045508   ;;  %vm1177_vm6 = vcmask 1043456  }
 0x232   : > { %1088 = vmatpush.bf16.msra.mxu2 %v5688_v54  ;;  %v8471_v30 = vld [vmem:[%s9611_s27 + $0x11c] sm:$0xf]  ;;  %v654_v32 = vpack.c.bf16 %v652_v28, %v652_v28  ;;  %v655_v33 = vpack.c.bf16 %v653_v29, %v653_v29  ;;  %v8466_v38 = vld [vmem:[%s9611_s27 + $0xec] sm:$0xf0]  ;;  %v8462_v39 = vld [vmem:[%s9611_s27 + $0xd4] sm:$0xf] }
 0x233   : > { %1101 = vmatpush.bf16.msra.mxu3 %v5692_v57  ;;  %v5833_v31 = vld [vmem:[%s9611_s27 + $0x138] sm:$0xf0]  ;;  %v5793_v43 = vld [vmem:[%s9611_s27 + $0xf0] sm:$0xf0]  ;;  %v5799_v44 = vld [vmem:[%s9611_s27 + $0xd8] sm:$0xf]  ;;  %v5792_v50 = vor.u32 %v8466_v38, %v5791_v37 }
 0x234   : > { %v724_v40 = vunpack.c.l.b16 %v654_v32  ;;  %v725_v41 = vunpack.c.l.b16 %v655_v33  ;;  %v5836_v42 = vor.u32 %v8471_v30, %v5833_v31  ;;  %v8467_v45 = vld [vmem:[%s9611_s27 + $0xf4] sm:$0xf0]  ;;  %v8463_v46 = vld [vmem:[%s9611_s27 + $0xdc] sm:$0xf]  ;;  %v5759_v51 = vld [vmem:[%s9611_s27 + $0x90] sm:$0xf]  ;;  %v5796_v52 = vor.u32 %v8462_v39, %v5793_v43 }
 0x235   : > { %1107 = vmatpush.bf16.msrb.mxu0 %v5920_v58  ;;  %1120 = vmatpush.bf16.msrb.mxu1 %v5924_v59  ;;  %v5801_v47 = vld [vmem:[%s9611_s27 + $0xf8] sm:$0xf0]  ;;  %v5800_v53 = vor.u32 %v8467_v45, %v5799_v44  ;;  %v8458_v54 = vld [vmem:[%s9611_s27 + $0xac] sm:$0xf0]  ;;  %v8454_v55 = vld [vmem:[%s9611_s27 + $0x94] sm:$0xf] }
 0x236   : > { %1133 = vmatpush.bf16.msrb.mxu2 %v5928_v60  ;;  %v9905_v48 = vunpack.i.l.s16 %v724_v40  ;;  %v9907_v49 = vunpack.i.l.s16 %v725_v41  ;;  %v5804_v57 = vor.u32 %v8463_v46, %v5801_v47  ;;  %v5761_v58 = vld [vmem:[%s9611_s27 + $0xb0] sm:$0xf0]  ;;  %v5767_v59 = vld [vmem:[%s9611_s27 + $0x98] sm:$0xf]  ;;  %v8455_v61 = vld [vmem:[%s9611_s27 + $0x9c] sm:$0xf] }
 0x237   : > { %1146 = vmatpush.bf16.msrb.mxu3 %v5932_v0  ;;  %v8459_v60 = vld [vmem:[%s9611_s27 + $0xb4] sm:$0xf0]  ;;  %v5769_v62 = vld [vmem:[%s9611_s27 + $0xb8] sm:$0xf0]  ;;  %v5760_v0 = vor.u32 %v8458_v54, %v5759_v51  ;;  %v5764_v2 = vor.u32 %v8454_v55, %v5761_v58  ;;  %v5727_v4 = vld [vmem:[%s9611_s27 + $0x50] sm:$0xf] }
 0x238   : > { %v730_v56 = vrot.slane %v9907_v49, 7  ;;  %v5768_v3 = vor.u32 %v8459_v60, %v5767_v59  ;;  %v8450_v5 = vld [vmem:[%s9611_s27 + $0x6c] sm:$0xf0]  ;;  %v5735_v9 = vld [vmem:[%s9611_s27 + $0x58] sm:$0xf]  ;;  %p8173_p1 = scmp.ne.s32.totalorder %s9511_s12, 1 }
 0x239   : > { %1108 = vmatpush.bf16.msrb.mxu0 %v5888_v6  ;;  %1121 = vmatpush.bf16.msrb.mxu1 %v5892_v7  ;;  %v8446_v6 = vld [vmem:[%s9611_s27 + $0x54] sm:$0xf]  ;;  %v5772_v7 = vor.u32 %v8455_v61, %v5769_v62  ;;  %v8451_v10 = vld [vmem:[%s9611_s27 + $0x74] sm:$0xf0]  ;;  %v8447_v11 = vld [vmem:[%s9611_s27 + $0x5c] sm:$0xf]  ;;  %v5728_v13 = vor.u32 %v8450_v5, %v5727_v4 }
 0x23a   : > { %1134 = vmatpush.bf16.msrb.mxu2 %v5896_v8  ;;  %v732_v63 = vsel %vm731_vm3, %v730_v56, %v9905_v48  ;;  %v5729_v8 = vld [vmem:[%s9611_s27 + $0x70] sm:$0xf0]  ;;  %v5695_v14 = vld [vmem:[%s9611_s27 + $0x10] sm:$0xf]  ;;  %v5736_v17 = vor.u32 %v8451_v10, %v5735_v9  ;;  %v5703_v20 = vld [vmem:[%s9611_s27 + $0x18] sm:$0xf] }
 0x23b   : > { %1147 = vmatpush.bf16.msrb.mxu3 %v5900_v12  ;;  %v9920_v1 = vpack.c.b16 %v732_v63, %v732_v63  ;;  %v5737_v12 = vld [vmem:[%s9611_s27 + $0x78] sm:$0xf0]  ;;  %v8442_v15 = vld [vmem:[%s9611_s27 + $0x2c] sm:$0xf0]  ;;  %v5732_v16 = vor.u32 %v8446_v6, %v5729_v8  ;;  %v8438_v18 = vld [vmem:[%s9611_s27 + $0x14] sm:$0xf] }
 0x23c   : > { %v5740_v21 = vor.u32 %v8447_v11, %v5737_v12  ;;  %v5705_v24 = vld [vmem:[%s9611_s27 + $0x38] sm:$0xf0]  ;;  %v6223_v25 = vld [vmem:[%s9611_s27 + $0x3c0] sm:$0xf]  ;;  %v8556_v27 = vld [vmem:[%s9611_s27 + $0x3c4] sm:$0xf]  ;;  %v5696_v28 = vor.u32 %v8442_v15, %v5695_v14 }
 0x23d   : > { %1109 = vmatpush.bf16.msrb.mxu0 %v5856_v19  ;;  %1122 = vmatpush.bf16.msrb.mxu1 %v5860_v22  ;;  %v5697_v19 = vld [vmem:[%s9611_s27 + $0x30] sm:$0xf0]  ;;  %v8443_v22 = vld [vmem:[%s9611_s27 + $0x34] sm:$0xf0]  ;;  %v6225_v29 = vld [vmem:[%s9611_s27 + $0x3e0] sm:$0xf0] }
 0x23e   : > { %1135 = vmatpush.bf16.msrb.mxu2 %v5864_v23  ;;  %1102 = vmatmul.bf16.vlgmr.msra.gmra.mxu3 %v9920_v1  ;;  %v8439_v23 = vld [vmem:[%s9611_s27 + $0x1c] sm:$0xf]  ;;  %v6231_v30 = vld [vmem:[%s9611_s27 + $0x3c8] sm:$0xf]  ;;  %v5700_v32 = vor.u32 %v8438_v18, %v5697_v19  ;;  %v5704_v33 = vor.u32 %v8443_v22, %v5703_v20  ;;  %v6228_v38 = vor.u32 %v8556_v27, %v6225_v29  ;;  %v6191_v40 = vld [vmem:[%s9611_s27 + $0x380] sm:$0xf] }
 0x23f   : > { %1148 = vmatpush.bf16.msrb.mxu3 %v5868_v26  ;;  %1089 = vmatmul.bf16.vlgmr.msra.gmra.mxu2 %v9920_v1  ;;  %v8560_v26 = vld [vmem:[%s9611_s27 + $0x3dc] sm:$0xf0]  ;;  %v8561_v31 = vld [vmem:[%s9611_s27 + $0x3e4] sm:$0xf0]  ;;  %v6193_v44 = vld [vmem:[%s9611_s27 + $0x3a0] sm:$0xf0] }
 0x240   : > { %1063 = vmatmul.bf16.vlgmr.msra.gmra.mxu0 %v9920_v1  ;;  %1076 = vmatmul.bf16.vlgmr.msra.gmra.mxu1 %v9920_v1  ;;  %v6224_v37 = vor.u32 %v8560_v26, %v6223_v25  ;;  %v6232_v39 = vor.u32 %v8561_v31, %v6231_v30  ;;  %v8552_v41 = vld [vmem:[%s9611_s27 + $0x39c] sm:$0xf0]  ;;  %v6199_v45 = vld [vmem:[%s9611_s27 + $0x388] sm:$0xf]  ;;  %v8549_v47 = vld [vmem:[%s9611_s27 + $0x38c] sm:$0xf] }
 0x241   : > { %1110 = vmatpush.bf16.msrb.mxu0 %v5824_v34  ;;  %1123 = vmatpush.bf16.msrb.mxu1 %v5828_v35  ;;  %v8557_v34 = vld [vmem:[%s9611_s27 + $0x3cc] sm:$0xf]  ;;  %v8553_v46 = vld [vmem:[%s9611_s27 + $0x3a4] sm:$0xf0]  ;;  %v6192_v51 = vor.u32 %v8552_v41, %v6191_v40  ;;  %v6159_v54 = vld [vmem:[%s9611_s27 + $0x340] sm:$0xf] }
 0x242   : > { %1136 = vmatpush.bf16.msrb.mxu2 %v5832_v36  ;;  %v6233_v35 = vld [vmem:[%s9611_s27 + $0x3e8] sm:$0xf0]  ;;  %v5708_v36 = vor.u32 %v8439_v23, %v5705_v24  ;;  %v8544_v55 = vld [vmem:[%s9611_s27 + $0x35c] sm:$0xf0]  ;;  %v8540_v56 = vld [vmem:[%s9611_s27 + $0x344] sm:$0xf] }
 0x243   : > { %1149 = vmatpush.bf16.msrb.mxu3 %v5836_v42  ;;  %v8548_v42 = vld [vmem:[%s9611_s27 + $0x384] sm:$0xf]  ;;  %v6236_v43 = vor.u32 %v8557_v34, %v6233_v35  ;;  %v6167_v59 = vld [vmem:[%s9611_s27 + $0x348] sm:$0xf]  ;;  %v8541_v61 = vld [vmem:[%s9611_s27 + $0x34c] sm:$0xf]  ;;  %v6160_v63 = vor.u32 %v8544_v55, %v6159_v54 }
 0x244   : > { %v6161_v58 = vld [vmem:[%s9611_s27 + $0x360] sm:$0xf0]  ;;  %v8545_v60 = vld [vmem:[%s9611_s27 + $0x364] sm:$0xf0]  ;;  %v6169_v62 = vld [vmem:[%s9611_s27 + $0x368] sm:$0xf0] }
 0x245   : > { %1111 = vmatpush.bf16.msrb.mxu0 %v5792_v50  ;;  %1124 = vmatpush.bf16.msrb.mxu1 %v5796_v52  ;;  %v6201_v50 = vld [vmem:[%s9611_s27 + $0x3a8] sm:$0xf0]  ;;  %v6196_v52 = vor.u32 %v8548_v42, %v6193_v44  ;;  %v8536_v4 = vld [vmem:[%s9611_s27 + $0x31c] sm:$0xf0]  ;;  %v8532_v5 = vld [vmem:[%s9611_s27 + $0x304] sm:$0xf]  ;;  %v6172_v6 = vor.u32 %v8541_v61, %v6169_v62 }
 0x246   : > { %1137 = vmatpush.bf16.msrb.mxu2 %v5800_v53  ;;  %v6200_v53 = vor.u32 %v8553_v46, %v6199_v45  ;;  %v6135_v8 = vld [vmem:[%s9611_s27 + $0x308] sm:$0xf]  ;;  %v8533_v10 = vld [vmem:[%s9611_s27 + $0x30c] sm:$0xf]  ;;  %v6095_v15 = vld [vmem:[%s9611_s27 + $0x2c0] sm:$0xf] }
 0x247   : > { %1150 = vmatpush.bf16.msrb.mxu3 %v5804_v57  ;;  %v6204_v57 = vor.u32 %v8549_v47, %v6201_v50  ;;  %v8537_v9 = vld [vmem:[%s9611_s27 + $0x324] sm:$0xf0]  ;;  %v6137_v11 = vld [vmem:[%s9611_s27 + $0x328] sm:$0xf0]  ;;  %v6097_v19 = vld [vmem:[%s9611_s27 + $0x2e0] sm:$0xf0] }
 0x248   : > { %v6136_v14 = vor.u32 %v8537_v9, %v6135_v8  ;;  %v6140_v18 = vor.u32 %v8533_v10, %v6137_v11  ;;  %v6103_v20 = vld [vmem:[%s9611_s27 + $0x2c8] sm:$0xf]  ;;  %v6105_v22 = vld [vmem:[%s9611_s27 + $0x2e8] sm:$0xf0]  ;;  %v6063_v26 = vld [vmem:[%s9611_s27 + $0x280] sm:$0xf] }
 0x249   : > { %1112 = vmatpush.bf16.msrb.mxu0 %v5760_v0  ;;  %1125 = vmatpush.bf16.msrb.mxu1 %v5764_v2  ;;  %v6164_v0 = vor.u32 %v8540_v56, %v6161_v58  ;;  %v6168_v2 = vor.u32 %v8545_v60, %v6167_v59  ;;  %v8520_v27 = vld [vmem:[%s9611_s27 + $0x29c] sm:$0xf0]  ;;  %v6065_v30 = vld [vmem:[%s9611_s27 + $0x2a0] sm:$0xf0]  ;;  %v6071_v31 = vld [vmem:[%s9611_s27 + $0x288] sm:$0xf] }
 0x24a   : > { %1138 = vmatpush.bf16.msrb.mxu2 %v5768_v3  ;;  %v6127_v3 = vld [vmem:[%s9611_s27 + $0x300] sm:$0xf]  ;;  %v6073_v34 = vld [vmem:[%s9611_s27 + $0x2a8] sm:$0xf0]  ;;  %v6064_v35 = vor.u32 %v8520_v27, %v6063_v26  ;;  %v8508_v40 = vld [vmem:[%s9611_s27 + $0x244] sm:$0xf] }
 0x24b   : > { %1151 = vmatpush.bf16.msrb.mxu3 %v5772_v7  ;;  %v6129_v7 = vld [vmem:[%s9611_s27 + $0x320] sm:$0xf0]  ;;  %v6128_v12 = vor.u32 %v8536_v4, %v6127_v3  ;;  %v8513_v44 = vld [vmem:[%s9611_s27 + $0x264] sm:$0xf0]  ;;  %v8509_v45 = vld [vmem:[%s9611_s27 + $0x24c] sm:$0xf] }
 0x24c   : > { %v6033_v42 = vld [vmem:[%s9611_s27 + $0x260] sm:$0xf0]  ;;  %v6041_v46 = vld [vmem:[%s9611_s27 + $0x268] sm:$0xf0]  ;;  %v5999_v50 = vld [vmem:[%s9611_s27 + $0x200] sm:$0xf] }
 0x24d   : > { %1113 = vmatpush.bf16.msrb.mxu0 %v5728_v13  ;;  %1126 = vmatpush.bf16.msrb.mxu1 %v5732_v16  ;;  %v6132_v13 = vor.u32 %v8532_v5, %v6129_v7  ;;  %v8528_v16 = vld [vmem:[%s9611_s27 + $0x2dc] sm:$0xf0]  ;;  %v6001_v55 = vld [vmem:[%s9611_s27 + $0x220] sm:$0xf0]  ;;  %v6007_v56 = vld [vmem:[%s9611_s27 + $0x208] sm:$0xf]  ;;  %v6044_v58 = vor.u32 %v8509_v45, %v6041_v46 }
 0x24e   : > { %1139 = vmatpush.bf16.msrb.mxu2 %v5736_v17  ;;  %v8524_v17 = vld [vmem:[%s9611_s27 + $0x2c4] sm:$0xf]  ;;  %v6096_v23 = vor.u32 %v8528_v16, %v6095_v15  ;;  %v8505_v59 = vld [vmem:[%s9611_s27 + $0x224] sm:$0xf0]  ;;  %v8501_v60 = vld [vmem:[%s9611_s27 + $0x20c] sm:$0xf] }
 0x24f   : > { %1152 = vmatpush.bf16.msrb.mxu3 %v5740_v21  ;;  %v8525_v21 = vld [vmem:[%s9611_s27 + $0x2cc] sm:$0xf]  ;;  %v6100_v24 = vor.u32 %v8524_v17, %v6097_v19  ;;  %v6239_v62 = vld [vmem:[%s9611_s27 + $0x3d0] sm:$0xf]  ;;  %v6241_v3 = vld [vmem:[%s9611_s27 + $0x3f0] sm:$0xf0]  ;;  %v6008_v7 = vor.u32 %v8505_v59, %v6007_v56 }
 0x250   : > { %v6108_v29 = vor.u32 %v8525_v21, %v6105_v22  ;;  %v6009_v61 = vld [vmem:[%s9611_s27 + $0x228] sm:$0xf0]  ;;  %v6247_v4 = vld [vmem:[%s9611_s27 + $0x3d8] sm:$0xf]  ;;  %v8559_v8 = vld [vmem:[%s9611_s27 + $0x3dc] sm:$0xf] }
 0x251   : > { %1114 = vmatpush.bf16.msrb.mxu0 %v5696_v28  ;;  %1127 = vmatpush.bf16.msrb.mxu1 %v5700_v32  ;;  %v8516_v28 = vld [vmem:[%s9611_s27 + $0x284] sm:$0xf]  ;;  %v8521_v32 = vld [vmem:[%s9611_s27 + $0x2a4] sm:$0xf0]  ;;  %v8563_v5 = vld [vmem:[%s9611_s27 + $0x3f4] sm:$0xf0]  ;;  %v6012_v11 = vor.u32 %v8501_v60, %v6009_v61 }
 0x252   : > { %1140 = vmatpush.bf16.msrb.mxu2 %v5704_v33  ;;  %v8517_v33 = vld [vmem:[%s9611_s27 + $0x28c] sm:$0xf]  ;;  %v6249_v9 = vld [vmem:[%s9611_s27 + $0x3f8] sm:$0xf0]  ;;  %v6207_v15 = vld [vmem:[%s9611_s27 + $0x390] sm:$0xf] }
 0x253   : > { %1153 = vmatpush.bf16.msrb.mxu3 %v5708_v36  ;;  %v6068_v36 = vor.u32 %v8516_v28, %v6065_v30  ;;  %v6076_v41 = vor.u32 %v8517_v33, %v6073_v34  ;;  %v8554_v16 = vld [vmem:[%s9611_s27 + $0x3ac] sm:$0xf0]  ;;  %v8550_v17 = vld [vmem:[%s9611_s27 + $0x394] sm:$0xf]  ;;  %v8555_v21 = vld [vmem:[%s9611_s27 + $0x3b4] sm:$0xf0] }
 0x254   : > { %1128 = vmatmul.bf16.vlgmr.msrb.gmra.mxu1 %v9920_v1  ;;  %1115 = vmatmul.bf16.vlgmr.msrb.gmra.mxu0 %v9920_v1  ;;  %v8551_v22 = vld [vmem:[%s9611_s27 + $0x39c] sm:$0xf]  ;;  %v6175_v27 = vld [vmem:[%s9611_s27 + $0x350] sm:$0xf]  ;;  %v8547_v33 = vld [vmem:[%s9611_s27 + $0x374] sm:$0xf0] }
 0x255   : > { %1575 = vmatpush.bf16.msra.mxu0 %v6224_v37  ;;  %1588 = vmatpush.bf16.msra.mxu1 %v6228_v38  ;;  %v6072_v37 = vor.u32 %v8521_v32, %v6071_v31  ;;  %v6031_v38 = vld [vmem:[%s9611_s27 + $0x240] sm:$0xf]  ;;  %v8546_v28 = vld [vmem:[%s9611_s27 + $0x36c] sm:$0xf0]  ;;  %v6177_v31 = vld [vmem:[%s9611_s27 + $0x370] sm:$0xf0] }
 0x256   : > { %1601 = vmatpush.bf16.msra.mxu2 %v6232_v39  ;;  %1154 = vmatmul.bf16.vlgmr.msrb.gmra.mxu3 %v9920_v1  ;;  %v8512_v39 = vld [vmem:[%s9611_s27 + $0x25c] sm:$0xf0]  ;;  %v6183_v32 = vld [vmem:[%s9611_s27 + $0x358] sm:$0xf]  ;;  %v8543_v34 = vld [vmem:[%s9611_s27 + $0x35c] sm:$0xf] }
 0x257   : > { %1614 = vmatpush.bf16.msra.mxu3 %v6236_v43  ;;  %1141 = vmatmul.bf16.vlgmr.msrb.gmra.mxu2 %v9920_v1  ;;  %v8529_v1 = vld [vmem:[%s9611_s27 + $0x2e4] sm:$0xf0]  ;;  %v6032_v47 = vor.u32 %v8512_v39, %v6031_v38  ;;  %v6184_v38 = vor.u32 %v8547_v33, %v6183_v32  ;;  %v6143_v39 = vld [vmem:[%s9611_s27 + $0x310] sm:$0xf]  ;;  %v8539_v45 = vld [vmem:[%s9611_s27 + $0x334] sm:$0xf0] }
 0x258   : > { %v6104_v25 = vor.u32 %v8529_v1, %v6103_v20  ;;  %v6039_v43 = vld [vmem:[%s9611_s27 + $0x248] sm:$0xf]  ;;  %v6209_v20 = vld [vmem:[%s9611_s27 + $0x3b0] sm:$0xf0]  ;;  %v6215_v1 = vld [vmem:[%s9611_s27 + $0x398] sm:$0xf] }
 0x259   : > { %1576 = vmatpush.bf16.msra.mxu0 %v6192_v51  ;;  %1589 = vmatpush.bf16.msra.mxu1 %v6196_v52  ;;  %v8504_v51 = vld [vmem:[%s9611_s27 + $0x21c] sm:$0xf0]  ;;  %v8500_v52 = vld [vmem:[%s9611_s27 + $0x204] sm:$0xf]  ;;  %v6040_v54 = vor.u32 %v8513_v44, %v6039_v43  ;;  %v6216_v26 = vor.u32 %v8555_v21, %v6215_v1  ;;  %v6145_v43 = vld [vmem:[%s9611_s27 + $0x330] sm:$0xf0] }
 0x25a   : > { %1602 = vmatpush.bf16.msra.mxu2 %v6200_v53  ;;  %v6036_v53 = vor.u32 %v8508_v40, %v6033_v42  ;;  %v8538_v40 = vld [vmem:[%s9611_s27 + $0x32c] sm:$0xf0]  ;;  %v6151_v44 = vld [vmem:[%s9611_s27 + $0x318] sm:$0xf]  ;;  %v8535_v46 = vld [vmem:[%s9611_s27 + $0x31c] sm:$0xf] }
 0x25b   : > { %1615 = vmatpush.bf16.msra.mxu3 %v6204_v57  ;;  %v1251_v57 = vrot.slane %v9905_v48, 1  ;;  %v8531_v59 = vld [vmem:[%s9611_s27 + $0x2f4] sm:$0xf0]  ;;  %v8527_v60 = vld [vmem:[%s9611_s27 + $0x2dc] sm:$0xf] }
 0x25c   : > { %v6121_v61 = vld [vmem:[%s9611_s27 + $0x2f8] sm:$0xf0]  ;;  %v8515_v1 = vld [vmem:[%s9611_s27 + $0x274] sm:$0xf0] }
 0x25d   : > { %1577 = vmatpush.bf16.msra.mxu0 %v6160_v63  ;;  %1590 = vmatpush.bf16.msra.mxu1 %v6164_v0  ;;  %v8562_v63 = vld [vmem:[%s9611_s27 + $0x3ec] sm:$0xf0]  ;;  %v8558_v0 = vld [vmem:[%s9611_s27 + $0x3d4] sm:$0xf]  ;;  %v1252_v10 = vsel %vm731_vm3, %v9907_v49, %v1251_v57  ;;  %v8511_v21 = vld [vmem:[%s9611_s27 + $0x25c] sm:$0xf] }
 0x25e   : > { %1603 = vmatpush.bf16.msra.mxu2 %v6168_v2  ;;  %v6000_v2 = vor.u32 %v8504_v51, %v5999_v50  ;;  %v10024_v19 = vpack.c.b16 %v1252_v10, %v1252_v10  ;;  %v6144_v50 = vor.u32 %v8538_v40, %v6143_v39  ;;  %v6113_v57 = vld [vmem:[%s9611_s27 + $0x2f0] sm:$0xf0]  ;;  %v6089_v10 = vld [vmem:[%s9611_s27 + $0x2b8] sm:$0xf0]  ;;  %v8507_v32 = vld [vmem:[%s9611_s27 + $0x234] sm:$0xf0] }
 0x25f   : > { %1616 = vmatpush.bf16.msra.mxu3 %v6172_v6  ;;  %v6004_v6 = vor.u32 %v8500_v52, %v6001_v55  ;;  %v6152_v52 = vor.u32 %v8539_v45, %v6151_v44  ;;  %v8526_v55 = vld [vmem:[%s9611_s27 + $0x2d4] sm:$0xf]  ;;  %v8503_v33 = vld [vmem:[%s9611_s27 + $0x21c] sm:$0xf]  ;;  %v6545_v39 = vld [vmem:[%s9611_s27 + $0x5e0] sm:$0xf0] }
 0x260   : > { %v6551_v40 = vld [vmem:[%s9611_s27 + $0x5c8] sm:$0xf]  ;;  %v8621_v44 = vld [vmem:[%s9611_s27 + $0x5cc] sm:$0xf] }
 0x261   : > { %1578 = vmatpush.bf16.msra.mxu0 %v6128_v12  ;;  %1591 = vmatpush.bf16.msra.mxu1 %v6132_v13  ;;  %v6240_v12 = vor.u32 %v8562_v63, %v6239_v62  ;;  %v6244_v13 = vor.u32 %v8558_v0, %v6241_v3  ;;  %v6116_v63 = vor.u32 %v8526_v55, %v6113_v57  ;;  %v8522_v3 = vld [vmem:[%s9611_s27 + $0x2ac] sm:$0xf0]  ;;  %v6553_v45 = vld [vmem:[%s9611_s27 + $0x5e8] sm:$0xf0]  ;;  %v6519_v57 = vld [vmem:[%s9611_s27 + $0x588] sm:$0xf] }
 0x262   : > { %1604 = vmatpush.bf16.msra.mxu2 %v6136_v14  ;;  %v6248_v14 = vor.u32 %v8563_v5, %v6247_v4  ;;  %v8518_v4 = vld [vmem:[%s9611_s27 + $0x294] sm:$0xf]  ;;  %v6124_v5 = vor.u32 %v8527_v60, %v6121_v61  ;;  %v6556_v55 = vor.u32 %v8621_v44, %v6553_v45  ;;  %v6521_v60 = vld [vmem:[%s9611_s27 + $0x5a8] sm:$0xf0] }
 0x263   : > { %1617 = vmatpush.bf16.msra.mxu3 %v6140_v18  ;;  %v6252_v18 = vor.u32 %v8559_v8, %v6249_v9  ;;  %v8523_v8 = vld [vmem:[%s9611_s27 + $0x2b4] sm:$0xf0]  ;;  %v8519_v9 = vld [vmem:[%s9611_s27 + $0x29c] sm:$0xf]  ;;  %v6393_v44 = vld [vmem:[%s9611_s27 + $0x4a8] sm:$0xf0] }
 0x265   : > { %1579 = vmatpush.bf16.msra.mxu0 %v6096_v23  ;;  %1592 = vmatpush.bf16.msra.mxu1 %v6100_v24  ;;  %v6217_v23 = vld [vmem:[%s9611_s27 + $0x3b8] sm:$0xf0]  ;;  %v6208_v24 = vor.u32 %v8554_v16, %v6207_v15  ;;  %v8514_v15 = vld [vmem:[%s9611_s27 + $0x26c] sm:$0xf0]  ;;  %v8510_v16 = vld [vmem:[%s9611_s27 + $0x254] sm:$0xf] }
 0x266   : > { %1605 = vmatpush.bf16.msra.mxu2 %v6104_v25  ;;  %v6212_v25 = vor.u32 %v8550_v17, %v6209_v20  ;;  %v6220_v30 = vor.u32 %v8551_v22, %v6217_v23  ;;  %v6092_v17 = vor.u32 %v8519_v9, %v6089_v10  ;;  %v6055_v20 = vld [vmem:[%s9611_s27 + $0x258] sm:$0xf]  ;;  %v6057_v22 = vld [vmem:[%s9611_s27 + $0x278] sm:$0xf0]  ;;  %v6489_v9 = vld [vmem:[%s9611_s27 + $0x568] sm:$0xf0] }
 0x267   : > { %1618 = vmatpush.bf16.msra.mxu3 %v6108_v29  ;;  %v8542_v29 = vld [vmem:[%s9611_s27 + $0x354] sm:$0xf] }
 0x269   : > { %1580 = vmatpush.bf16.msra.mxu0 %v6064_v35  ;;  %1593 = vmatpush.bf16.msra.mxu1 %v6068_v36  ;;  %v6185_v35 = vld [vmem:[%s9611_s27 + $0x378] sm:$0xf0]  ;;  %v6176_v36 = vor.u32 %v8546_v28, %v6175_v27  ;;  %v6056_v27 = vor.u32 %v8515_v1, %v6055_v20  ;;  %v8502_v28 = vld [vmem:[%s9611_s27 + $0x214] sm:$0xf]  ;;  %v8601_v20 = vld [vmem:[%s9611_s27 + $0x524] sm:$0xf0] }
 0x26a   : > { %1606 = vmatpush.bf16.msra.mxu2 %v6072_v37  ;;  %v6180_v37 = vor.u32 %v8542_v29, %v6177_v31  ;;  %v6188_v42 = vor.u32 %v8543_v34, %v6185_v35  ;;  %v6017_v29 = vld [vmem:[%s9611_s27 + $0x230] sm:$0xf0]  ;;  %v6060_v31 = vor.u32 %v8511_v21, %v6057_v22  ;;  %v6025_v34 = vld [vmem:[%s9611_s27 + $0x238] sm:$0xf0]  ;;  %v6543_v35 = vld [vmem:[%s9611_s27 + $0x5c0] sm:$0xf] }
 0x26b   : > { %1619 = vmatpush.bf16.msra.mxu3 %v6076_v41  ;;  %v8534_v41 = vld [vmem:[%s9611_s27 + $0x314] sm:$0xf]  ;;  %v8597_v1 = vld [vmem:[%s9611_s27 + $0x50c] sm:$0xf] }
 0x26c   : > { %v6148_v51 = vor.u32 %v8534_v41, %v6145_v43  ;;  %v8625_v41 = vld [vmem:[%s9611_s27 + $0x5e4] sm:$0xf0]  ;;  %v6457_v21 = vld [vmem:[%s9611_s27 + $0x528] sm:$0xf0] }
 0x26d   : > { %1581 = vmatpush.bf16.msra.mxu0 %v6032_v47  ;;  %1594 = vmatpush.bf16.msra.mxu1 %v6036_v53  ;;  %v6153_v47 = vld [vmem:[%s9611_s27 + $0x338] sm:$0xf0]  ;;  %v6111_v53 = vld [vmem:[%s9611_s27 + $0x2d0] sm:$0xf] }
 0x26e   : > { %1607 = vmatpush.bf16.msra.mxu2 %v6040_v54  ;;  %v8530_v54 = vld [vmem:[%s9611_s27 + $0x2ec] sm:$0xf0]  ;;  %v6156_v56 = vor.u32 %v8535_v46, %v6153_v47  ;;  %v6028_v46 = vor.u32 %v8503_v33, %v6025_v34 }
 0x26f   : > { %1620 = vmatpush.bf16.msra.mxu3 %v6044_v58  ;;  %v6119_v58 = vld [vmem:[%s9611_s27 + $0x2d8] sm:$0xf]  ;;  %v6112_v62 = vor.u32 %v8530_v54, %v6111_v53  ;;  %v8616_v53 = vld [vmem:[%s9611_s27 + $0x59c] sm:$0xf0]  ;;  %v8612_v54 = vld [vmem:[%s9611_s27 + $0x584] sm:$0xf] }
 0x270   : > { %v6120_v0 = vor.u32 %v8531_v59, %v6119_v58  ;;  %v8617_v58 = vld [vmem:[%s9611_s27 + $0x5a4] sm:$0xf0]  ;;  %v8613_v59 = vld [vmem:[%s9611_s27 + $0x58c] sm:$0xf] }
 0x271   : > { %1582 = vmatpush.bf16.msra.mxu0 %v6000_v2  ;;  %1595 = vmatpush.bf16.msra.mxu1 %v6004_v6  ;;  %v6079_v2 = vld [vmem:[%s9611_s27 + $0x290] sm:$0xf]  ;;  %v6081_v6 = vld [vmem:[%s9611_s27 + $0x2b0] sm:$0xf0] }
 0x272   : > { %1608 = vmatpush.bf16.msra.mxu2 %v6008_v7  ;;  %v6087_v7 = vld [vmem:[%s9611_s27 + $0x298] sm:$0xf] }
 0x273   : > { %1621 = vmatpush.bf16.msra.mxu3 %v6012_v11  ;;  %v6080_v11 = vor.u32 %v8522_v3, %v6079_v2  ;;  %v8608_v2 = vld [vmem:[%s9611_s27 + $0x55c] sm:$0xf0]  ;;  %v8604_v3 = vld [vmem:[%s9611_s27 + $0x544] sm:$0xf] }
 0x274   : > { %1596 = vmatmul.bf16.vlgmr.msra.gmra.mxu1 %v10024_v19  ;;  %1583 = vmatmul.bf16.vlgmr.msra.gmra.mxu0 %v10024_v19 }
 0x275   : > { %1627 = vmatpush.bf16.msrb.mxu0 %v6240_v12  ;;  %1640 = vmatpush.bf16.msrb.mxu1 %v6244_v13  ;;  %v6084_v12 = vor.u32 %v8518_v4, %v6081_v6  ;;  %v6088_v13 = vor.u32 %v8523_v8, %v6087_v7  ;;  %v6524_v4 = vor.u32 %v8613_v59, %v6521_v60  ;;  %v6487_v6 = vld [vmem:[%s9611_s27 + $0x548] sm:$0xf]  ;;  %v8605_v8 = vld [vmem:[%s9611_s27 + $0x54c] sm:$0xf]  ;;  %v6319_v60 = vld [vmem:[%s9611_s27 + $0x400] sm:$0xf] }
 0x276   : > { %1653 = vmatpush.bf16.msrb.mxu2 %v6248_v14  ;;  %1622 = vmatmul.bf16.vlgmr.msra.gmra.mxu3 %v10024_v19  ;;  %v6047_v14 = vld [vmem:[%s9611_s27 + $0x250] sm:$0xf]  ;;  %v8609_v7 = vld [vmem:[%s9611_s27 + $0x564] sm:$0xf0] }
 0x277   : > { %1666 = vmatpush.bf16.msrb.mxu3 %v6252_v18  ;;  %1609 = vmatmul.bf16.vlgmr.msra.gmra.mxu2 %v10024_v19  ;;  %v6049_v18 = vld [vmem:[%s9611_s27 + $0x270] sm:$0xf0]  ;;  %v6048_v23 = vor.u32 %v8514_v15, %v6047_v14  ;;  %v8600_v14 = vld [vmem:[%s9611_s27 + $0x51c] sm:$0xf0]  ;;  %v8596_v15 = vld [vmem:[%s9611_s27 + $0x504] sm:$0xf] }
 0x279   : > { %1628 = vmatpush.bf16.msrb.mxu0 %v6208_v24  ;;  %1641 = vmatpush.bf16.msrb.mxu1 %v6212_v25  ;;  %v6015_v24 = vld [vmem:[%s9611_s27 + $0x210] sm:$0xf] }
 0x27a   : > { %1654 = vmatpush.bf16.msrb.mxu2 %v6216_v26  ;;  %v8506_v25 = vld [vmem:[%s9611_s27 + $0x22c] sm:$0xf0]  ;;  %v6052_v26 = vor.u32 %v8510_v16, %v6049_v18  ;;  %v6492_v16 = vor.u32 %v8605_v8, %v6489_v9  ;;  %v6455_v18 = vld [vmem:[%s9611_s27 + $0x508] sm:$0xf]  ;;  %v8565_v8 = vld [vmem:[%s9611_s27 + $0x40c] sm:$0xf] }
 0x27b   : > { %1667 = vmatpush.bf16.msrb.mxu3 %v6220_v30  ;;  %v6023_v30 = vld [vmem:[%s9611_s27 + $0x218] sm:$0xf]  ;;  %v6329_v9 = vld [vmem:[%s9611_s27 + $0x428] sm:$0xf0] }
 0x27c   : > { %v6024_v43 = vor.u32 %v8507_v32, %v6023_v30  ;;  %v8593_v30 = vld [vmem:[%s9611_s27 + $0x4e4] sm:$0xf0]  ;;  %v6425_v32 = vld [vmem:[%s9611_s27 + $0x4e8] sm:$0xf0] }
 0x27d   : > { %1629 = vmatpush.bf16.msrb.mxu0 %v6176_v36  ;;  %1642 = vmatpush.bf16.msrb.mxu1 %v6180_v37  ;;  %v8624_v36 = vld [vmem:[%s9611_s27 + $0x5dc] sm:$0xf0]  ;;  %v8620_v37 = vld [vmem:[%s9611_s27 + $0x5c4] sm:$0xf] }
 0x27e   : > { %1655 = vmatpush.bf16.msrb.mxu2 %v6184_v38  ;;  %v6016_v38 = vor.u32 %v8506_v25, %v6015_v24  ;;  %v6544_v47 = vor.u32 %v8624_v36, %v6543_v35  ;;  %v6456_v24 = vor.u32 %v8601_v20, %v6455_v18  ;;  %v6415_v25 = vld [vmem:[%s9611_s27 + $0x4c0] sm:$0xf]  ;;  %v8623_v20 = vld [vmem:[%s9611_s27 + $0x5dc] sm:$0xf] }
 0x27f   : > { %1668 = vmatpush.bf16.msrb.mxu3 %v6188_v42  ;;  %v6020_v42 = vor.u32 %v8502_v28, %v6017_v29  ;;  %v6417_v28 = vld [vmem:[%s9611_s27 + $0x4e0] sm:$0xf0]  ;;  %v6423_v29 = vld [vmem:[%s9611_s27 + $0x4c8] sm:$0xf]  ;;  %v6383_v36 = vld [vmem:[%s9611_s27 + $0x480] sm:$0xf] }
 0x280   : > { %v6424_v35 = vor.u32 %v8593_v30, %v6423_v29  ;;  %v6529_v30 = vld [vmem:[%s9611_s27 + $0x5b0] sm:$0xf0] }
 0x281   : > { %1630 = vmatpush.bf16.msrb.mxu0 %v6144_v50  ;;  %1643 = vmatpush.bf16.msrb.mxu1 %v6148_v51  ;;  %v6548_v50 = vor.u32 %v8620_v37, %v6545_v39  ;;  %v6552_v51 = vor.u32 %v8625_v41, %v6551_v40  ;;  %v8584_v37 = vld [vmem:[%s9611_s27 + $0x49c] sm:$0xf0]  ;;  %v6385_v40 = vld [vmem:[%s9611_s27 + $0x4a0] sm:$0xf0]  ;;  %v6391_v41 = vld [vmem:[%s9611_s27 + $0x488] sm:$0xf] }
 0x282   : > { %1656 = vmatpush.bf16.msrb.mxu2 %v6152_v52  ;;  %v6511_v52 = vld [vmem:[%s9611_s27 + $0x580] sm:$0xf]  ;;  %v6384_v45 = vor.u32 %v8584_v37, %v6383_v36 }
 0x283   : > { %1669 = vmatpush.bf16.msrb.mxu3 %v6156_v56  ;;  %v6513_v56 = vld [vmem:[%s9611_s27 + $0x5a0] sm:$0xf0]  ;;  %v6512_v61 = vor.u32 %v8616_v53, %v6511_v52 }
 0x284   : > { %v8572_v52 = vld [vmem:[%s9611_s27 + $0x444] sm:$0xf] }
 0x285   : > { %1631 = vmatpush.bf16.msrb.mxu0 %v6112_v62  ;;  %1644 = vmatpush.bf16.msrb.mxu1 %v6116_v63  ;;  %v6516_v62 = vor.u32 %v8612_v54, %v6513_v56  ;;  %v6520_v63 = vor.u32 %v8617_v58, %v6519_v57  ;;  %v6353_v54 = vld [vmem:[%s9611_s27 + $0x460] sm:$0xf0]  ;;  %v8577_v56 = vld [vmem:[%s9611_s27 + $0x464] sm:$0xf0]  ;;  %v8573_v57 = vld [vmem:[%s9611_s27 + $0x44c] sm:$0xf] }
 0x286   : > { %1657 = vmatpush.bf16.msrb.mxu2 %v6120_v0  ;;  %v6479_v0 = vld [vmem:[%s9611_s27 + $0x540] sm:$0xf]  ;;  %v6361_v58 = vld [vmem:[%s9611_s27 + $0x468] sm:$0xf0] }
 0x287   : > { %1670 = vmatpush.bf16.msrb.mxu3 %v6124_v5  ;;  %v6481_v5 = vld [vmem:[%s9611_s27 + $0x560] sm:$0xf0]  ;;  %v6480_v10 = vor.u32 %v8608_v2, %v6479_v0 }
 0x288   : > { %v6321_v2 = vld [vmem:[%s9611_s27 + $0x420] sm:$0xf0] }
 0x289   : > { %1632 = vmatpush.bf16.msrb.mxu0 %v6080_v11  ;;  %1645 = vmatpush.bf16.msrb.mxu1 %v6084_v12  ;;  %v6484_v11 = vor.u32 %v8604_v3, %v6481_v5  ;;  %v6488_v12 = vor.u32 %v8609_v7, %v6487_v6  ;;  %v6327_v3 = vld [vmem:[%s9611_s27 + $0x408] sm:$0xf]  ;;  %v1769_v5 = vrot.slane %v9907_v49, 1  ;;  %v6364_v6 = vor.u32 %v8573_v57, %v6361_v58  ;;  %v6471_v57 = vld [vmem:[%s9611_s27 + $0x518] sm:$0xf] }
 0x28a   : > { %1658 = vmatpush.bf16.msrb.mxu2 %v6088_v13  ;;  %v6447_v13 = vld [vmem:[%s9611_s27 + $0x500] sm:$0xf]  ;;  %v8569_v7 = vld [vmem:[%s9611_s27 + $0x424] sm:$0xf0]  ;;  %v8603_v58 = vld [vmem:[%s9611_s27 + $0x534] sm:$0xf0] }
 0x28b   : > { %1671 = vmatpush.bf16.msrb.mxu3 %v6092_v17  ;;  %v6449_v17 = vld [vmem:[%s9611_s27 + $0x520] sm:$0xf0]  ;;  %v6448_v22 = vor.u32 %v8600_v14, %v6447_v13  ;;  %v6561_v14 = vld [vmem:[%s9611_s27 + $0x5f0] sm:$0xf0]  ;;  %v6328_v18 = vor.u32 %v8569_v7, %v6327_v3  ;;  %v8595_v7 = vld [vmem:[%s9611_s27 + $0x4f4] sm:$0xf0] }
 0x28c   : > { %v8590_v3 = vld [vmem:[%s9611_s27 + $0x4d4] sm:$0xf] }
 0x28d   : > { %1633 = vmatpush.bf16.msrb.mxu0 %v6048_v23  ;;  %1646 = vmatpush.bf16.msrb.mxu1 %v6052_v26  ;;  %v6452_v23 = vor.u32 %v8596_v15, %v6449_v17  ;;  %v8592_v26 = vld [vmem:[%s9611_s27 + $0x4dc] sm:$0xf0]  ;;  %v6567_v15 = vld [vmem:[%s9611_s27 + $0x5d8] sm:$0xf] }
 0x28e   : > { %1659 = vmatpush.bf16.msrb.mxu2 %v6056_v27  ;;  %v6460_v27 = vor.u32 %v8597_v1, %v6457_v21  ;;  %v6416_v33 = vor.u32 %v8592_v26, %v6415_v25  ;;  %v6569_v1 = vld [vmem:[%s9611_s27 + $0x5f8] sm:$0xf0]  ;;  %v6527_v26 = vld [vmem:[%s9611_s27 + $0x590] sm:$0xf] }
 0x28f   : > { %1672 = vmatpush.bf16.msrb.mxu3 %v6060_v31  ;;  %v8589_v31 = vld [vmem:[%s9611_s27 + $0x4cc] sm:$0xf] }
 0x290   : > { %v6428_v39 = vor.u32 %v8589_v31, %v6425_v32  ;;  %v6535_v31 = vld [vmem:[%s9611_s27 + $0x598] sm:$0xf] }
 0x291   : > { %1634 = vmatpush.bf16.msrb.mxu0 %v6016_v38  ;;  %1647 = vmatpush.bf16.msrb.mxu1 %v6020_v42  ;;  %v8580_v38 = vld [vmem:[%s9611_s27 + $0x484] sm:$0xf]  ;;  %v8585_v42 = vld [vmem:[%s9611_s27 + $0x4a4] sm:$0xf0]  ;;  %v8619_v32 = vld [vmem:[%s9611_s27 + $0x5b4] sm:$0xf0] }
 0x292   : > { %1660 = vmatpush.bf16.msrb.mxu2 %v6024_v43  ;;  %v8581_v43 = vld [vmem:[%s9611_s27 + $0x48c] sm:$0xf]  ;;  %v6536_v37 = vor.u32 %v8619_v32, %v6535_v31  ;;  %v8579_v31 = vld [vmem:[%s9611_s27 + $0x474] sm:$0xf0]  ;;  %v8575_v32 = vld [vmem:[%s9611_s27 + $0x45c] sm:$0xf] }
 0x293   : > { %1673 = vmatpush.bf16.msrb.mxu3 %v6028_v46  ;;  %v6388_v46 = vor.u32 %v8580_v38, %v6385_v40  ;;  %v6396_v53 = vor.u32 %v8581_v43, %v6393_v44  ;;  %v6495_v38 = vld [vmem:[%s9611_s27 + $0x550] sm:$0xf]  ;;  %v8606_v40 = vld [vmem:[%s9611_s27 + $0x554] sm:$0xf]  ;;  %v6503_v43 = vld [vmem:[%s9611_s27 + $0x558] sm:$0xf] }
 0x294   : > { %1648 = vmatmul.bf16.vlgmr.msrb.gmra.mxu1 %v10024_v19  ;;  %1635 = vmatmul.bf16.vlgmr.msrb.gmra.mxu0 %v10024_v19  ;;  %v8611_v44 = vld [vmem:[%s9611_s27 + $0x574] sm:$0xf0] }
 0x295   : > { %2093 = vmatpush.bf16.msra.mxu0 %v6544_v47  ;;  %2106 = vmatpush.bf16.msra.mxu1 %v6548_v50  ;;  %v6392_v47 = vor.u32 %v8585_v42, %v6391_v41  ;;  %v6351_v50 = vld [vmem:[%s9611_s27 + $0x440] sm:$0xf]  ;;  %v6497_v42 = vld [vmem:[%s9611_s27 + $0x570] sm:$0xf0] }
 0x296   : > { %2119 = vmatpush.bf16.msra.mxu2 %v6552_v51  ;;  %1674 = vmatmul.bf16.vlgmr.msrb.gmra.mxu3 %v10024_v19  ;;  %v8576_v51 = vld [vmem:[%s9611_s27 + $0x45c] sm:$0xf0] }
 0x297   : > { %2132 = vmatpush.bf16.msra.mxu3 %v6556_v55  ;;  %1661 = vmatmul.bf16.vlgmr.msrb.gmra.mxu2 %v10024_v19  ;;  %v8588_v19 = vld [vmem:[%s9611_s27 + $0x4c4] sm:$0xf]  ;;  %v6359_v55 = vld [vmem:[%s9611_s27 + $0x448] sm:$0xf]  ;;  %v6352_v59 = vor.u32 %v8576_v51, %v6351_v50  ;;  %v6500_v50 = vor.u32 %v8606_v40, %v6497_v42  ;;  %v6504_v51 = vor.u32 %v8611_v44, %v6503_v43  ;;  %v6337_v40 = vld [vmem:[%s9611_s27 + $0x430] sm:$0xf0] }
 0x298   : > { %v6420_v34 = vor.u32 %v8588_v19, %v6417_v28  ;;  %v6360_v0 = vor.u32 %v8577_v56, %v6359_v55  ;;  %v8618_v19 = vld [vmem:[%s9611_s27 + $0x5ac] sm:$0xf0]  ;;  %v6572_v28 = vor.u32 %v8623_v20, %v6569_v1  ;;  %v6465_v56 = vld [vmem:[%s9611_s27 + $0x530] sm:$0xf0]  ;;  %v8587_v20 = vld [vmem:[%s9611_s27 + $0x4b4] sm:$0xf0] }
 0x299   : > { %2094 = vmatpush.bf16.msra.mxu0 %v6512_v61  ;;  %2107 = vmatpush.bf16.msra.mxu1 %v6516_v62  ;;  %v8568_v61 = vld [vmem:[%s9611_s27 + $0x41c] sm:$0xf0]  ;;  %v8564_v62 = vld [vmem:[%s9611_s27 + $0x404] sm:$0xf]  ;;  %v8583_v1 = vld [vmem:[%s9611_s27 + $0x49c] sm:$0xf] }
 0x29a   : > { %2120 = vmatpush.bf16.msra.mxu2 %v6520_v63  ;;  %v6356_v63 = vor.u32 %v8572_v52, %v6353_v54  ;;  %v6320_v13 = vor.u32 %v8568_v61, %v6319_v60  ;;  %v6324_v17 = vor.u32 %v8564_v62, %v6321_v2  ;;  %v6463_v52 = vld [vmem:[%s9611_s27 + $0x510] sm:$0xf]  ;;  %v8598_v54 = vld [vmem:[%s9611_s27 + $0x514] sm:$0xf]  ;;  %v6473_v60 = vld [vmem:[%s9611_s27 + $0x538] sm:$0xf0] }
 0x29b   : > { %2133 = vmatpush.bf16.msra.mxu3 %v6524_v4  ;;  %v1768_v4 = vrot.slane %v9905_v48, 2  ;;  %v6468_v62 = vor.u32 %v8598_v54, %v6465_v56  ;;  %v8594_v2 = vld [vmem:[%s9611_s27 + $0x4ec] sm:$0xf0]  ;;  %v8571_v43 = vld [vmem:[%s9611_s27 + $0x434] sm:$0xf0] }
 0x29c   : > { %v8567_v44 = vld [vmem:[%s9611_s27 + $0x41c] sm:$0xf]  ;;  %v8689_v54 = vld [vmem:[%s9611_s27 + $0x7e4] sm:$0xf0] }
 0x29d   : > { %2095 = vmatpush.bf16.msra.mxu0 %v6480_v10  ;;  %2108 = vmatpush.bf16.msra.mxu1 %v6484_v11  ;;  %v6559_v10 = vld [vmem:[%s9611_s27 + $0x5d0] sm:$0xf]  ;;  %v1770_v21 = vsel %vm731_vm3, %v1769_v5, %v1768_v4  ;;  %v6433_v5 = vld [vmem:[%s9611_s27 + $0x4f0] sm:$0xf0] }
 0x29e   : > { %2121 = vmatpush.bf16.msra.mxu2 %v6488_v12  ;;  %v8626_v11 = vld [vmem:[%s9611_s27 + $0x5ec] sm:$0xf0]  ;;  %v8622_v12 = vld [vmem:[%s9611_s27 + $0x5d4] sm:$0xf]  ;;  %v10165_v29 = vpack.c.b16 %v1770_v21, %v1770_v21  ;;  %v6409_v21 = vld [vmem:[%s9611_s27 + $0x4b8] sm:$0xf0] }
 0x29f   : > { %2134 = vmatpush.bf16.msra.mxu3 %v6492_v16  ;;  %v8627_v16 = vld [vmem:[%s9611_s27 + $0x5f4] sm:$0xf0] }
 0x2a0   : > { %v6568_v25 = vor.u32 %v8627_v16, %v6567_v15  ;;  %v8582_v15 = vld [vmem:[%s9611_s27 + $0x494] sm:$0xf] }
 0x2a1   : > { %2096 = vmatpush.bf16.msra.mxu0 %v6448_v22  ;;  %2109 = vmatpush.bf16.msra.mxu1 %v6452_v23  ;;  %v6332_v22 = vor.u32 %v8565_v8, %v6329_v9  ;;  %v6560_v23 = vor.u32 %v8626_v11, %v6559_v10  ;;  %v8591_v8 = vld [vmem:[%s9611_s27 + $0x4dc] sm:$0xf]  ;;  %v6436_v11 = vor.u32 %v8590_v3, %v6433_v5  ;;  %v6831_v3 = vld [vmem:[%s9611_s27 + $0x780] sm:$0xf]  ;;  %v8676_v5 = vld [vmem:[%s9611_s27 + $0x784] sm:$0xf] }
 0x2a2   : > { %2122 = vmatpush.bf16.msra.mxu2 %v6456_v24  ;;  %v6564_v24 = vor.u32 %v8622_v12, %v6561_v14  ;;  %v6441_v9 = vld [vmem:[%s9611_s27 + $0x4f8] sm:$0xf0]  ;;  %v8586_v14 = vld [vmem:[%s9611_s27 + $0x4ac] sm:$0xf0] }
 0x2a3   : > { %2135 = vmatpush.bf16.msra.mxu3 %v6460_v27  ;;  %v8614_v27 = vld [vmem:[%s9611_s27 + $0x594] sm:$0xf]  ;;  %v6444_v16 = vor.u32 %v8591_v8, %v6441_v9  ;;  %v6839_v8 = vld [vmem:[%s9611_s27 + $0x788] sm:$0xf] }
 0x2a4   : > { %v6532_v36 = vor.u32 %v8614_v27, %v6529_v30  ;;  %v6412_v27 = vor.u32 %v8583_v1, %v6409_v21  ;;  %v6375_v30 = vld [vmem:[%s9611_s27 + $0x458] sm:$0xf]  ;;  %v8681_v9 = vld [vmem:[%s9611_s27 + $0x7a4] sm:$0xf0]  ;;  %v8672_v21 = vld [vmem:[%s9611_s27 + $0x75c] sm:$0xf0] }
 0x2a5   : > { %2097 = vmatpush.bf16.msra.mxu0 %v6416_v33  ;;  %2110 = vmatpush.bf16.msra.mxu1 %v6420_v34  ;;  %v8615_v33 = vld [vmem:[%s9611_s27 + $0x59c] sm:$0xf] }
 0x2a6   : > { %2123 = vmatpush.bf16.msra.mxu2 %v6424_v35  ;;  %v6537_v34 = vld [vmem:[%s9611_s27 + $0x5b8] sm:$0xf0]  ;;  %v6528_v35 = vor.u32 %v8618_v19, %v6527_v26  ;;  %v8578_v26 = vld [vmem:[%s9611_s27 + $0x46c] sm:$0xf0]  ;;  %v8574_v19 = vld [vmem:[%s9611_s27 + $0x454] sm:$0xf] }
 0x2a7   : > { %2136 = vmatpush.bf16.msra.mxu3 %v6428_v39  ;;  %v8610_v39 = vld [vmem:[%s9611_s27 + $0x56c] sm:$0xf0]  ;;  %v6540_v41 = vor.u32 %v8615_v33, %v6537_v34  ;;  %v6377_v33 = vld [vmem:[%s9611_s27 + $0x478] sm:$0xf0] }
 0x2a8   : > { %v6380_v42 = vor.u32 %v8575_v32, %v6377_v33 }
 0x2a9   : > { %2098 = vmatpush.bf16.msra.mxu0 %v6384_v45  ;;  %2111 = vmatpush.bf16.msra.mxu1 %v6388_v46  ;;  %v8607_v45 = vld [vmem:[%s9611_s27 + $0x55c] sm:$0xf] }
 0x2aa   : > { %2124 = vmatpush.bf16.msra.mxu2 %v6392_v47  ;;  %v6505_v46 = vld [vmem:[%s9611_s27 + $0x578] sm:$0xf0]  ;;  %v6496_v47 = vor.u32 %v8610_v39, %v6495_v38  ;;  %v6376_v38 = vor.u32 %v8579_v31, %v6375_v30  ;;  %v8566_v39 = vld [vmem:[%s9611_s27 + $0x414] sm:$0xf]  ;;  %v6809_v30 = vld [vmem:[%s9611_s27 + $0x768] sm:$0xf0] }
 0x2ab   : > { %2137 = vmatpush.bf16.msra.mxu3 %v6396_v53  ;;  %v8602_v53 = vld [vmem:[%s9611_s27 + $0x52c] sm:$0xf0]  ;;  %v6508_v55 = vor.u32 %v8607_v45, %v6505_v46  ;;  %v6345_v45 = vld [vmem:[%s9611_s27 + $0x438] sm:$0xf0]  ;;  %v6863_v46 = vld [vmem:[%s9611_s27 + $0x7c0] sm:$0xf]  ;;  %v6340_v56 = vor.u32 %v8566_v39, %v6337_v40 }
 0x2ac   : > { %v6464_v61 = vor.u32 %v8602_v53, %v6463_v52  ;;  %v6865_v52 = vld [vmem:[%s9611_s27 + $0x7e0] sm:$0xf0]  ;;  %v6871_v53 = vld [vmem:[%s9611_s27 + $0x7c8] sm:$0xf] }
 0x2ad   : > { %2099 = vmatpush.bf16.msra.mxu0 %v6352_v59  ;;  %2112 = vmatpush.bf16.msra.mxu1 %v6356_v63  ;;  %v8599_v59 = vld [vmem:[%s9611_s27 + $0x51c] sm:$0xf]  ;;  %v6472_v63 = vor.u32 %v8603_v58, %v6471_v57  ;;  %v8685_v58 = vld [vmem:[%s9611_s27 + $0x7cc] sm:$0xf]  ;;  %v6769_v40 = vld [vmem:[%s9611_s27 + $0x720] sm:$0xf0] }
 0x2ae   : > { %2125 = vmatpush.bf16.msra.mxu2 %v6360_v0  ;;  %v6431_v0 = vld [vmem:[%s9611_s27 + $0x4d0] sm:$0xf]  ;;  %v6476_v4 = vor.u32 %v8599_v59, %v6473_v60  ;;  %v6873_v59 = vld [vmem:[%s9611_s27 + $0x7e8] sm:$0xf0] }
 0x2af   : > { %2138 = vmatpush.bf16.msra.mxu3 %v6364_v6  ;;  %v6439_v6 = vld [vmem:[%s9611_s27 + $0x4d8] sm:$0xf]  ;;  %v6432_v10 = vor.u32 %v8594_v2, %v6431_v0  ;;  %v6872_v2 = vor.u32 %v8689_v54, %v6871_v53  ;;  %v8652_v53 = vld [vmem:[%s9611_s27 + $0x6c4] sm:$0xf] }
 0x2b0   : > { %v6440_v12 = vor.u32 %v8595_v7, %v6439_v6  ;;  %v6876_v6 = vor.u32 %v8685_v58, %v6873_v59  ;;  %v6833_v7 = vld [vmem:[%s9611_s27 + $0x7a0] sm:$0xf0]  ;;  %v8653_v58 = vld [vmem:[%s9611_s27 + $0x6cc] sm:$0xf] }
 0x2b1   : > { %2100 = vmatpush.bf16.msra.mxu0 %v6320_v13  ;;  %2113 = vmatpush.bf16.msra.mxu1 %v6324_v17  ;;  %v6399_v13 = vld [vmem:[%s9611_s27 + $0x490] sm:$0xf]  ;;  %v6401_v17 = vld [vmem:[%s9611_s27 + $0x4b0] sm:$0xf0]  ;;  %v6745_v59 = vld [vmem:[%s9611_s27 + $0x6e8] sm:$0xf0] }
 0x2b2   : > { %2126 = vmatpush.bf16.msra.mxu2 %v6328_v18  ;;  %v6407_v18 = vld [vmem:[%s9611_s27 + $0x498] sm:$0xf] }
 0x2b3   : > { %2139 = vmatpush.bf16.msra.mxu3 %v6332_v22  ;;  %v6400_v22 = vor.u32 %v8586_v14, %v6399_v13 }
 0x2b4   : > { %2114 = vmatmul.bf16.vlgmr.msra.gmra.mxu1 %v10165_v29  ;;  %2101 = vmatmul.bf16.vlgmr.msra.gmra.mxu0 %v10165_v29 }
 0x2b5   : > { %2145 = vmatpush.bf16.msrb.mxu0 %v6560_v23  ;;  %2158 = vmatpush.bf16.msrb.mxu1 %v6564_v24  ;;  %v6404_v23 = vor.u32 %v8582_v15, %v6401_v17  ;;  %v6408_v24 = vor.u32 %v8587_v20, %v6407_v18  ;;  %v6799_v17 = vld [vmem:[%s9611_s27 + $0x740] sm:$0xf]  ;;  %v6836_v18 = vor.u32 %v8676_v5, %v6833_v7  ;;  %v8644_v5 = vld [vmem:[%s9611_s27 + $0x684] sm:$0xf] }
 0x2b6   : > { %2171 = vmatpush.bf16.msrb.mxu2 %v6568_v25  ;;  %2140 = vmatmul.bf16.vlgmr.msra.gmra.mxu3 %v10165_v29  ;;  %v6367_v25 = vld [vmem:[%s9611_s27 + $0x450] sm:$0xf]  ;;  %v6840_v20 = vor.u32 %v8681_v9, %v6839_v8  ;;  %v6800_v33 = vor.u32 %v8672_v21, %v6799_v17  ;;  %v6705_v7 = vld [vmem:[%s9611_s27 + $0x6a0] sm:$0xf0]  ;;  %v6711_v8 = vld [vmem:[%s9611_s27 + $0x688] sm:$0xf] }
 0x2b7   : > { %2184 = vmatpush.bf16.msrb.mxu3 %v6572_v28  ;;  %2127 = vmatmul.bf16.vlgmr.msra.gmra.mxu2 %v10165_v29  ;;  %v6369_v28 = vld [vmem:[%s9611_s27 + $0x470] sm:$0xf0]  ;;  %v6368_v34 = vor.u32 %v8578_v26, %v6367_v25  ;;  %v6807_v25 = vld [vmem:[%s9611_s27 + $0x748] sm:$0xf]  ;;  %v6708_v17 = vor.u32 %v8644_v5, %v6705_v7  ;;  %v8682_v5 = vld [vmem:[%s9611_s27 + $0x7ac] sm:$0xf0] }
 0x2b8   : > { %v8673_v26 = vld [vmem:[%s9611_s27 + $0x764] sm:$0xf0] }
 0x2b9   : > { %2146 = vmatpush.bf16.msrb.mxu0 %v6528_v35  ;;  %2159 = vmatpush.bf16.msrb.mxu1 %v6532_v36  ;;  %v6335_v35 = vld [vmem:[%s9611_s27 + $0x410] sm:$0xf]  ;;  %v8649_v9 = vld [vmem:[%s9611_s27 + $0x6a4] sm:$0xf0] }
 0x2ba   : > { %2172 = vmatpush.bf16.msrb.mxu2 %v6536_v37  ;;  %v8570_v36 = vld [vmem:[%s9611_s27 + $0x42c] sm:$0xf0]  ;;  %v6372_v37 = vor.u32 %v8574_v19, %v6369_v28  ;;  %v8669_v28 = vld [vmem:[%s9611_s27 + $0x74c] sm:$0xf] }
 0x2bb   : > { %2185 = vmatpush.bf16.msrb.mxu3 %v6540_v41  ;;  %v6343_v41 = vld [vmem:[%s9611_s27 + $0x418] sm:$0xf]  ;;  %v6812_v39 = vor.u32 %v8669_v28, %v6809_v30 }
 0x2bc   : > { %v6344_v57 = vor.u32 %v8571_v43, %v6343_v41  ;;  %v6775_v41 = vld [vmem:[%s9611_s27 + $0x708] sm:$0xf]  ;;  %v8661_v43 = vld [vmem:[%s9611_s27 + $0x70c] sm:$0xf] }
 0x2bd   : > { %2147 = vmatpush.bf16.msrb.mxu0 %v6496_v47  ;;  %2160 = vmatpush.bf16.msrb.mxu1 %v6500_v50  ;;  %v8688_v47 = vld [vmem:[%s9611_s27 + $0x7dc] sm:$0xf0]  ;;  %v8684_v50 = vld [vmem:[%s9611_s27 + $0x7c4] sm:$0xf]  ;;  %v1077_v60 = vpop.f32.mrf.mxu1 }
 0x2be   : > { %2173 = vmatpush.bf16.msrb.mxu2 %v6504_v51  ;;  %v6336_v51 = vor.u32 %v8570_v36, %v6335_v35  ;;  %v6868_v0 = vor.u32 %v8684_v50, %v6865_v52  ;;  %v6808_v35 = vor.u32 %v8673_v26, %v6807_v25  ;;  %v6767_v36 = vld [vmem:[%s9611_s27 + $0x700] sm:$0xf]  ;;  %v8637_v26 = vld [vmem:[%s9611_s27 + $0x64c] sm:$0xf] }
 0x2bf   : > { %2186 = vmatpush.bf16.msrb.mxu3 %v6508_v55  ;;  %v1064_v55 = vpop.f32.mrf.mxu0  ;;  %v8656_v52 = vld [vmem:[%s9611_s27 + $0x6dc] sm:$0xf0] }
 0x2c1   : > { %2148 = vmatpush.bf16.msrb.mxu0 %v6464_v61  ;;  %2161 = vmatpush.bf16.msrb.mxu1 %v6468_v62  ;;  %v6348_v61 = vor.u32 %v8567_v44, %v6345_v45  ;;  %v6864_v62 = vor.u32 %v8688_v47, %v6863_v46  ;;  %v6777_v44 = vld [vmem:[%s9611_s27 + $0x728] sm:$0xf0] }
 0x2c2   : > { %2174 = vmatpush.bf16.msrb.mxu2 %v6472_v63  ;;  %v1167_v63 = vrot.slane %v1077_v60, 6  ;;  %v1090_v13 = vpop.f32.mrf.mxu2  ;;  %v6780_v54 = vor.u32 %v8661_v43, %v6777_v44  ;;  %v8633_v44 = vld [vmem:[%s9611_s27 + $0x624] sm:$0xf0] }
 0x2c3   : > { %2187 = vmatpush.bf16.msrb.mxu3 %v6476_v4  ;;  %v8680_v4 = vld [vmem:[%s9611_s27 + $0x79c] sm:$0xf0]  ;;  %v1168_v15 = vrot.slane %v1090_v13, 4 }
 0x2c4   : > { %v6832_v14 = vor.u32 %v8680_v4, %v6831_v3  ;;  %v6703_v3 = vld [vmem:[%s9611_s27 + $0x680] sm:$0xf] }
 0x2c5   : > { %2149 = vmatpush.bf16.msrb.mxu0 %v6432_v10  ;;  %2162 = vmatpush.bf16.msrb.mxu1 %v6436_v11  ;;  %v1174_v10 = vsel %vm1173_vm4, %v1064_v55, %v1167_v63  ;;  %v8677_v11 = vld [vmem:[%s9611_s27 + $0x78c] sm:$0xf]  ;;  %v1079_v31 = vpop.f32.mrf.mxu1  ;;  %v6737_v55 = vld [vmem:[%s9611_s27 + $0x6e0] sm:$0xf0]  ;;  %v8648_v4 = vld [vmem:[%s9611_s27 + $0x69c] sm:$0xf0] }
 0x2c6   : > { %2175 = vmatpush.bf16.msrb.mxu2 %v6440_v12  ;;  %v6841_v12 = vld [vmem:[%s9611_s27 + $0x7a8] sm:$0xf0] }
 0x2c7   : > { %2188 = vmatpush.bf16.msrb.mxu3 %v6444_v16  ;;  %v1103_v16 = vpop.f32.mrf.mxu3  ;;  %v1066_v19 = vpop.f32.mrf.mxu0 }
 0x2c8   : > { %v1169_v1 = vrot.slane %v1103_v16, 2  ;;  %v8640_v16 = vld [vmem:[%s9611_s27 + $0x65c] sm:$0xf0]  ;;  %v6681_v19 = vld [vmem:[%s9611_s27 + $0x668] sm:$0xf0] }
 0x2c9   : > { %2150 = vmatpush.bf16.msrb.mxu0 %v6400_v22  ;;  %2163 = vmatpush.bf16.msrb.mxu1 %v6404_v23  ;;  %v8668_v22 = vld [vmem:[%s9611_s27 + $0x744] sm:$0xf]  ;;  %v6844_v23 = vor.u32 %v8677_v11, %v6841_v12  ;;  %v8645_v11 = vld [vmem:[%s9611_s27 + $0x68c] sm:$0xf]  ;;  %v6684_v43 = vor.u32 %v8637_v26, %v6681_v19 }
 0x2ca   : > { %2176 = vmatpush.bf16.msrb.mxu2 %v6408_v24  ;;  %v6801_v24 = vld [vmem:[%s9611_s27 + $0x760] sm:$0xf0]  ;;  %v1092_v45 = vpop.f32.mrf.mxu2  ;;  %v6713_v12 = vld [vmem:[%s9611_s27 + $0x6a8] sm:$0xf0] }
 0x2cb   : > { %2189 = vmatpush.bf16.msrb.mxu3 %v6412_v27  ;;  %v1176_v27 = vsel %vm1175_vm5, %v1168_v15, %v1169_v1  ;;  %v6671_v15 = vld [vmem:[%s9611_s27 + $0x640] sm:$0xf]  ;;  %v6673_v1 = vld [vmem:[%s9611_s27 + $0x660] sm:$0xf0]  ;;  %v8629_v45 = vld [vmem:[%s9611_s27 + $0x60c] sm:$0xf] }
 0x2cc   : > { %v10254_v32 = vsel %vm1177_vm6, %v1174_v10, %v1176_v27  ;;  %v6672_v30 = vor.u32 %v8640_v16, %v6671_v15 }
 0x2cd   : > { %2151 = vmatpush.bf16.msrb.mxu0 %v6368_v34  ;;  %2164 = vmatpush.bf16.msrb.mxu1 %v6372_v37  ;;  %v6804_v34 = vor.u32 %v8668_v22, %v6801_v24  ;;  %v8664_v37 = vld [vmem:[%s9611_s27 + $0x71c] sm:$0xf0]  ;;  %v6716_v22 = vor.u32 %v8645_v11, %v6713_v12  ;;  %v8641_v24 = vld [vmem:[%s9611_s27 + $0x664] sm:$0xf0]  ;;  %v8683_v11 = vld [vmem:[%s9611_s27 + $0x7b4] sm:$0xf0] }
 0x2ce   : > { %2177 = vmatpush.bf16.msrb.mxu2 %v6376_v38  ;;  %v8660_v38 = vld [vmem:[%s9611_s27 + $0x704] sm:$0xf]  ;;  %v6768_v46 = vor.u32 %v8664_v37, %v6767_v36  ;;  %v8679_v12 = vld [vmem:[%s9611_s27 + $0x79c] sm:$0xf] }
 0x2cf   : > { %2190 = vmatpush.bf16.msrb.mxu3 %v6380_v42  ;;  %v8665_v42 = vld [vmem:[%s9611_s27 + $0x724] sm:$0xf0]  ;;  %v1105_v47 = vpop.f32.mrf.mxu3  ;;  %v6772_v50 = vor.u32 %v8660_v38, %v6769_v40  ;;  %v6641_v38 = vld [vmem:[%s9611_s27 + $0x620] sm:$0xf0] }
 0x2d1   : > { %2152 = vmatpush.bf16.msrb.mxu0 %v6336_v51  ;;  %2165 = vmatpush.bf16.msrb.mxu1 %v6340_v56  ;;  %v6776_v51 = vor.u32 %v8665_v42, %v6775_v41  ;;  %v6743_v56 = vld [vmem:[%s9611_s27 + $0x6c8] sm:$0xf]  ;;  %v1129_v60 = vpop.f32.mrf.mxu1  ;;  %v1116_v63 = vpop.f32.mrf.mxu0  ;;  %v2286_v41 = vrot.slane %v9905_v48, 3  ;;  %v2287_v42 = vrot.slane %v9907_v49, 2 }
 0x2d2   : > { %2178 = vmatpush.bf16.msrb.mxu2 %v6344_v57  ;;  %v8657_v57 = vld [vmem:[%s9611_s27 + $0x6e4] sm:$0xf0] }
 0x2d3   : > { %2191 = vmatpush.bf16.msrb.mxu3 %v6348_v61 }
 0x2d4   : > { %2166 = vmatmul.bf16.vlgmr.msrb.gmra.mxu1 %v10165_v29  ;;  %2153 = vmatmul.bf16.vlgmr.msrb.gmra.mxu0 %v10165_v29 }
 0x2d5   : > { %2611 = vmatpush.bf16.msra.mxu0 %v6864_v62  ;;  %2624 = vmatpush.bf16.msra.mxu1 %v6868_v0  ;;  %v1170_v62 = vrot.slane %v1129_v60, 6  ;;  %v6740_v0 = vor.u32 %v8652_v53, %v6737_v55  ;;  %v6887_v55 = vld [vmem:[%s9611_s27 + $0x7d8] sm:$0xf]  ;;  %v6889_v60 = vld [vmem:[%s9611_s27 + $0x7f8] sm:$0xf0] }
 0x2d6   : > { %2637 = vmatpush.bf16.msra.mxu2 %v6872_v2  ;;  %2192 = vmatmul.bf16.vlgmr.msrb.gmra.mxu3 %v10165_v29  ;;  %v6744_v2 = vor.u32 %v8657_v57, %v6743_v56  ;;  %v8691_v56 = vld [vmem:[%s9611_s27 + $0x7f4] sm:$0xf0] }
 0x2d7   : > { %2650 = vmatpush.bf16.msra.mxu3 %v6876_v6  ;;  %2179 = vmatmul.bf16.vlgmr.msrb.gmra.mxu2 %v10165_v29  ;;  %v6735_v29 = vld [vmem:[%s9611_s27 + $0x6c0] sm:$0xf]  ;;  %v6748_v6 = vor.u32 %v8653_v58, %v6745_v59  ;;  %v1179_v10 = vsel %vm1173_vm4, %v1116_v63, %v1170_v62  ;;  %v8687_v59 = vld [vmem:[%s9611_s27 + $0x7dc] sm:$0xf] }
 0x2d8   : > { %v6736_v61 = vor.u32 %v8656_v52, %v6735_v29  ;;  %v8686_v29 = vld [vmem:[%s9611_s27 + $0x7d4] sm:$0xf]  ;;  %v6892_v7 = vor.u32 %v8687_v59, %v6889_v60  ;;  %v6719_v59 = vld [vmem:[%s9611_s27 + $0x690] sm:$0xf] }
 0x2d9   : > { %2612 = vmatpush.bf16.msra.mxu0 %v6832_v14  ;;  %2625 = vmatpush.bf16.msra.mxu1 %v6836_v18  ;;  %v6704_v14 = vor.u32 %v8648_v4, %v6703_v3  ;;  %v6712_v18 = vor.u32 %v8649_v9, %v6711_v8  ;;  %v1155_v25 = vpop.f32.mrf.mxu3  ;;  %v1131_v28 = vpop.f32.mrf.mxu1  ;;  %v6888_v3 = vor.u32 %v8691_v56, %v6887_v55  ;;  %v6847_v4 = vld [vmem:[%s9611_s27 + $0x790] sm:$0xf]  ;;  %v6849_v9 = vld [vmem:[%s9611_s27 + $0x7b0] sm:$0xf0] }
 0x2da   : > { %2638 = vmatpush.bf16.msra.mxu2 %v6840_v20  ;;  %v1142_v13 = vpop.f32.mrf.mxu2  ;;  %v8636_v20 = vld [vmem:[%s9611_s27 + $0x644] sm:$0xf]  ;;  %v1172_v27 = vrot.slane %v1155_v25, 2  ;;  %v1118_v36 = vpop.f32.mrf.mxu0  ;;  %v6825_v25 = vld [vmem:[%s9611_s27 + $0x778] sm:$0xf0] }
 0x2db   : > { %2651 = vmatpush.bf16.msra.mxu3 %v6844_v23  ;;  %v1171_v21 = vrot.slane %v1142_v13, 4  ;;  %v6679_v23 = vld [vmem:[%s9611_s27 + $0x648] sm:$0xf]  ;;  %v6676_v31 = vor.u32 %v8636_v20, %v6673_v1  ;;  %v6857_v13 = vld [vmem:[%s9611_s27 + $0x7b8] sm:$0xf0] }
 0x2dc   : > { %v6680_v37 = vor.u32 %v8641_v24, %v6679_v23  ;;  %v8670_v20 = vld [vmem:[%s9611_s27 + $0x754] sm:$0xf]  ;;  %v6860_v1 = vor.u32 %v8679_v12, %v6857_v13  ;;  %v8675_v23 = vld [vmem:[%s9611_s27 + $0x774] sm:$0xf0]  ;;  %v8671_v24 = vld [vmem:[%s9611_s27 + $0x75c] sm:$0xf] }
 0x2dd   : > { %2613 = vmatpush.bf16.msra.mxu0 %v6800_v33  ;;  %2626 = vmatpush.bf16.msra.mxu1 %v6804_v34  ;;  %v6639_v33 = vld [vmem:[%s9611_s27 + $0x600] sm:$0xf]  ;;  %v1180_v40 = vsel %vm1175_vm5, %v1171_v21, %v1172_v27  ;;  %v6817_v21 = vld [vmem:[%s9611_s27 + $0x770] sm:$0xf0]  ;;  %v6783_v28 = vld [vmem:[%s9611_s27 + $0x710] sm:$0xf] }
 0x2de   : > { %2639 = vmatpush.bf16.msra.mxu2 %v6808_v35  ;;  %v8632_v34 = vld [vmem:[%s9611_s27 + $0x61c] sm:$0xf0]  ;;  %v8628_v35 = vld [vmem:[%s9611_s27 + $0x604] sm:$0xf]  ;;  %v10302_v47 = vsel %vm1177_vm6, %v1179_v10, %v1180_v40  ;;  %v6855_v10 = vld [vmem:[%s9611_s27 + $0x798] sm:$0xf]  ;;  %v6820_v19 = vor.u32 %v8670_v20, %v6817_v21 }
 0x2df   : > { %2652 = vmatpush.bf16.msra.mxu3 %v6812_v39  ;;  %v6647_v39 = vld [vmem:[%s9611_s27 + $0x608] sm:$0xf]  ;;  %v6640_v53 = vor.u32 %v8632_v34, %v6639_v33  ;;  %v6644_v57 = vor.u32 %v8628_v35, %v6641_v38  ;;  %v6856_v16 = vor.u32 %v8683_v11, %v6855_v10  ;;  %v6828_v33 = vor.u32 %v8671_v24, %v6825_v25  ;;  %v6785_v34 = vld [vmem:[%s9611_s27 + $0x730] sm:$0xf0]  ;;  %v6791_v35 = vld [vmem:[%s9611_s27 + $0x718] sm:$0xf] }
 0x2e0   : > { %v6648_v58 = vor.u32 %v8633_v44, %v6647_v39  ;;  %v8667_v36 = vld [vmem:[%s9611_s27 + $0x734] sm:$0xf0]  ;;  %v6793_v38 = vld [vmem:[%s9611_s27 + $0x738] sm:$0xf0]  ;;  %v6751_v40 = vld [vmem:[%s9611_s27 + $0x6d0] sm:$0xf] }
 0x2e1   : > { %2614 = vmatpush.bf16.msra.mxu0 %v6768_v46  ;;  %2627 = vmatpush.bf16.msra.mxu1 %v6772_v50  ;;  %v6649_v46 = vld [vmem:[%s9611_s27 + $0x628] sm:$0xf0]  ;;  %v6879_v50 = vld [vmem:[%s9611_s27 + $0x7d0] sm:$0xf]  ;;  %v8647_v10 = vld [vmem:[%s9611_s27 + $0x69c] sm:$0xf] }
 0x2e2   : > { %2640 = vmatpush.bf16.msra.mxu2 %v6776_v51  ;;  %v8690_v51 = vld [vmem:[%s9611_s27 + $0x7ec] sm:$0xf0]  ;;  %v1144_v52 = vpop.f32.mrf.mxu2  ;;  %v6652_v62 = vor.u32 %v8629_v45, %v6649_v46  ;;  %v8654_v45 = vld [vmem:[%s9611_s27 + $0x6d4] sm:$0xf]  ;;  %v6729_v11 = vld [vmem:[%s9611_s27 + $0x6b8] sm:$0xf0] }
 0x2e3   : > { %2653 = vmatpush.bf16.msra.mxu3 %v6780_v54  ;;  %v6881_v54 = vld [vmem:[%s9611_s27 + $0x7f0] sm:$0xf0]  ;;  %v6880_v63 = vor.u32 %v8690_v51, %v6879_v50  ;;  %v8658_v44 = vld [vmem:[%s9611_s27 + $0x6ec] sm:$0xf0]  ;;  %v8659_v52 = vld [vmem:[%s9611_s27 + $0x6f4] sm:$0xf0] }
 0x2e4   : > { %v6753_v51 = vld [vmem:[%s9611_s27 + $0x6f0] sm:$0xf0]  ;;  %v6752_v56 = vor.u32 %v8658_v44, %v6751_v40  ;;  %v8642_v20 = vld [vmem:[%s9611_s27 + $0x66c] sm:$0xf0]  ;;  %v8643_v24 = vld [vmem:[%s9611_s27 + $0x674] sm:$0xf0] }
 0x2e5   : > { %2615 = vmatpush.bf16.msra.mxu0 %v6736_v61  ;;  %2628 = vmatpush.bf16.msra.mxu1 %v6740_v0  ;;  %v2288_v61 = vsel %vm731_vm3, %v2287_v42, %v2286_v41  ;;  %v1157_v0 = vpop.f32.mrf.mxu3  ;;  %v6756_v60 = vor.u32 %v8654_v45, %v6753_v51  ;;  %v8635_v40 = vld [vmem:[%s9611_s27 + $0x634] sm:$0xf0]  ;;  %v7183_v44 = vld [vmem:[%s9611_s27 + $0x9c0] sm:$0xf]  ;;  %v7185_v51 = vld [vmem:[%s9611_s27 + $0x9e0] sm:$0xf0] }
 0x2e6   : > { %2641 = vmatpush.bf16.msra.mxu2 %v6744_v2  ;;  %v6884_v2 = vor.u32 %v8686_v29, %v6881_v54  ;;  %v10316_v8 = vpack.c.b16 %v2288_v61, %v2288_v61  ;;  %v6759_v29 = vld [vmem:[%s9611_s27 + $0x6d8] sm:$0xf]  ;;  %v6761_v54 = vld [vmem:[%s9611_s27 + $0x6f8] sm:$0xf0]  ;;  %v8646_v0 = vld [vmem:[%s9611_s27 + $0x694] sm:$0xf] }
 0x2e7   : > { %2654 = vmatpush.bf16.msra.mxu3 %v6748_v6  ;;  %v8678_v6 = vld [vmem:[%s9611_s27 + $0x794] sm:$0xf]  ;;  %v6760_v61 = vor.u32 %v8659_v52, %v6759_v29  ;;  %v8752_v45 = vld [vmem:[%s9611_s27 + $0x9dc] sm:$0xf0]  ;;  %v7191_v29 = vld [vmem:[%s9611_s27 + $0x9c8] sm:$0xf] }
 0x2e8   : > { %v6852_v15 = vor.u32 %v8678_v6, %v6849_v9  ;;  %v6727_v6 = vld [vmem:[%s9611_s27 + $0x698] sm:$0xf]  ;;  %v8753_v52 = vld [vmem:[%s9611_s27 + $0x9e4] sm:$0xf0] }
 0x2e9   : > { %2616 = vmatpush.bf16.msra.mxu0 %v6704_v14  ;;  %2629 = vmatpush.bf16.msra.mxu1 %v6708_v17  ;;  %v6848_v14 = vor.u32 %v8682_v5, %v6847_v4  ;;  %v6815_v17 = vld [vmem:[%s9611_s27 + $0x750] sm:$0xf] }
 0x2ea   : > { %2642 = vmatpush.bf16.msra.mxu2 %v6712_v18  ;;  %v8674_v18 = vld [vmem:[%s9611_s27 + $0x76c] sm:$0xf0] }
 0x2eb   : > { %2655 = vmatpush.bf16.msra.mxu3 %v6716_v22  ;;  %v6823_v22 = vld [vmem:[%s9611_s27 + $0x758] sm:$0xf]  ;;  %v6816_v26 = vor.u32 %v8674_v18, %v6815_v17  ;;  %v6687_v18 = vld [vmem:[%s9611_s27 + $0x650] sm:$0xf] }
 0x2ec   : > { %v6824_v27 = vor.u32 %v8675_v23, %v6823_v22  ;;  %v6689_v22 = vld [vmem:[%s9611_s27 + $0x670] sm:$0xf0]  ;;  %v6695_v23 = vld [vmem:[%s9611_s27 + $0x658] sm:$0xf] }
 0x2ed   : > { %2617 = vmatpush.bf16.msra.mxu0 %v6672_v30  ;;  %2630 = vmatpush.bf16.msra.mxu1 %v6676_v31  ;;  %v8666_v30 = vld [vmem:[%s9611_s27 + $0x72c] sm:$0xf0]  ;;  %v8662_v31 = vld [vmem:[%s9611_s27 + $0x714] sm:$0xf] }
 0x2ee   : > { %2643 = vmatpush.bf16.msra.mxu2 %v6680_v37  ;;  %v8663_v37 = vld [vmem:[%s9611_s27 + $0x71c] sm:$0xf]  ;;  %v6784_v39 = vor.u32 %v8666_v30, %v6783_v28  ;;  %v6788_v42 = vor.u32 %v8662_v31, %v6785_v34  ;;  %v6688_v28 = vor.u32 %v8642_v20, %v6687_v18  ;;  %v6655_v30 = vld [vmem:[%s9611_s27 + $0x610] sm:$0xf]  ;;  %v6696_v34 = vor.u32 %v8643_v24, %v6695_v23  ;;  %v8733_v18 = vld [vmem:[%s9611_s27 + $0x94c] sm:$0xf] }
 0x2ef   : > { %2656 = vmatpush.bf16.msra.mxu3 %v6684_v43  ;;  %v6792_v43 = vor.u32 %v8667_v36, %v6791_v35  ;;  %v6796_v50 = vor.u32 %v8663_v37, %v6793_v38  ;;  %v8634_v31 = vld [vmem:[%s9611_s27 + $0x62c] sm:$0xf0]  ;;  %v8630_v35 = vld [vmem:[%s9611_s27 + $0x614] sm:$0xf]  ;;  %v6663_v37 = vld [vmem:[%s9611_s27 + $0x618] sm:$0xf] }
 0x2f0   : > { %v6657_v36 = vld [vmem:[%s9611_s27 + $0x630] sm:$0xf0]  ;;  %v7129_v20 = vld [vmem:[%s9611_s27 + $0x968] sm:$0xf0]  ;;  %v8728_v23 = vld [vmem:[%s9611_s27 + $0x91c] sm:$0xf0] }
 0x2f1   : > { %2618 = vmatpush.bf16.msra.mxu0 %v6640_v53  ;;  %2631 = vmatpush.bf16.msra.mxu1 %v6644_v57  ;;  %v1597_v41 = vpop.f32.mrf.mxu1  ;;  %v8655_v53 = vld [vmem:[%s9611_s27 + $0x6dc] sm:$0xf]  ;;  %v1584_v55 = vpop.f32.mrf.mxu0  ;;  %v8724_v24 = vld [vmem:[%s9611_s27 + $0x904] sm:$0xf] }
 0x2f2   : > { %2644 = vmatpush.bf16.msra.mxu2 %v6648_v58  ;;  %v1687_v46 = vrot.slane %v1597_v41, 6  ;;  %v656_v57 = vld [vmem:[#allocation3] sm:$0xff] }
 0x2f3   : > { %2657 = vmatpush.bf16.msra.mxu3 %v6652_v62  ;;  %v1184_v12 = vadd.f32 %v10254_v32, %v656_v57  ;;  %v6732_v32 = vor.u32 %v8647_v10, %v6729_v11  ;;  %v8631_v41 = vld [vmem:[%s9611_s27 + $0x61c] sm:$0xf]  ;;  %v7119_v11 = vld [vmem:[%s9611_s27 + $0x940] sm:$0xf] }
 0x2f4   : > { %2632 = vmatmul.bf16.vlgmr.msra.gmra.mxu1 %v10316_v8  ;;  %2619 = vmatmul.bf16.vlgmr.msra.gmra.mxu0 %v10316_v8  ;;  %v1693_v58 = vsel %vm1173_vm4, %v1584_v55, %v1687_v46  ;;  %v8748_v46 = vld [vmem:[%s9611_s27 + $0x9c4] sm:$0xf]  ;;  %v8749_v55 = vld [vmem:[%s9611_s27 + $0x9cc] sm:$0xf] }
 0x2f5   : > { %2663 = vmatpush.bf16.msrb.mxu0 %v6880_v63  ;;  %2676 = vmatpush.bf16.msrb.mxu1 %v6884_v2  ;;  %v8650_v63 = vld [vmem:[%s9611_s27 + $0x6ac] sm:$0xf0]  ;;  %v6721_v2 = vld [vmem:[%s9611_s27 + $0x6b0] sm:$0xf0] }
 0x2f6   : > { %2689 = vmatpush.bf16.msrb.mxu2 %v6888_v3  ;;  %2658 = vmatmul.bf16.vlgmr.msra.gmra.mxu3 %v10316_v8  ;;  %v6764_v3 = vor.u32 %v8655_v53, %v6761_v54  ;;  %v6720_v13 = vor.u32 %v8650_v63, %v6719_v59  ;;  %v6660_v53 = vor.u32 %v8630_v35, %v6657_v36  ;;  %v8740_v63 = vld [vmem:[%s9611_s27 + $0x984] sm:$0xf] }
 0x2f7   : > { %2702 = vmatpush.bf16.msrb.mxu3 %v6892_v7  ;;  %2645 = vmatmul.bf16.vlgmr.msra.gmra.mxu2 %v10316_v8  ;;  %v8651_v7 = vld [vmem:[%s9611_s27 + $0x6b4] sm:$0xf0]  ;;  %v6664_v54 = vor.u32 %v8635_v40, %v6663_v37  ;;  %v7188_v59 = vor.u32 %v8748_v46, %v7185_v51 }
 0x2f8   : > { %v6728_v17 = vor.u32 %v8651_v7, %v6727_v6  ;;  %v7161_v6 = vld [vmem:[%s9611_s27 + $0x9a8] sm:$0xf0] }
 0x2f9   : > { %2664 = vmatpush.bf16.msrb.mxu0 %v6848_v14  ;;  %2677 = vmatpush.bf16.msrb.mxu1 %v6852_v15  ;;  %v1623_v5 = vpop.f32.mrf.mxu3  ;;  %v1599_v14 = vpop.f32.mrf.mxu1 }
 0x2fa   : > { %2690 = vmatpush.bf16.msrb.mxu2 %v6856_v16  ;;  %v1610_v62 = vpop.f32.mrf.mxu2  ;;  %v1689_v9 = vrot.slane %v1623_v5, 2  ;;  %v6724_v16 = vor.u32 %v8646_v0, %v6721_v2  ;;  %v7153_v2 = vld [vmem:[%s9611_s27 + $0x9a0] sm:$0xf0]  ;;  %v8741_v5 = vld [vmem:[%s9611_s27 + $0x98c] sm:$0xf] }
 0x2fb   : > { %2703 = vmatpush.bf16.msrb.mxu3 %v6860_v1  ;;  %v1688_v4 = vrot.slane %v1610_v62, 4  ;;  %v8638_v1 = vld [vmem:[%s9611_s27 + $0x654] sm:$0xf]  ;;  %v8744_v62 = vld [vmem:[%s9611_s27 + $0x99c] sm:$0xf0]  ;;  %v7164_v14 = vor.u32 %v8741_v5, %v7161_v6 }
 0x2fd   : > { %2665 = vmatpush.bf16.msrb.mxu0 %v6816_v26  ;;  %2678 = vmatpush.bf16.msrb.mxu1 %v6820_v19  ;;  %v1694_v15 = vsel %vm1175_vm5, %v1688_v4, %v1689_v9  ;;  %v8639_v26 = vld [vmem:[%s9611_s27 + $0x65c] sm:$0xf]  ;;  %v8745_v4 = vld [vmem:[%s9611_s27 + $0x9a4] sm:$0xf0]  ;;  %v7156_v9 = vor.u32 %v8740_v63, %v7153_v2  ;;  %v8709_v2 = vld [vmem:[%s9611_s27 + $0x88c] sm:$0xf] }
 0x2fe   : > { %2691 = vmatpush.bf16.msrb.mxu2 %v6824_v27  ;;  %v1695_v21 = vsel %vm1177_vm6, %v1693_v58, %v1694_v15  ;;  %v6697_v19 = vld [vmem:[%s9611_s27 + $0x678] sm:$0xf0]  ;;  %v1586_v27 = vpop.f32.mrf.mxu0  ;;  %v7184_v58 = vor.u32 %v8752_v45, %v7183_v44  ;;  %v7121_v15 = vld [vmem:[%s9611_s27 + $0x960] sm:$0xf0]  ;;  %v8717_v44 = vld [vmem:[%s9611_s27 + $0x8cc] sm:$0xf] }
 0x2ff   : > { %2704 = vmatpush.bf16.msrb.mxu3 %v6828_v33  ;;  %v10369_v25 = vadd.f32 %v1695_v21, %v1184_v12  ;;  %v6692_v33 = vor.u32 %v8638_v1, %v6689_v22  ;;  %v8736_v12 = vld [vmem:[%s9611_s27 + $0x95c] sm:$0xf0]  ;;  %v7095_v27 = vld [vmem:[%s9611_s27 + $0x908] sm:$0xf]  ;;  %v7065_v45 = vld [vmem:[%s9611_s27 + $0x8e8] sm:$0xf0] }
 0x300   : > { %v7120_v1 = vor.u32 %v8736_v12, %v7119_v11  ;;  %v7087_v22 = vld [vmem:[%s9611_s27 + $0x900] sm:$0xf]  ;;  %v8713_v63 = vld [vmem:[%s9611_s27 + $0x8a4] sm:$0xf0] }
 0x301   : > { %2666 = vmatpush.bf16.msrb.mxu0 %v6784_v39  ;;  %2679 = vmatpush.bf16.msrb.mxu1 %v6788_v42  ;;  %v6700_v39 = vor.u32 %v8639_v26, %v6697_v19  ;;  %v6665_v42 = vld [vmem:[%s9611_s27 + $0x638] sm:$0xf0]  ;;  %v7132_v26 = vor.u32 %v8733_v18, %v7129_v20  ;;  %v7089_v19 = vld [vmem:[%s9611_s27 + $0x920] sm:$0xf0]  ;;  %v6991_v11 = vld [vmem:[%s9611_s27 + $0x840] sm:$0xf] }
 0x302   : > { %2692 = vmatpush.bf16.msrb.mxu2 %v6792_v43  ;;  %v1612_v38 = vpop.f32.mrf.mxu2  ;;  %v1625_v43 = vpop.f32.mrf.mxu3  ;;  %v6668_v57 = vor.u32 %v8631_v41, %v6665_v42  ;;  %v7092_v36 = vor.u32 %v8724_v24, %v7089_v19  ;;  %v7057_v41 = vld [vmem:[%s9611_s27 + $0x8e0] sm:$0xf0]  ;;  %v7063_v42 = vld [vmem:[%s9611_s27 + $0x8c8] sm:$0xf]  ;;  %v8704_v12 = vld [vmem:[%s9611_s27 + $0x85c] sm:$0xf0] }
 0x303   : > { %2705 = vmatpush.bf16.msrb.mxu3 %v6796_v50  ;;  %v6656_v50 = vor.u32 %v8634_v31, %v6655_v30  ;;  %v8725_v30 = vld [vmem:[%s9611_s27 + $0x90c] sm:$0xf]  ;;  %v8716_v38 = vld [vmem:[%s9611_s27 + $0x8c4] sm:$0xf]  ;;  %v8721_v43 = vld [vmem:[%s9611_s27 + $0x8e4] sm:$0xf0] }
 0x304   : > { %v7097_v31 = vld [vmem:[%s9611_s27 + $0x928] sm:$0xf0]  ;;  %v8692_v24 = vld [vmem:[%s9611_s27 + $0x804] sm:$0xf] }
 0x305   : > { %2667 = vmatpush.bf16.msrb.mxu0 %v6752_v56  ;;  %2680 = vmatpush.bf16.msrb.mxu1 %v6756_v60  ;;  %v7193_v56 = vld [vmem:[%s9611_s27 + $0x9e8] sm:$0xf0]  ;;  %v7192_v60 = vor.u32 %v8753_v52, %v7191_v29  ;;  %v7100_v40 = vor.u32 %v8725_v30, %v7097_v31  ;;  %v7023_v52 = vld [vmem:[%s9611_s27 + $0x880] sm:$0xf]  ;;  %v2804_v30 = vrot.slane %v9905_v48, 4  ;;  %v2805_v31 = vrot.slane %v9907_v49, 3 }
 0x306   : > { %2693 = vmatpush.bf16.msrb.mxu2 %v6760_v61  ;;  %v7151_v61 = vld [vmem:[%s9611_s27 + $0x980] sm:$0xf]  ;;  %v7196_v0 = vor.u32 %v8749_v55, %v7193_v56  ;;  %v8701_v20 = vld [vmem:[%s9611_s27 + $0x84c] sm:$0xf] }
 0x307   : > { %2706 = vmatpush.bf16.msrb.mxu3 %v6764_v3  ;;  %v7159_v3 = vld [vmem:[%s9611_s27 + $0x988] sm:$0xf]  ;;  %v7152_v7 = vor.u32 %v8744_v62, %v7151_v61  ;;  %v8712_v56 = vld [vmem:[%s9611_s27 + $0x89c] sm:$0xf0] }
 0x308   : > { %v7160_v10 = vor.u32 %v8745_v4, %v7159_v3  ;;  %v7031_v62 = vld [vmem:[%s9611_s27 + $0x888] sm:$0xf]  ;;  %v7033_v3 = vld [vmem:[%s9611_s27 + $0x8a8] sm:$0xf0]  ;;  %v7024_v5 = vor.u32 %v8712_v56, %v7023_v52  ;;  %v7167_v56 = vld [vmem:[%s9611_s27 + $0x990] sm:$0xf] }
 0x309   : > { %2668 = vmatpush.bf16.msrb.mxu0 %v6720_v13  ;;  %2681 = vmatpush.bf16.msrb.mxu1 %v6724_v16  ;;  %v8732_v13 = vld [vmem:[%s9611_s27 + $0x944] sm:$0xf]  ;;  %v7127_v16 = vld [vmem:[%s9611_s27 + $0x948] sm:$0xf] }
 0x30a   : > { %2694 = vmatpush.bf16.msrb.mxu2 %v6728_v17  ;;  %v8737_v17 = vld [vmem:[%s9611_s27 + $0x964] sm:$0xf0]  ;;  %v7124_v21 = vor.u32 %v8732_v13, %v7121_v15  ;;  %v8700_v13 = vld [vmem:[%s9611_s27 + $0x844] sm:$0xf] }
 0x30b   : > { %2707 = vmatpush.bf16.msrb.mxu3 %v6732_v32  ;;  %v7128_v32 = vor.u32 %v8737_v17, %v7127_v16  ;;  %v6993_v15 = vld [vmem:[%s9611_s27 + $0x860] sm:$0xf0]  ;;  %v6999_v16 = vld [vmem:[%s9611_s27 + $0x848] sm:$0xf] }
 0x30c   : > { %v8705_v17 = vld [vmem:[%s9611_s27 + $0x864] sm:$0xf0] }
 0x30d   : > { %2669 = vmatpush.bf16.msrb.mxu0 %v6688_v28  ;;  %2682 = vmatpush.bf16.msrb.mxu1 %v6692_v33  ;;  %v8729_v28 = vld [vmem:[%s9611_s27 + $0x924] sm:$0xf0]  ;;  %v7088_v33 = vor.u32 %v8728_v23, %v7087_v22  ;;  %v6959_v22 = vld [vmem:[%s9611_s27 + $0x800] sm:$0xf]  ;;  %v7000_v19 = vor.u32 %v8705_v17, %v6999_v16 }
 0x30e   : > { %2695 = vmatpush.bf16.msrb.mxu2 %v6696_v34  ;;  %v7055_v34 = vld [vmem:[%s9611_s27 + $0x8c0] sm:$0xf]  ;;  %v7096_v37 = vor.u32 %v8729_v28, %v7095_v27  ;;  %v6961_v27 = vld [vmem:[%s9611_s27 + $0x820] sm:$0xf0]  ;;  %v6967_v28 = vld [vmem:[%s9611_s27 + $0x808] sm:$0xf] }
 0x30f   : > { %2708 = vmatpush.bf16.msrb.mxu3 %v6700_v39  ;;  %v8696_v23 = vld [vmem:[%s9611_s27 + $0x81c] sm:$0xf0] }
 0x311   : > { %2670 = vmatpush.bf16.msrb.mxu0 %v6656_v50  ;;  %2683 = vmatpush.bf16.msrb.mxu1 %v6660_v53  ;;  %v1649_v35 = vpop.f32.mrf.mxu1  ;;  %v1636_v46 = vpop.f32.mrf.mxu0  ;;  %v657_v50 = vld [vmem:[#allocation3 + $0x8] sm:$0xff]  ;;  %v7060_v53 = vor.u32 %v8716_v38, %v7057_v41  ;;  %v7199_v38 = vld [vmem:[%s9611_s27 + $0x9d0] sm:$0xf]  ;;  %v6960_v41 = vor.u32 %v8696_v23, %v6959_v22  ;;  %v7105_v22 = vld [vmem:[%s9611_s27 + $0x930] sm:$0xf0] }
 0x312   : > { %2696 = vmatpush.bf16.msrb.mxu2 %v6664_v54  ;;  %v1690_v39 = vrot.slane %v1649_v35, 6  ;;  %v7064_v54 = vor.u32 %v8721_v43, %v7063_v42  ;;  %v1185_v4 = vadd.f32 %v10302_v47, %v657_v50  ;;  %v8697_v35 = vld [vmem:[%s9611_s27 + $0x824] sm:$0xf0]  ;;  %v7201_v42 = vld [vmem:[%s9611_s27 + $0x9f0] sm:$0xf0] }
 0x313   : > { %2709 = vmatpush.bf16.msrb.mxu3 %v6668_v57  ;;  %v8708_v57 = vld [vmem:[%s9611_s27 + $0x884] sm:$0xf]  ;;  %v7207_v43 = vld [vmem:[%s9611_s27 + $0x9d8] sm:$0xf]  ;;  %v8751_v50 = vld [vmem:[%s9611_s27 + $0x9dc] sm:$0xf] }
 0x314   : > { %2684 = vmatmul.bf16.vlgmr.msrb.gmra.mxu1 %v10316_v8  ;;  %2671 = vmatmul.bf16.vlgmr.msrb.gmra.mxu0 %v10316_v8  ;;  %v1696_v29 = vsel %vm1173_vm4, %v1636_v46, %v1690_v39  ;;  %v8754_v39 = vld [vmem:[%s9611_s27 + $0x9ec] sm:$0xf0]  ;;  %v6968_v46 = vor.u32 %v8697_v35, %v6967_v28  ;;  %v7111_v23 = vld [vmem:[%s9611_s27 + $0x918] sm:$0xf]  ;;  %v8718_v35 = vld [vmem:[%s9611_s27 + $0x8d4] sm:$0xf] }
 0x315   : > { %3129 = vmatpush.bf16.msra.mxu0 %v7184_v58  ;;  %3142 = vmatpush.bf16.msra.mxu1 %v7188_v59  ;;  %v7025_v58 = vld [vmem:[%s9611_s27 + $0x8a0] sm:$0xf0]  ;;  %v7068_v59 = vor.u32 %v8717_v44, %v7065_v45  ;;  %v8755_v44 = vld [vmem:[%s9611_s27 + $0x9f4] sm:$0xf0]  ;;  %v6964_v45 = vor.u32 %v8692_v24, %v6961_v27  ;;  %v7071_v28 = vld [vmem:[%s9611_s27 + $0x8d0] sm:$0xf] }
 0x316   : > { %3155 = vmatpush.bf16.msra.mxu2 %v7192_v60  ;;  %2710 = vmatmul.bf16.vlgmr.msrb.gmra.mxu3 %v10316_v8  ;;  %v8731_v24 = vld [vmem:[%s9611_s27 + $0x934] sm:$0xf0] }
 0x317   : > { %3168 = vmatpush.bf16.msra.mxu3 %v7196_v0  ;;  %2697 = vmatmul.bf16.vlgmr.msrb.gmra.mxu2 %v10316_v8  ;;  %v8720_v8 = vld [vmem:[%s9611_s27 + $0x8dc] sm:$0xf0] }
 0x318   : > { %v7056_v51 = vor.u32 %v8720_v8, %v7055_v34 }
 0x319   : > { %3130 = vmatpush.bf16.msra.mxu0 %v7152_v7  ;;  %3143 = vmatpush.bf16.msra.mxu1 %v7156_v9  ;;  %v1675_v61 = vpop.f32.mrf.mxu3  ;;  %v1651_v6 = vpop.f32.mrf.mxu1  ;;  %v7028_v9 = vor.u32 %v8708_v57, %v7025_v58  ;;  %v8746_v57 = vld [vmem:[%s9611_s27 + $0x9ac] sm:$0xf0]  ;;  %v8742_v58 = vld [vmem:[%s9611_s27 + $0x994] sm:$0xf] }
 0x31a   : > { %3156 = vmatpush.bf16.msra.mxu2 %v7160_v10  ;;  %v1662_v55 = vpop.f32.mrf.mxu2  ;;  %v1692_v0 = vrot.slane %v1675_v61, 2  ;;  %v7032_v10 = vor.u32 %v8713_v63, %v7031_v62  ;;  %v7169_v61 = vld [vmem:[%s9611_s27 + $0x9b0] sm:$0xf0]  ;;  %v7175_v62 = vld [vmem:[%s9611_s27 + $0x998] sm:$0xf] }
 0x31b   : > { %3169 = vmatpush.bf16.msra.mxu3 %v7164_v14  ;;  %v1691_v60 = vrot.slane %v1662_v55, 4  ;;  %v7036_v14 = vor.u32 %v8709_v2, %v7033_v3  ;;  %v7208_v55 = vor.u32 %v8755_v44, %v7207_v43  ;;  %v8747_v63 = vld [vmem:[%s9611_s27 + $0x9b4] sm:$0xf0]  ;;  %v7177_v2 = vld [vmem:[%s9611_s27 + $0x9b8] sm:$0xf0]  ;;  %v7168_v3 = vor.u32 %v8746_v57, %v7167_v56 }
 0x31c   : > { %v7135_v6 = vld [vmem:[%s9611_s27 + $0x950] sm:$0xf]  ;;  %v7047_v57 = vld [vmem:[%s9611_s27 + $0x898] sm:$0xf] }
 0x31d   : > { %3131 = vmatpush.bf16.msra.mxu0 %v7120_v1  ;;  %3144 = vmatpush.bf16.msra.mxu1 %v7124_v21  ;;  %v1697_v7 = vsel %vm1175_vm5, %v1691_v60, %v1692_v0  ;;  %v7001_v1 = vld [vmem:[%s9611_s27 + $0x868] sm:$0xf0]  ;;  %v1638_v21 = vpop.f32.mrf.mxu0  ;;  %v8743_v0 = vld [vmem:[%s9611_s27 + $0x99c] sm:$0xf] }
 0x31e   : > { %3157 = vmatpush.bf16.msra.mxu2 %v7128_v32  ;;  %v1698_v47 = vsel %vm1177_vm6, %v1696_v29, %v1697_v7  ;;  %v6992_v32 = vor.u32 %v8704_v12, %v6991_v11  ;;  %v7004_v34 = vor.u32 %v8701_v20, %v7001_v1  ;;  %v2806_v29 = vsel %vm731_vm3, %v2805_v31, %v2804_v30  ;;  %v8738_v7 = vld [vmem:[%s9611_s27 + $0x96c] sm:$0xf0]  ;;  %v7137_v11 = vld [vmem:[%s9611_s27 + $0x970] sm:$0xf0]  ;;  %v7143_v12 = vld [vmem:[%s9611_s27 + $0x958] sm:$0xf] }
 0x31f   : > { %3170 = vmatpush.bf16.msra.mxu3 %v7132_v26  ;;  %v10443_v18 = vadd.f32 %v1698_v47, %v1185_v4  ;;  %v6996_v26 = vor.u32 %v8700_v13, %v6993_v15  ;;  %v10469_v60 = vpack.c.b16 %v2806_v29, %v2806_v29  ;;  %v7172_v4 = vor.u32 %v8742_v58, %v7169_v61  ;;  %v8739_v13 = vld [vmem:[%s9611_s27 + $0x974] sm:$0xf0]  ;;  %v8735_v47 = vld [vmem:[%s9611_s27 + $0x95c] sm:$0xf]  ;;  %v7103_v20 = vld [vmem:[%s9611_s27 + $0x910] sm:$0xf] }
 0x320   : > { %v7136_v15 = vor.u32 %v8738_v7, %v7135_v6  ;;  %v7144_v17 = vor.u32 %v8739_v13, %v7143_v12  ;;  %v8730_v1 = vld [vmem:[%s9611_s27 + $0x92c] sm:$0xf0]  ;;  %v8726_v21 = vld [vmem:[%s9611_s27 + $0x914] sm:$0xf]  ;;  %v8715_v58 = vld [vmem:[%s9611_s27 + $0x8b4] sm:$0xf0] }
 0x321   : > { %3132 = vmatpush.bf16.msra.mxu0 %v7088_v33  ;;  %3145 = vmatpush.bf16.msra.mxu1 %v7092_v36  ;;  %v8693_v36 = vld [vmem:[%s9611_s27 + $0x80c] sm:$0xf]  ;;  %v1677_v8 = vpop.f32.mrf.mxu3  ;;  %v7104_v27 = vor.u32 %v8730_v1, %v7103_v20  ;;  %v7108_v31 = vor.u32 %v8726_v21, %v7105_v22  ;;  %v8714_v29 = vld [vmem:[%s9611_s27 + $0x8ac] sm:$0xf0]  ;;  %v8711_v61 = vld [vmem:[%s9611_s27 + $0x89c] sm:$0xf] }
 0x322   : > { %3158 = vmatpush.bf16.msra.mxu2 %v7096_v37  ;;  %v1664_v33 = vpop.f32.mrf.mxu2  ;;  %v6969_v37 = vld [vmem:[%s9611_s27 + $0x828] sm:$0xf0]  ;;  %v7073_v8 = vld [vmem:[%s9611_s27 + $0x8f0] sm:$0xf0]  ;;  %v8706_v6 = vld [vmem:[%s9611_s27 + $0x86c] sm:$0xf0] }
 0x323   : > { %3171 = vmatpush.bf16.msra.mxu3 %v7100_v40  ;;  %v8750_v40 = vld [vmem:[%s9611_s27 + $0x9d4] sm:$0xf]  ;;  %v6972_v52 = vor.u32 %v8693_v36, %v6969_v37  ;;  %v7112_v33 = vor.u32 %v8731_v24, %v7111_v23  ;;  %v7015_v12 = vld [vmem:[%s9611_s27 + $0x858] sm:$0xf]  ;;  %v6975_v20 = vld [vmem:[%s9611_s27 + $0x810] sm:$0xf] }
 0x324   : > { %v8702_v7 = vld [vmem:[%s9611_s27 + $0x854] sm:$0xf]  ;;  %v8707_v13 = vld [vmem:[%s9611_s27 + $0x874] sm:$0xf0]  ;;  %v8698_v1 = vld [vmem:[%s9611_s27 + $0x82c] sm:$0xf0] }
 0x325   : > { %3133 = vmatpush.bf16.msra.mxu0 %v7056_v51  ;;  %3146 = vmatpush.bf16.msra.mxu1 %v7060_v53  ;;  %v7209_v51 = vld [vmem:[%s9611_s27 + $0x9f8] sm:$0xf0]  ;;  %v7200_v53 = vor.u32 %v8754_v39, %v7199_v38  ;;  %v7079_v38 = vld [vmem:[%s9611_s27 + $0x8d8] sm:$0xf]  ;;  %v6977_v22 = vld [vmem:[%s9611_s27 + $0x830] sm:$0xf0] }
 0x326   : > { %3159 = vmatpush.bf16.msra.mxu2 %v7064_v54  ;;  %v7204_v54 = vor.u32 %v8750_v40, %v7201_v42  ;;  %v8723_v39 = vld [vmem:[%s9611_s27 + $0x8f4] sm:$0xf0]  ;;  %v8719_v40 = vld [vmem:[%s9611_s27 + $0x8dc] sm:$0xf] }
 0x327   : > { %3172 = vmatpush.bf16.msra.mxu3 %v7068_v59  ;;  %v7212_v59 = vor.u32 %v8751_v50, %v7209_v51  ;;  %v7080_v50 = vor.u32 %v8723_v39, %v7079_v38  ;;  %v6983_v23 = vld [vmem:[%s9611_s27 + $0x818] sm:$0xf] }
 0x329   : > { %3134 = vmatpush.bf16.msra.mxu0 %v7024_v5  ;;  %3147 = vmatpush.bf16.msra.mxu1 %v7028_v9  ;;  %v7176_v5 = vor.u32 %v8747_v63, %v7175_v62  ;;  %v8734_v9 = vld [vmem:[%s9611_s27 + $0x954] sm:$0xf]  ;;  %v7049_v62 = vld [vmem:[%s9611_s27 + $0x8b8] sm:$0xf0] }
 0x32a   : > { %3160 = vmatpush.bf16.msra.mxu2 %v7032_v10  ;;  %v7180_v10 = vor.u32 %v8743_v0, %v7177_v2  ;;  %v7140_v16 = vor.u32 %v8734_v9, %v7137_v11  ;;  %v7009_v11 = vld [vmem:[%s9611_s27 + $0x870] sm:$0xf0] }
 0x32b   : > { %3173 = vmatpush.bf16.msra.mxu3 %v7036_v14  ;;  %v7145_v14 = vld [vmem:[%s9611_s27 + $0x978] sm:$0xf0]  ;;  %v7012_v21 = vor.u32 %v8702_v7, %v7009_v11  ;;  %v7407_v11 = vld [vmem:[%s9611_s27 + $0xb00] sm:$0xf] }
 0x32d   : > { %3135 = vmatpush.bf16.msra.mxu0 %v6992_v32  ;;  %3148 = vmatpush.bf16.msra.mxu1 %v6996_v26  ;;  %v7148_v32 = vor.u32 %v8735_v47, %v7145_v14  ;;  %v8727_v26 = vld [vmem:[%s9611_s27 + $0x91c] sm:$0xf] }
 0x32e   : > { %3161 = vmatpush.bf16.msra.mxu2 %v7000_v19  ;;  %v7113_v19 = vld [vmem:[%s9611_s27 + $0x938] sm:$0xf0] }
 0x32f   : > { %3174 = vmatpush.bf16.msra.mxu3 %v7004_v34  ;;  %v8722_v34 = vld [vmem:[%s9611_s27 + $0x8ec] sm:$0xf0]  ;;  %v7116_v37 = vor.u32 %v8727_v26, %v7113_v19  ;;  %v8703_v14 = vld [vmem:[%s9611_s27 + $0x85c] sm:$0xf]  ;;  %v8699_v19 = vld [vmem:[%s9611_s27 + $0x834] sm:$0xf0] }
 0x330   : > { %v7072_v43 = vor.u32 %v8722_v34, %v7071_v28  ;;  %v6985_v28 = vld [vmem:[%s9611_s27 + $0x838] sm:$0xf0]  ;;  %v8812_v34 = vld [vmem:[%s9611_s27 + $0xbc4] sm:$0xf]  ;;  %v6984_v39 = vor.u32 %v8699_v19, %v6983_v23 }
 0x331   : > { %3136 = vmatpush.bf16.msra.mxu0 %v6960_v41  ;;  %3149 = vmatpush.bf16.msra.mxu1 %v6964_v45  ;;  %v2115_v30 = vpop.f32.mrf.mxu1  ;;  %v7081_v41 = vld [vmem:[%s9611_s27 + $0x8f8] sm:$0xf0]  ;;  %v2102_v42 = vpop.f32.mrf.mxu0  ;;  %v7039_v45 = vld [vmem:[%s9611_s27 + $0x890] sm:$0xf] }
 0x332   : > { %3162 = vmatpush.bf16.msra.mxu2 %v6968_v46  ;;  %v2205_v36 = vrot.slane %v2115_v30, 6  ;;  %v7076_v46 = vor.u32 %v8718_v35, %v7073_v8  ;;  %v7040_v63 = vor.u32 %v8714_v29, %v7039_v45  ;;  %v6976_v35 = vor.u32 %v8698_v1, %v6975_v20  ;;  %v8817_v8 = vld [vmem:[%s9611_s27 + $0xbe4] sm:$0xf0]  ;;  %v8789_v20 = vld [vmem:[%s9611_s27 + $0xb0c] sm:$0xf] }
 0x333   : > { %3175 = vmatpush.bf16.msra.mxu3 %v6972_v52  ;;  %v8710_v52 = vld [vmem:[%s9611_s27 + $0x894] sm:$0xf]  ;;  %v7417_v1 = vld [vmem:[%s9611_s27 + $0xb28] sm:$0xf0] }
 0x334   : > { %3150 = vmatmul.bf16.vlgmr.msra.gmra.mxu1 %v10469_v60  ;;  %3137 = vmatmul.bf16.vlgmr.msra.gmra.mxu0 %v10469_v60  ;;  %v2211_v44 = vsel %vm1173_vm4, %v2102_v42, %v2205_v36  ;;  %v7505_v36 = vld [vmem:[%s9611_s27 + $0xbe0] sm:$0xf0]  ;;  %v7420_v19 = vor.u32 %v8789_v20, %v7417_v1 }
 0x335   : > { %3181 = vmatpush.bf16.msrb.mxu0 %v7200_v53  ;;  %3194 = vmatpush.bf16.msrb.mxu1 %v7204_v54  ;;  %v7041_v53 = vld [vmem:[%s9611_s27 + $0x8b0] sm:$0xf0]  ;;  %v7084_v54 = vor.u32 %v8719_v40, %v7081_v41  ;;  %v8813_v40 = vld [vmem:[%s9611_s27 + $0xbcc] sm:$0xf] }
 0x336   : > { %3207 = vmatpush.bf16.msrb.mxu2 %v7208_v55  ;;  %3176 = vmatmul.bf16.vlgmr.msra.gmra.mxu3 %v10469_v60  ;;  %v7513_v41 = vld [vmem:[%s9611_s27 + $0xbe8] sm:$0xf0] }
 0x337   : > { %3220 = vmatpush.bf16.msrb.mxu3 %v7212_v59  ;;  %3163 = vmatmul.bf16.vlgmr.msra.gmra.mxu2 %v10469_v60  ;;  %v7516_v29 = vor.u32 %v8813_v40, %v7513_v41  ;;  %v8776_v40 = vld [vmem:[%s9611_s27 + $0xa9c] sm:$0xf0]  ;;  %v8772_v41 = vld [vmem:[%s9611_s27 + $0xa84] sm:$0xf] }
 0x339   : > { %3182 = vmatpush.bf16.msrb.mxu0 %v7168_v3  ;;  %3195 = vmatpush.bf16.msrb.mxu1 %v7172_v4  ;;  %v2141_v56 = vpop.f32.mrf.mxu3  ;;  %v2117_v0 = vpop.f32.mrf.mxu1  ;;  %v7044_v3 = vor.u32 %v8710_v52, %v7041_v53  ;;  %v7048_v4 = vor.u32 %v8715_v58, %v7047_v57  ;;  %v7473_v52 = vld [vmem:[%s9611_s27 + $0xba0] sm:$0xf0]  ;;  %v7479_v53 = vld [vmem:[%s9611_s27 + $0xb88] sm:$0xf] }
 0x33a   : > { %3208 = vmatpush.bf16.msrb.mxu2 %v7176_v5  ;;  %v2128_v51 = vpop.f32.mrf.mxu2  ;;  %v2207_v59 = vrot.slane %v2141_v56, 2  ;;  %v7007_v5 = vld [vmem:[%s9611_s27 + $0x850] sm:$0xf]  ;;  %v7481_v56 = vld [vmem:[%s9611_s27 + $0xba8] sm:$0xf0] }
 0x33b   : > { %3221 = vmatpush.bf16.msrb.mxu3 %v7180_v10  ;;  %v2206_v55 = vrot.slane %v2128_v51, 4  ;;  %v7052_v10 = vor.u32 %v8711_v61, %v7049_v62  ;;  %v8804_v51 = vld [vmem:[%s9611_s27 + $0xb84] sm:$0xf]  ;;  %v7439_v61 = vld [vmem:[%s9611_s27 + $0xb40] sm:$0xf] }
 0x33c   : > { %v7476_v58 = vor.u32 %v8804_v51, %v7473_v52  ;;  %v8800_v62 = vld [vmem:[%s9611_s27 + $0xb5c] sm:$0xf0]  ;;  %v7353_v52 = vld [vmem:[%s9611_s27 + $0xaa8] sm:$0xf0] }
 0x33d   : > { %3183 = vmatpush.bf16.msrb.mxu0 %v7136_v15  ;;  %3196 = vmatpush.bf16.msrb.mxu1 %v7140_v16  ;;  %v2212_v2 = vsel %vm1175_vm5, %v2206_v55, %v2207_v59  ;;  %v7017_v15 = vld [vmem:[%s9611_s27 + $0x878] sm:$0xf0]  ;;  %v2104_v16 = vpop.f32.mrf.mxu0  ;;  %v8805_v55 = vld [vmem:[%s9611_s27 + $0xb8c] sm:$0xf]  ;;  %v7440_v7 = vor.u32 %v8800_v62, %v7439_v61  ;;  %v8764_v61 = vld [vmem:[%s9611_s27 + $0xa44] sm:$0xf] }
 0x33e   : > { %3209 = vmatpush.bf16.msrb.mxu2 %v7144_v17  ;;  %v2213_v9 = vsel %vm1177_vm6, %v2211_v44, %v2212_v2  ;;  %v7008_v17 = vor.u32 %v8706_v6, %v7007_v5  ;;  %v7020_v26 = vor.u32 %v8703_v14, %v7017_v15  ;;  %v7508_v44 = vor.u32 %v8812_v34, %v7505_v36  ;;  %v7441_v2 = vld [vmem:[%s9611_s27 + $0xb60] sm:$0xf0]  ;;  %v8797_v5 = vld [vmem:[%s9611_s27 + $0xb4c] sm:$0xf]  ;;  %v7415_v16 = vld [vmem:[%s9611_s27 + $0xb08] sm:$0xf] }
 0x33f   : > { %3222 = vmatpush.bf16.msrb.mxu3 %v7148_v32  ;;  %v10522_v47 = vadd.f32 %v2213_v9, %v10369_v25  ;;  %v7016_v32 = vor.u32 %v8707_v13, %v7015_v12  ;;  %v8694_v25 = vld [vmem:[%s9611_s27 + $0x814] sm:$0xf]  ;;  %v7484_v0 = vor.u32 %v8805_v55, %v7481_v56  ;;  %v7449_v6 = vld [vmem:[%s9611_s27 + $0xb68] sm:$0xf0]  ;;  %v8792_v12 = vld [vmem:[%s9611_s27 + $0xb1c] sm:$0xf0] }
 0x340   : > { %v6980_v38 = vor.u32 %v8694_v25, %v6977_v22  ;;  %v8788_v13 = vld [vmem:[%s9611_s27 + $0xb04] sm:$0xf]  ;;  %v7452_v14 = vor.u32 %v8797_v5, %v7449_v6  ;;  %v8765_v5 = vld [vmem:[%s9611_s27 + $0xa4c] sm:$0xf] }
 0x341   : > { %3184 = vmatpush.bf16.msrb.mxu0 %v7104_v27  ;;  %3197 = vmatpush.bf16.msrb.mxu1 %v7108_v31  ;;  %v8695_v27 = vld [vmem:[%s9611_s27 + $0x81c] sm:$0xf]  ;;  %v2143_v30 = vpop.f32.mrf.mxu3  ;;  %v7503_v31 = vld [vmem:[%s9611_s27 + $0xbc0] sm:$0xf]  ;;  %v7409_v15 = vld [vmem:[%s9611_s27 + $0xb20] sm:$0xf0] }
 0x342   : > { %3210 = vmatpush.bf16.msrb.mxu2 %v7112_v33  ;;  %v2130_v24 = vpop.f32.mrf.mxu2  ;;  %v8816_v33 = vld [vmem:[%s9611_s27 + $0xbdc] sm:$0xf0]  ;;  %v6988_v42 = vor.u32 %v8695_v27, %v6985_v28  ;;  %v7412_v22 = vor.u32 %v8788_v13, %v7409_v15  ;;  %v7377_v27 = vld [vmem:[%s9611_s27 + $0xae0] sm:$0xf0]  ;;  %v7383_v28 = vld [vmem:[%s9611_s27 + $0xac8] sm:$0xf] }
 0x343   : > { %3223 = vmatpush.bf16.msrb.mxu3 %v7116_v37  ;;  %v7511_v37 = vld [vmem:[%s9611_s27 + $0xbc8] sm:$0xf]  ;;  %v8780_v24 = vld [vmem:[%s9611_s27 + $0xac4] sm:$0xf]  ;;  %v7321_v6 = vld [vmem:[%s9611_s27 + $0xa68] sm:$0xf0] }
 0x344   : > { %v7512_v45 = vor.u32 %v8817_v8, %v7511_v37  ;;  %v8785_v30 = vld [vmem:[%s9611_s27 + $0xae4] sm:$0xf0]  ;;  %v7343_v37 = vld [vmem:[%s9611_s27 + $0xa80] sm:$0xf]  ;;  %v7380_v8 = vor.u32 %v8780_v24, %v7377_v27  ;;  %v7324_v1 = vor.u32 %v8765_v5, %v7321_v6  ;;  %v8814_v24 = vld [vmem:[%s9611_s27 + $0xbd4] sm:$0xf] }
 0x345   : > { %3185 = vmatpush.bf16.msrb.mxu0 %v7072_v43  ;;  %3198 = vmatpush.bf16.msrb.mxu1 %v7076_v46  ;;  %v7504_v43 = vor.u32 %v8816_v33, %v7503_v31  ;;  %v7471_v46 = vld [vmem:[%s9611_s27 + $0xb80] sm:$0xf]  ;;  %v8781_v31 = vld [vmem:[%s9611_s27 + $0xacc] sm:$0xf]  ;;  %v7287_v15 = vld [vmem:[%s9611_s27 + $0xa08] sm:$0xf] }
 0x346   : > { %3211 = vmatpush.bf16.msrb.mxu2 %v7080_v50  ;;  %v8808_v50 = vld [vmem:[%s9611_s27 + $0xb9c] sm:$0xf0]  ;;  %v7385_v33 = vld [vmem:[%s9611_s27 + $0xae8] sm:$0xf0]  ;;  %v7527_v27 = vld [vmem:[%s9611_s27 + $0xbd8] sm:$0xf] }
 0x347   : > { %3224 = vmatpush.bf16.msrb.mxu3 %v7084_v54  ;;  %v8809_v54 = vld [vmem:[%s9611_s27 + $0xba4] sm:$0xf0]  ;;  %v7472_v57 = vor.u32 %v8808_v50, %v7471_v46  ;;  %v7423_v5 = vld [vmem:[%s9611_s27 + $0xb10] sm:$0xf] }
 0x348   : > { %v7480_v59 = vor.u32 %v8809_v54, %v7479_v53  ;;  %v7351_v46 = vld [vmem:[%s9611_s27 + $0xa88] sm:$0xf]  ;;  %v7344_v53 = vor.u32 %v8776_v40, %v7343_v37  ;;  %v8810_v40 = vld [vmem:[%s9611_s27 + $0xbac] sm:$0xf0] }
 0x349   : > { %3186 = vmatpush.bf16.msrb.mxu0 %v7040_v63  ;;  %3199 = vmatpush.bf16.msrb.mxu1 %v7044_v3  ;;  %v8796_v63 = vld [vmem:[%s9611_s27 + $0xb44] sm:$0xf]  ;;  %v7447_v3 = vld [vmem:[%s9611_s27 + $0xb48] sm:$0xf]  ;;  %v8794_v6 = vld [vmem:[%s9611_s27 + $0xb2c] sm:$0xf0] }
 0x34a   : > { %3212 = vmatpush.bf16.msrb.mxu2 %v7048_v4  ;;  %v8801_v4 = vld [vmem:[%s9611_s27 + $0xb64] sm:$0xf0]  ;;  %v7444_v9 = vor.u32 %v8796_v63, %v7441_v2 }
 0x34b   : > { %3225 = vmatpush.bf16.msrb.mxu3 %v7052_v10  ;;  %v7448_v10 = vor.u32 %v8801_v4, %v7447_v3  ;;  %v8777_v50 = vld [vmem:[%s9611_s27 + $0xaa4] sm:$0xf0] }
 0x34c   : > { %v7319_v2 = vld [vmem:[%s9611_s27 + $0xa48] sm:$0xf] }
 0x34d   : > { %3187 = vmatpush.bf16.msrb.mxu0 %v7008_v17  ;;  %3200 = vmatpush.bf16.msrb.mxu1 %v7012_v21  ;;  %v8793_v17 = vld [vmem:[%s9611_s27 + $0xb24] sm:$0xf0]  ;;  %v7408_v21 = vor.u32 %v8792_v12, %v7407_v11  ;;  %v8760_v11 = vld [vmem:[%s9611_s27 + $0xa1c] sm:$0xf0]  ;;  %v8756_v12 = vld [vmem:[%s9611_s27 + $0xa04] sm:$0xf] }
 0x34e   : > { %3213 = vmatpush.bf16.msrb.mxu2 %v7016_v32  ;;  %v7375_v32 = vld [vmem:[%s9611_s27 + $0xac0] sm:$0xf]  ;;  %v7416_v23 = vor.u32 %v8793_v17, %v7415_v16  ;;  %v8769_v3 = vld [vmem:[%s9611_s27 + $0xa64] sm:$0xf0]  ;;  %v3322_v16 = vrot.slane %v9905_v48, 5  ;;  %v3323_v17 = vrot.slane %v9907_v49, 4 }
 0x34f   : > { %3226 = vmatpush.bf16.msrb.mxu3 %v7020_v26 }
 0x351   : > { %3188 = vmatpush.bf16.msrb.mxu0 %v6976_v35  ;;  %3201 = vmatpush.bf16.msrb.mxu1 %v6980_v38  ;;  %v2167_v25 = vpop.f32.mrf.mxu1  ;;  %v2154_v34 = vpop.f32.mrf.mxu0  ;;  %v7384_v38 = vor.u32 %v8785_v30, %v7383_v28  ;;  %v8819_v28 = vld [vmem:[%s9611_s27 + $0xbf4] sm:$0xf0] }
 0x352   : > { %3214 = vmatpush.bf16.msrb.mxu2 %v6984_v39  ;;  %v2208_v26 = vrot.slane %v2167_v25, 6  ;;  %v7289_v25 = vld [vmem:[%s9611_s27 + $0xa28] sm:$0xf0] }
 0x353   : > { %3227 = vmatpush.bf16.msrb.mxu3 %v6988_v42  ;;  %v7345_v42 = vld [vmem:[%s9611_s27 + $0xaa0] sm:$0xf0] }
 0x354   : > { %3202 = vmatmul.bf16.vlgmr.msrb.gmra.mxu1 %v10469_v60  ;;  %3189 = vmatmul.bf16.vlgmr.msrb.gmra.mxu0 %v10469_v60  ;;  %v2214_v36 = vsel %vm1173_vm4, %v2154_v34, %v2208_v26  ;;  %v7348_v56 = vor.u32 %v8772_v41, %v7345_v42  ;;  %v7529_v34 = vld [vmem:[%s9611_s27 + $0xbf8] sm:$0xf0]  ;;  %v8806_v41 = vld [vmem:[%s9611_s27 + $0xb94] sm:$0xf] }
 0x355   : > { %3647 = vmatpush.bf16.msra.mxu0 %v7504_v43  ;;  %3660 = vmatpush.bf16.msra.mxu1 %v7508_v44  ;;  %v7388_v43 = vor.u32 %v8781_v31, %v7385_v33  ;;  %v8815_v33 = vld [vmem:[%s9611_s27 + $0xbdc] sm:$0xf] }
 0x356   : > { %3673 = vmatpush.bf16.msra.mxu2 %v7512_v45  ;;  %3228 = vmatmul.bf16.vlgmr.msrb.gmra.mxu3 %v10469_v60  ;;  %v7532_v42 = vor.u32 %v8815_v33, %v7529_v34 }
 0x357   : > { %3686 = vmatpush.bf16.msra.mxu3 %v7516_v29  ;;  %3215 = vmatmul.bf16.vlgmr.msrb.gmra.mxu2 %v10469_v60  ;;  %v8784_v60 = vld [vmem:[%s9611_s27 + $0xadc] sm:$0xf0]  ;;  %v8773_v29 = vld [vmem:[%s9611_s27 + $0xa8c] sm:$0xf] }
 0x358   : > { %v7376_v35 = vor.u32 %v8784_v60, %v7375_v32  ;;  %v7356_v63 = vor.u32 %v8773_v29, %v7353_v52  ;;  %v8757_v32 = vld [vmem:[%s9611_s27 + $0xa0c] sm:$0xf]  ;;  %v8818_v60 = vld [vmem:[%s9611_s27 + $0xbec] sm:$0xf0] }
 0x359   : > { %3648 = vmatpush.bf16.msra.mxu0 %v7472_v57  ;;  %3661 = vmatpush.bf16.msra.mxu1 %v7476_v58  ;;  %v2193_v45 = vpop.f32.mrf.mxu3  ;;  %v2169_v54 = vpop.f32.mrf.mxu1  ;;  %v7352_v57 = vor.u32 %v8777_v50, %v7351_v46  ;;  %v7311_v58 = vld [vmem:[%s9611_s27 + $0xa40] sm:$0xf]  ;;  %v8811_v46 = vld [vmem:[%s9611_s27 + $0xbb4] sm:$0xf0]  ;;  %v8807_v50 = vld [vmem:[%s9611_s27 + $0xb9c] sm:$0xf] }
 0x35a   : > { %3674 = vmatpush.bf16.msra.mxu2 %v7480_v59  ;;  %v2180_v39 = vpop.f32.mrf.mxu2  ;;  %v2210_v51 = vrot.slane %v2193_v45, 2  ;;  %v8768_v59 = vld [vmem:[%s9611_s27 + $0xa5c] sm:$0xf0]  ;;  %v7495_v45 = vld [vmem:[%s9611_s27 + $0xb98] sm:$0xf] }
 0x35b   : > { %3687 = vmatpush.bf16.msra.mxu3 %v7484_v0  ;;  %v2209_v44 = vrot.slane %v2180_v39, 4  ;;  %v7313_v0 = vld [vmem:[%s9611_s27 + $0xa60] sm:$0xf0]  ;;  %v7487_v39 = vld [vmem:[%s9611_s27 + $0xb90] sm:$0xf] }
 0x35c   : > { %v7316_v13 = vor.u32 %v8764_v61, %v7313_v0  ;;  %v7488_v29 = vor.u32 %v8810_v40, %v7487_v39  ;;  %v7455_v54 = vld [vmem:[%s9611_s27 + $0xb50] sm:$0xf]  ;;  %v8803_v61 = vld [vmem:[%s9611_s27 + $0xb74] sm:$0xf0] }
 0x35d   : > { %3649 = vmatpush.bf16.msra.mxu0 %v7440_v7  ;;  %3662 = vmatpush.bf16.msra.mxu1 %v7444_v9  ;;  %v2215_v55 = vsel %vm1175_vm5, %v2209_v44, %v2210_v51  ;;  %v2156_v7 = vpop.f32.mrf.mxu0  ;;  %v7312_v9 = vor.u32 %v8768_v59, %v7311_v58  ;;  %v7489_v44 = vld [vmem:[%s9611_s27 + $0xbb0] sm:$0xf0]  ;;  %v7497_v51 = vld [vmem:[%s9611_s27 + $0xbb8] sm:$0xf0]  ;;  %v7463_v59 = vld [vmem:[%s9611_s27 + $0xb58] sm:$0xf] }
 0x35e   : > { %3675 = vmatpush.bf16.msra.mxu2 %v7448_v10  ;;  %v2216_v62 = vsel %vm1177_vm6, %v2214_v36, %v2215_v55  ;;  %v7279_v10 = vld [vmem:[%s9611_s27 + $0xa00] sm:$0xf]  ;;  %v7292_v36 = vor.u32 %v8757_v32, %v7289_v25  ;;  %v7492_v52 = vor.u32 %v8806_v41, %v7489_v44  ;;  %v8802_v55 = vld [vmem:[%s9611_s27 + $0xb6c] sm:$0xf0]  ;;  %v7457_v58 = vld [vmem:[%s9611_s27 + $0xb70] sm:$0xf0] }
 0x35f   : > { %3688 = vmatpush.bf16.msra.mxu3 %v7452_v14  ;;  %v10596_v4 = vadd.f32 %v2216_v62, %v10443_v18  ;;  %v7320_v14 = vor.u32 %v8769_v3, %v7319_v2  ;;  %v7281_v18 = vld [vmem:[%s9611_s27 + $0xa20] sm:$0xf0]  ;;  %v7280_v26 = vor.u32 %v8760_v11, %v7279_v10  ;;  %v8799_v62 = vld [vmem:[%s9611_s27 + $0xb5c] sm:$0xf]  ;;  %v7456_v0 = vor.u32 %v8802_v55, %v7455_v54  ;;  %v8790_v7 = vld [vmem:[%s9611_s27 + $0xb14] sm:$0xf] }
 0x360   : > { %v7284_v30 = vor.u32 %v8756_v12, %v7281_v18  ;;  %v7464_v3 = vor.u32 %v8803_v61, %v7463_v59  ;;  %v7425_v10 = vld [vmem:[%s9611_s27 + $0xb30] sm:$0xf0]  ;;  %v7431_v11 = vld [vmem:[%s9611_s27 + $0xb18] sm:$0xf]  ;;  %v7424_v18 = vor.u32 %v8794_v6, %v7423_v5  ;;  %v8775_v44 = vld [vmem:[%s9611_s27 + $0xa9c] sm:$0xf] }
 0x361   : > { %3650 = vmatpush.bf16.msra.mxu0 %v7408_v21  ;;  %3663 = vmatpush.bf16.msra.mxu1 %v7412_v22  ;;  %v8761_v21 = vld [vmem:[%s9611_s27 + $0xa24] sm:$0xf0]  ;;  %v2195_v22 = vpop.f32.mrf.mxu3  ;;  %v8795_v12 = vld [vmem:[%s9611_s27 + $0xb34] sm:$0xf0]  ;;  %v8770_v54 = vld [vmem:[%s9611_s27 + $0xa6c] sm:$0xf0] }
 0x362   : > { %3676 = vmatpush.bf16.msra.mxu2 %v7416_v23  ;;  %v2182_v20 = vpop.f32.mrf.mxu2  ;;  %v7519_v23 = vld [vmem:[%s9611_s27 + $0xbd0] sm:$0xf]  ;;  %v7288_v31 = vor.u32 %v8761_v21, %v7287_v15  ;;  %v8782_v21 = vld [vmem:[%s9611_s27 + $0xad4] sm:$0xf]  ;;  %v7367_v40 = vld [vmem:[%s9611_s27 + $0xa98] sm:$0xf] }
 0x363   : > { %3689 = vmatpush.bf16.msra.mxu3 %v7420_v19  ;;  %v7521_v19 = vld [vmem:[%s9611_s27 + $0xbf0] sm:$0xf0]  ;;  %v7520_v37 = vor.u32 %v8818_v60, %v7519_v23  ;;  %v7391_v15 = vld [vmem:[%s9611_s27 + $0xad0] sm:$0xf]  ;;  %v7432_v20 = vor.u32 %v8795_v12, %v7431_v11  ;;  %v7399_v23 = vld [vmem:[%s9611_s27 + $0xad8] sm:$0xf] }
 0x364   : > { %v7393_v22 = vld [vmem:[%s9611_s27 + $0xaf0] sm:$0xf0]  ;;  %v8787_v60 = vld [vmem:[%s9611_s27 + $0xaf4] sm:$0xf0]  ;;  %v7295_v5 = vld [vmem:[%s9611_s27 + $0xa10] sm:$0xf] }
 0x365   : > { %3651 = vmatpush.bf16.msra.mxu0 %v7376_v35  ;;  %3664 = vmatpush.bf16.msra.mxu1 %v7380_v8  ;;  %v3324_v35 = vsel %vm731_vm3, %v3323_v17, %v3322_v16  ;;  %v7524_v8 = vor.u32 %v8814_v24, %v7521_v19  ;;  %v7428_v17 = vor.u32 %v8790_v7, %v7425_v10  ;;  %v8783_v24 = vld [vmem:[%s9611_s27 + $0xadc] sm:$0xf]  ;;  %v8779_v41 = vld [vmem:[%s9611_s27 + $0xab4] sm:$0xf0]  ;;  %v8766_v55 = vld [vmem:[%s9611_s27 + $0xa54] sm:$0xf] }
 0x366   : > { %3677 = vmatpush.bf16.msra.mxu2 %v7384_v38  ;;  %v7528_v38 = vor.u32 %v8819_v28, %v7527_v27  ;;  %v7400_v33 = vor.u32 %v8787_v60, %v7399_v23  ;;  %v7335_v59 = vld [vmem:[%s9611_s27 + $0xa58] sm:$0xf]  ;;  %v8762_v6 = vld [vmem:[%s9611_s27 + $0xa2c] sm:$0xf0]  ;;  %v7297_v10 = vld [vmem:[%s9611_s27 + $0xa30] sm:$0xf0] }
 0x367   : > { %3690 = vmatpush.bf16.msra.mxu3 %v7388_v43  ;;  %v10622_v43 = vpack.c.b16 %v3324_v35, %v3324_v35  ;;  %v8778_v35 = vld [vmem:[%s9611_s27 + $0xaac] sm:$0xf0]  ;;  %v8771_v61 = vld [vmem:[%s9611_s27 + $0xa74] sm:$0xf0] }
 0x368   : > { %v7303_v11 = vld [vmem:[%s9611_s27 + $0xa18] sm:$0xf] }
 0x369   : > { %3652 = vmatpush.bf16.msra.mxu0 %v7344_v53  ;;  %3665 = vmatpush.bf16.msra.mxu1 %v7348_v56  ;;  %v7496_v53 = vor.u32 %v8811_v46, %v7495_v45  ;;  %v8798_v56 = vld [vmem:[%s9611_s27 + $0xb54] sm:$0xf]  ;;  %v7369_v45 = vld [vmem:[%s9611_s27 + $0xab8] sm:$0xf0] }
 0x36a   : > { %3678 = vmatpush.bf16.msra.mxu2 %v7352_v57  ;;  %v7500_v57 = vor.u32 %v8807_v50, %v7497_v51  ;;  %v7460_v2 = vor.u32 %v8798_v56, %v7457_v58  ;;  %v7329_v58 = vld [vmem:[%s9611_s27 + $0xa70] sm:$0xf0] }
 0x36b   : > { %3691 = vmatpush.bf16.msra.mxu3 %v7356_v63  ;;  %v7465_v63 = vld [vmem:[%s9611_s27 + $0xb78] sm:$0xf0]  ;;  %v7332_v7 = vor.u32 %v8766_v55, %v7329_v58  ;;  %v7727_v58 = vld [vmem:[%s9611_s27 + $0xd00] sm:$0xf] }
 0x36d   : > { %3653 = vmatpush.bf16.msra.mxu0 %v7312_v9  ;;  %3666 = vmatpush.bf16.msra.mxu1 %v7316_v13  ;;  %v7468_v9 = vor.u32 %v8799_v62, %v7465_v63  ;;  %v8791_v13 = vld [vmem:[%s9611_s27 + $0xb1c] sm:$0xf] }
 0x36e   : > { %3679 = vmatpush.bf16.msra.mxu2 %v7320_v14  ;;  %v7433_v14 = vld [vmem:[%s9611_s27 + $0xb38] sm:$0xf0] }
 0x36f   : > { %3692 = vmatpush.bf16.msra.mxu3 %v7324_v1  ;;  %v8786_v1 = vld [vmem:[%s9611_s27 + $0xaec] sm:$0xf0]  ;;  %v7436_v25 = vor.u32 %v8791_v13, %v7433_v14  ;;  %v8767_v63 = vld [vmem:[%s9611_s27 + $0xa5c] sm:$0xf]  ;;  %v8763_v14 = vld [vmem:[%s9611_s27 + $0xa34] sm:$0xf0] }
 0x370   : > { %v7392_v27 = vor.u32 %v8786_v1, %v7391_v15  ;;  %v7305_v15 = vld [vmem:[%s9611_s27 + $0xa38] sm:$0xf0]  ;;  %v8876_v1 = vld [vmem:[%s9611_s27 + $0xdc4] sm:$0xf]  ;;  %v7304_v60 = vor.u32 %v8763_v14, %v7303_v11 }
 0x371   : > { %3654 = vmatpush.bf16.msra.mxu0 %v7280_v26  ;;  %3667 = vmatpush.bf16.msra.mxu1 %v7284_v30  ;;  %v2633_v16 = vpop.f32.mrf.mxu1  ;;  %v7401_v26 = vld [vmem:[%s9611_s27 + $0xaf8] sm:$0xf0]  ;;  %v2620_v19 = vpop.f32.mrf.mxu0  ;;  %v7359_v30 = vld [vmem:[%s9611_s27 + $0xa90] sm:$0xf] }
 0x372   : > { %3680 = vmatpush.bf16.msra.mxu2 %v7288_v31  ;;  %v2723_v32 = vrot.slane %v2633_v16, 6  ;;  %v7396_v31 = vor.u32 %v8782_v21, %v7393_v22  ;;  %v7360_v46 = vor.u32 %v8778_v35, %v7359_v30  ;;  %v7296_v21 = vor.u32 %v8762_v6, %v7295_v5  ;;  %v8881_v22 = vld [vmem:[%s9611_s27 + $0xde4] sm:$0xf0]  ;;  %v8853_v5 = vld [vmem:[%s9611_s27 + $0xd0c] sm:$0xf] }
 0x373   : > { %3693 = vmatpush.bf16.msra.mxu3 %v7292_v36  ;;  %v8774_v36 = vld [vmem:[%s9611_s27 + $0xa94] sm:$0xf]  ;;  %v7737_v6 = vld [vmem:[%s9611_s27 + $0xd28] sm:$0xf0] }
 0x374   : > { %3668 = vmatmul.bf16.vlgmr.msra.gmra.mxu1 %v10622_v43  ;;  %3655 = vmatmul.bf16.vlgmr.msra.gmra.mxu0 %v10622_v43  ;;  %v2729_v28 = vsel %vm1173_vm4, %v2620_v19, %v2723_v32  ;;  %v7825_v32 = vld [vmem:[%s9611_s27 + $0xde0] sm:$0xf0]  ;;  %v7740_v14 = vor.u32 %v8853_v5, %v7737_v6 }
 0x375   : > { %3699 = vmatpush.bf16.msrb.mxu0 %v7520_v37  ;;  %3712 = vmatpush.bf16.msrb.mxu1 %v7524_v8  ;;  %v7361_v37 = vld [vmem:[%s9611_s27 + $0xab0] sm:$0xf0]  ;;  %v7404_v8 = vor.u32 %v8783_v24, %v7401_v26  ;;  %v8877_v24 = vld [vmem:[%s9611_s27 + $0xdcc] sm:$0xf] }
 0x376   : > { %3725 = vmatpush.bf16.msrb.mxu2 %v7528_v38  ;;  %3694 = vmatmul.bf16.vlgmr.msra.gmra.mxu3 %v10622_v43  ;;  %v7833_v26 = vld [vmem:[%s9611_s27 + $0xde8] sm:$0xf0] }
 0x377   : > { %3738 = vmatpush.bf16.msrb.mxu3 %v7532_v42  ;;  %3681 = vmatmul.bf16.vlgmr.msra.gmra.mxu2 %v10622_v43  ;;  %v7836_v35 = vor.u32 %v8877_v24, %v7833_v26  ;;  %v8840_v24 = vld [vmem:[%s9611_s27 + $0xc9c] sm:$0xf0]  ;;  %v8836_v26 = vld [vmem:[%s9611_s27 + $0xc84] sm:$0xf] }
 0x379   : > { %3700 = vmatpush.bf16.msrb.mxu0 %v7488_v29  ;;  %3713 = vmatpush.bf16.msrb.mxu1 %v7492_v52  ;;  %v2659_v39 = vpop.f32.mrf.mxu3  ;;  %v2635_v50 = vpop.f32.mrf.mxu1  ;;  %v7364_v29 = vor.u32 %v8774_v36, %v7361_v37  ;;  %v7368_v52 = vor.u32 %v8779_v41, %v7367_v40  ;;  %v7793_v36 = vld [vmem:[%s9611_s27 + $0xda0] sm:$0xf0]  ;;  %v7799_v37 = vld [vmem:[%s9611_s27 + $0xd88] sm:$0xf] }
 0x37a   : > { %3726 = vmatpush.bf16.msrb.mxu2 %v7496_v53  ;;  %v2646_v34 = vpop.f32.mrf.mxu2  ;;  %v2725_v42 = vrot.slane %v2659_v39, 2  ;;  %v7327_v53 = vld [vmem:[%s9611_s27 + $0xa50] sm:$0xf]  ;;  %v7801_v39 = vld [vmem:[%s9611_s27 + $0xda8] sm:$0xf0] }
 0x37b   : > { %3739 = vmatpush.bf16.msrb.mxu3 %v7500_v57  ;;  %v2724_v38 = vrot.slane %v2646_v34, 4  ;;  %v7372_v57 = vor.u32 %v8775_v44, %v7369_v45  ;;  %v8868_v34 = vld [vmem:[%s9611_s27 + $0xd84] sm:$0xf]  ;;  %v7759_v44 = vld [vmem:[%s9611_s27 + $0xd40] sm:$0xf] }
 0x37c   : > { %v7796_v41 = vor.u32 %v8868_v34, %v7793_v36  ;;  %v8864_v45 = vld [vmem:[%s9611_s27 + $0xd5c] sm:$0xf0]  ;;  %v7673_v36 = vld [vmem:[%s9611_s27 + $0xca8] sm:$0xf0] }
 0x37d   : > { %3701 = vmatpush.bf16.msrb.mxu0 %v7456_v0  ;;  %3714 = vmatpush.bf16.msrb.mxu1 %v7460_v2  ;;  %v2730_v51 = vsel %vm1175_vm5, %v2724_v38, %v2725_v42  ;;  %v7337_v0 = vld [vmem:[%s9611_s27 + $0xa78] sm:$0xf0]  ;;  %v2622_v2 = vpop.f32.mrf.mxu0  ;;  %v8869_v38 = vld [vmem:[%s9611_s27 + $0xd8c] sm:$0xf]  ;;  %v7760_v55 = vor.u32 %v8864_v45, %v7759_v44  ;;  %v8828_v44 = vld [vmem:[%s9611_s27 + $0xc44] sm:$0xf] }
 0x37e   : > { %3727 = vmatpush.bf16.msrb.mxu2 %v7464_v3  ;;  %v2731_v56 = vsel %vm1177_vm6, %v2729_v28, %v2730_v51  ;;  %v7328_v3 = vor.u32 %v8770_v54, %v7327_v53  ;;  %v7340_v13 = vor.u32 %v8767_v63, %v7337_v0  ;;  %v7828_v28 = vor.u32 %v8876_v1, %v7825_v32  ;;  %v7761_v51 = vld [vmem:[%s9611_s27 + $0xd60] sm:$0xf0]  ;;  %v8861_v53 = vld [vmem:[%s9611_s27 + $0xd4c] sm:$0xf]  ;;  %v7735_v2 = vld [vmem:[%s9611_s27 + $0xd08] sm:$0xf] }
 0x37f   : > { %3740 = vmatpush.bf16.msrb.mxu3 %v7468_v9  ;;  %v10675_v62 = vadd.f32 %v2731_v56, %v10522_v47  ;;  %v7336_v9 = vor.u32 %v8771_v61, %v7335_v59  ;;  %v8758_v47 = vld [vmem:[%s9611_s27 + $0xa14] sm:$0xf]  ;;  %v7804_v50 = vor.u32 %v8869_v38, %v7801_v39  ;;  %v7769_v54 = vld [vmem:[%s9611_s27 + $0xd68] sm:$0xf0]  ;;  %v8856_v59 = vld [vmem:[%s9611_s27 + $0xd1c] sm:$0xf0] }
 0x380   : > { %v7300_v23 = vor.u32 %v8758_v47, %v7297_v10  ;;  %v8852_v61 = vld [vmem:[%s9611_s27 + $0xd04] sm:$0xf]  ;;  %v7772_v63 = vor.u32 %v8861_v53, %v7769_v54  ;;  %v8829_v53 = vld [vmem:[%s9611_s27 + $0xc4c] sm:$0xf] }
 0x381   : > { %3702 = vmatpush.bf16.msrb.mxu0 %v7424_v18  ;;  %3715 = vmatpush.bf16.msrb.mxu1 %v7428_v17  ;;  %v8759_v18 = vld [vmem:[%s9611_s27 + $0xa1c] sm:$0xf]  ;;  %v2661_v16 = vpop.f32.mrf.mxu3  ;;  %v7823_v17 = vld [vmem:[%s9611_s27 + $0xdc0] sm:$0xf]  ;;  %v7729_v0 = vld [vmem:[%s9611_s27 + $0xd20] sm:$0xf0] }
 0x382   : > { %3728 = vmatpush.bf16.msrb.mxu2 %v7432_v20  ;;  %v2648_v12 = vpop.f32.mrf.mxu2  ;;  %v8880_v20 = vld [vmem:[%s9611_s27 + $0xddc] sm:$0xf0]  ;;  %v7308_v19 = vor.u32 %v8759_v18, %v7305_v15  ;;  %v7732_v10 = vor.u32 %v8852_v61, %v7729_v0  ;;  %v7697_v18 = vld [vmem:[%s9611_s27 + $0xce0] sm:$0xf0]  ;;  %v7703_v15 = vld [vmem:[%s9611_s27 + $0xcc8] sm:$0xf] }
 0x383   : > { %3741 = vmatpush.bf16.msrb.mxu3 %v7436_v25  ;;  %v7831_v25 = vld [vmem:[%s9611_s27 + $0xdc8] sm:$0xf]  ;;  %v8844_v12 = vld [vmem:[%s9611_s27 + $0xcc4] sm:$0xf]  ;;  %v7641_v54 = vld [vmem:[%s9611_s27 + $0xc68] sm:$0xf0] }
 0x384   : > { %v7832_v30 = vor.u32 %v8881_v22, %v7831_v25  ;;  %v8849_v16 = vld [vmem:[%s9611_s27 + $0xce4] sm:$0xf0]  ;;  %v7663_v25 = vld [vmem:[%s9611_s27 + $0xc80] sm:$0xf]  ;;  %v7700_v22 = vor.u32 %v8844_v12, %v7697_v18  ;;  %v7644_v6 = vor.u32 %v8829_v53, %v7641_v54  ;;  %v8878_v12 = vld [vmem:[%s9611_s27 + $0xdd4] sm:$0xf] }
 0x385   : > { %3703 = vmatpush.bf16.msrb.mxu0 %v7392_v27  ;;  %3716 = vmatpush.bf16.msrb.mxu1 %v7396_v31  ;;  %v7824_v27 = vor.u32 %v8880_v20, %v7823_v17  ;;  %v7791_v31 = vld [vmem:[%s9611_s27 + $0xd80] sm:$0xf]  ;;  %v8845_v17 = vld [vmem:[%s9611_s27 + $0xccc] sm:$0xf]  ;;  %v7607_v0 = vld [vmem:[%s9611_s27 + $0xc08] sm:$0xf] }
 0x386   : > { %3729 = vmatpush.bf16.msrb.mxu2 %v7400_v33  ;;  %v8872_v33 = vld [vmem:[%s9611_s27 + $0xd9c] sm:$0xf0]  ;;  %v7705_v20 = vld [vmem:[%s9611_s27 + $0xce8] sm:$0xf0]  ;;  %v7847_v18 = vld [vmem:[%s9611_s27 + $0xdd8] sm:$0xf] }
 0x387   : > { %3742 = vmatpush.bf16.msrb.mxu3 %v7404_v8  ;;  %v8873_v8 = vld [vmem:[%s9611_s27 + $0xda4] sm:$0xf0]  ;;  %v7792_v40 = vor.u32 %v8872_v33, %v7791_v31  ;;  %v7743_v53 = vld [vmem:[%s9611_s27 + $0xd10] sm:$0xf] }
 0x388   : > { %v7800_v42 = vor.u32 %v8873_v8, %v7799_v37  ;;  %v7671_v31 = vld [vmem:[%s9611_s27 + $0xc88] sm:$0xf]  ;;  %v7664_v37 = vor.u32 %v8840_v24, %v7663_v25  ;;  %v8874_v24 = vld [vmem:[%s9611_s27 + $0xdac] sm:$0xf0] }
 0x389   : > { %3704 = vmatpush.bf16.msrb.mxu0 %v7360_v46  ;;  %3717 = vmatpush.bf16.msrb.mxu1 %v7364_v29  ;;  %v8860_v46 = vld [vmem:[%s9611_s27 + $0xd44] sm:$0xf]  ;;  %v7767_v29 = vld [vmem:[%s9611_s27 + $0xd48] sm:$0xf]  ;;  %v8858_v54 = vld [vmem:[%s9611_s27 + $0xd2c] sm:$0xf0] }
 0x38a   : > { %3730 = vmatpush.bf16.msrb.mxu2 %v7368_v52  ;;  %v8865_v52 = vld [vmem:[%s9611_s27 + $0xd64] sm:$0xf0]  ;;  %v7764_v56 = vor.u32 %v8860_v46, %v7761_v51 }
 0x38b   : > { %3743 = vmatpush.bf16.msrb.mxu3 %v7372_v57  ;;  %v7768_v57 = vor.u32 %v8865_v52, %v7767_v29  ;;  %v8841_v33 = vld [vmem:[%s9611_s27 + $0xca4] sm:$0xf0] }
 0x38c   : > { %v7639_v51 = vld [vmem:[%s9611_s27 + $0xc48] sm:$0xf] }
 0x38d   : > { %3705 = vmatpush.bf16.msrb.mxu0 %v7328_v3  ;;  %3718 = vmatpush.bf16.msrb.mxu1 %v7332_v7  ;;  %v8857_v3 = vld [vmem:[%s9611_s27 + $0xd24] sm:$0xf0]  ;;  %v7728_v7 = vor.u32 %v8856_v59, %v7727_v58  ;;  %v8824_v58 = vld [vmem:[%s9611_s27 + $0xc1c] sm:$0xf0]  ;;  %v8820_v59 = vld [vmem:[%s9611_s27 + $0xc04] sm:$0xf] }
 0x38e   : > { %3731 = vmatpush.bf16.msrb.mxu2 %v7336_v9  ;;  %v7695_v9 = vld [vmem:[%s9611_s27 + $0xcc0] sm:$0xf]  ;;  %v7736_v11 = vor.u32 %v8857_v3, %v7735_v2  ;;  %v8833_v29 = vld [vmem:[%s9611_s27 + $0xc64] sm:$0xf0]  ;;  %v3840_v2 = vrot.slane %v9905_v48, 6  ;;  %v3841_v3 = vrot.slane %v9907_v49, 5 }
 0x38f   : > { %3744 = vmatpush.bf16.msrb.mxu3 %v7340_v13 }
 0x391   : > { %3706 = vmatpush.bf16.msrb.mxu0 %v7296_v21  ;;  %3719 = vmatpush.bf16.msrb.mxu1 %v7300_v23  ;;  %v2685_v47 = vpop.f32.mrf.mxu1  ;;  %v2672_v1 = vpop.f32.mrf.mxu0  ;;  %v7704_v23 = vor.u32 %v8849_v16, %v7703_v15  ;;  %v8883_v15 = vld [vmem:[%s9611_s27 + $0xdf4] sm:$0xf0] }
 0x392   : > { %3732 = vmatpush.bf16.msrb.mxu2 %v7304_v60  ;;  %v2726_v13 = vrot.slane %v2685_v47, 6  ;;  %v7609_v47 = vld [vmem:[%s9611_s27 + $0xc28] sm:$0xf0] }
 0x393   : > { %3745 = vmatpush.bf16.msrb.mxu3 %v7308_v19  ;;  %v7665_v19 = vld [vmem:[%s9611_s27 + $0xca0] sm:$0xf0] }
 0x394   : > { %3720 = vmatmul.bf16.vlgmr.msrb.gmra.mxu1 %v10622_v43  ;;  %3707 = vmatmul.bf16.vlgmr.msrb.gmra.mxu0 %v10622_v43  ;;  %v2732_v32 = vsel %vm1173_vm4, %v2672_v1, %v2726_v13  ;;  %v7668_v39 = vor.u32 %v8836_v26, %v7665_v19  ;;  %v7849_v1 = vld [vmem:[%s9611_s27 + $0xdf8] sm:$0xf0]  ;;  %v8870_v26 = vld [vmem:[%s9611_s27 + $0xd94] sm:$0xf] }
 0x395   : > { %4165 = vmatpush.bf16.msra.mxu0 %v7824_v27  ;;  %4178 = vmatpush.bf16.msra.mxu1 %v7828_v28  ;;  %v7708_v27 = vor.u32 %v8845_v17, %v7705_v20  ;;  %v8879_v20 = vld [vmem:[%s9611_s27 + $0xddc] sm:$0xf] }
 0x396   : > { %4191 = vmatpush.bf16.msra.mxu2 %v7832_v30  ;;  %3746 = vmatmul.bf16.vlgmr.msrb.gmra.mxu3 %v10622_v43  ;;  %v7852_v19 = vor.u32 %v8879_v20, %v7849_v1 }
 0x397   : > { %4204 = vmatpush.bf16.msra.mxu3 %v7836_v35  ;;  %3733 = vmatmul.bf16.vlgmr.msrb.gmra.mxu2 %v10622_v43  ;;  %v8848_v43 = vld [vmem:[%s9611_s27 + $0xcdc] sm:$0xf0]  ;;  %v8837_v35 = vld [vmem:[%s9611_s27 + $0xc8c] sm:$0xf] }
 0x398   : > { %v7696_v21 = vor.u32 %v8848_v43, %v7695_v9  ;;  %v7676_v46 = vor.u32 %v8837_v35, %v7673_v36  ;;  %v8821_v9 = vld [vmem:[%s9611_s27 + $0xc0c] sm:$0xf]  ;;  %v8882_v43 = vld [vmem:[%s9611_s27 + $0xdec] sm:$0xf0] }
 0x399   : > { %4166 = vmatpush.bf16.msra.mxu0 %v7792_v40  ;;  %4179 = vmatpush.bf16.msra.mxu1 %v7796_v41  ;;  %v2711_v30 = vpop.f32.mrf.mxu3  ;;  %v2687_v8 = vpop.f32.mrf.mxu1  ;;  %v7672_v40 = vor.u32 %v8841_v33, %v7671_v31  ;;  %v7631_v41 = vld [vmem:[%s9611_s27 + $0xc40] sm:$0xf]  ;;  %v8875_v31 = vld [vmem:[%s9611_s27 + $0xdb4] sm:$0xf0]  ;;  %v8871_v33 = vld [vmem:[%s9611_s27 + $0xd9c] sm:$0xf] }
 0x39a   : > { %4192 = vmatpush.bf16.msra.mxu2 %v7800_v42  ;;  %v2698_v60 = vpop.f32.mrf.mxu2  ;;  %v2728_v34 = vrot.slane %v2711_v30, 2  ;;  %v8832_v42 = vld [vmem:[%s9611_s27 + $0xc5c] sm:$0xf0]  ;;  %v7815_v30 = vld [vmem:[%s9611_s27 + $0xd98] sm:$0xf] }
 0x39b   : > { %4205 = vmatpush.bf16.msra.mxu3 %v7804_v50  ;;  %v2727_v28 = vrot.slane %v2698_v60, 4  ;;  %v7633_v50 = vld [vmem:[%s9611_s27 + $0xc60] sm:$0xf0]  ;;  %v7807_v60 = vld [vmem:[%s9611_s27 + $0xd90] sm:$0xf] }
 0x39c   : > { %v7636_v61 = vor.u32 %v8828_v44, %v7633_v50  ;;  %v7808_v35 = vor.u32 %v8874_v24, %v7807_v60  ;;  %v7775_v8 = vld [vmem:[%s9611_s27 + $0xd50] sm:$0xf]  ;;  %v8867_v44 = vld [vmem:[%s9611_s27 + $0xd74] sm:$0xf0] }
 0x39d   : > { %4167 = vmatpush.bf16.msra.mxu0 %v7760_v55  ;;  %4180 = vmatpush.bf16.msra.mxu1 %v7764_v56  ;;  %v2733_v38 = vsel %vm1175_vm5, %v2727_v28, %v2728_v34  ;;  %v2674_v55 = vpop.f32.mrf.mxu0  ;;  %v7632_v56 = vor.u32 %v8832_v42, %v7631_v41  ;;  %v7809_v28 = vld [vmem:[%s9611_s27 + $0xdb0] sm:$0xf0]  ;;  %v7817_v34 = vld [vmem:[%s9611_s27 + $0xdb8] sm:$0xf0]  ;;  %v7783_v42 = vld [vmem:[%s9611_s27 + $0xd58] sm:$0xf] }
 0x39e   : > { %4193 = vmatpush.bf16.msra.mxu2 %v7768_v57  ;;  %v2734_v45 = vsel %vm1177_vm6, %v2732_v32, %v2733_v38  ;;  %v7599_v57 = vld [vmem:[%s9611_s27 + $0xc00] sm:$0xf]  ;;  %v7612_v32 = vor.u32 %v8821_v9, %v7609_v47  ;;  %v7812_v36 = vor.u32 %v8870_v26, %v7809_v28  ;;  %v8866_v38 = vld [vmem:[%s9611_s27 + $0xd6c] sm:$0xf0]  ;;  %v7777_v41 = vld [vmem:[%s9611_s27 + $0xd70] sm:$0xf0] }
 0x39f   : > { %4206 = vmatpush.bf16.msra.mxu3 %v7772_v63  ;;  %v10749_v52 = vadd.f32 %v2734_v45, %v10596_v4  ;;  %v7640_v63 = vor.u32 %v8833_v29, %v7639_v51  ;;  %v7601_v4 = vld [vmem:[%s9611_s27 + $0xc20] sm:$0xf0]  ;;  %v7600_v13 = vor.u32 %v8824_v58, %v7599_v57  ;;  %v8863_v45 = vld [vmem:[%s9611_s27 + $0xd5c] sm:$0xf]  ;;  %v7776_v50 = vor.u32 %v8866_v38, %v7775_v8  ;;  %v8854_v55 = vld [vmem:[%s9611_s27 + $0xd14] sm:$0xf] }
 0x3a0   : > { %v7604_v16 = vor.u32 %v8820_v59, %v7601_v4  ;;  %v7784_v29 = vor.u32 %v8867_v44, %v7783_v42  ;;  %v7745_v57 = vld [vmem:[%s9611_s27 + $0xd30] sm:$0xf0]  ;;  %v7751_v58 = vld [vmem:[%s9611_s27 + $0xd18] sm:$0xf]  ;;  %v7744_v4 = vor.u32 %v8858_v54, %v7743_v53  ;;  %v8839_v28 = vld [vmem:[%s9611_s27 + $0xc9c] sm:$0xf] }
 0x3a1   : > { %4168 = vmatpush.bf16.msra.mxu0 %v7728_v7  ;;  %4181 = vmatpush.bf16.msra.mxu1 %v7732_v10  ;;  %v8825_v7 = vld [vmem:[%s9611_s27 + $0xc24] sm:$0xf0]  ;;  %v2713_v10 = vpop.f32.mrf.mxu3  ;;  %v8859_v59 = vld [vmem:[%s9611_s27 + $0xd34] sm:$0xf0]  ;;  %v8834_v8 = vld [vmem:[%s9611_s27 + $0xc6c] sm:$0xf0] }
 0x3a2   : > { %4194 = vmatpush.bf16.msra.mxu2 %v7736_v11  ;;  %v2700_v5 = vpop.f32.mrf.mxu2  ;;  %v7839_v11 = vld [vmem:[%s9611_s27 + $0xdd0] sm:$0xf]  ;;  %v7608_v17 = vor.u32 %v8825_v7, %v7607_v0  ;;  %v8846_v7 = vld [vmem:[%s9611_s27 + $0xcd4] sm:$0xf]  ;;  %v7687_v24 = vld [vmem:[%s9611_s27 + $0xc98] sm:$0xf] }
 0x3a3   : > { %4207 = vmatpush.bf16.msra.mxu3 %v7740_v14  ;;  %v7841_v14 = vld [vmem:[%s9611_s27 + $0xdf0] sm:$0xf0]  ;;  %v7840_v25 = vor.u32 %v8882_v43, %v7839_v11  ;;  %v7711_v0 = vld [vmem:[%s9611_s27 + $0xcd0] sm:$0xf]  ;;  %v7752_v5 = vor.u32 %v8859_v59, %v7751_v58  ;;  %v7719_v11 = vld [vmem:[%s9611_s27 + $0xcd8] sm:$0xf] }
 0x3a4   : > { %v7713_v10 = vld [vmem:[%s9611_s27 + $0xcf0] sm:$0xf0]  ;;  %v8851_v43 = vld [vmem:[%s9611_s27 + $0xcf4] sm:$0xf0]  ;;  %v7615_v53 = vld [vmem:[%s9611_s27 + $0xc10] sm:$0xf] }
 0x3a5   : > { %4169 = vmatpush.bf16.msra.mxu0 %v7696_v21  ;;  %4182 = vmatpush.bf16.msra.mxu1 %v7700_v22  ;;  %v3842_v21 = vsel %vm731_vm3, %v3841_v3, %v3840_v2  ;;  %v7844_v22 = vor.u32 %v8878_v12, %v7841_v14  ;;  %v7748_v3 = vor.u32 %v8854_v55, %v7745_v57  ;;  %v8847_v12 = vld [vmem:[%s9611_s27 + $0xcdc] sm:$0xf]  ;;  %v8843_v26 = vld [vmem:[%s9611_s27 + $0xcb4] sm:$0xf0]  ;;  %v8830_v38 = vld [vmem:[%s9611_s27 + $0xc54] sm:$0xf] }
 0x3a6   : > { %4195 = vmatpush.bf16.msra.mxu2 %v7704_v23  ;;  %v7848_v23 = vor.u32 %v8883_v15, %v7847_v18  ;;  %v7720_v20 = vor.u32 %v8851_v43, %v7719_v11  ;;  %v7655_v42 = vld [vmem:[%s9611_s27 + $0xc58] sm:$0xf]  ;;  %v8826_v54 = vld [vmem:[%s9611_s27 + $0xc2c] sm:$0xf0]  ;;  %v7617_v57 = vld [vmem:[%s9611_s27 + $0xc30] sm:$0xf0] }
 0x3a7   : > { %4208 = vmatpush.bf16.msra.mxu3 %v7708_v27  ;;  %v10775_v27 = vpack.c.b16 %v3842_v21, %v3842_v21  ;;  %v8842_v21 = vld [vmem:[%s9611_s27 + $0xcac] sm:$0xf0]  ;;  %v8835_v44 = vld [vmem:[%s9611_s27 + $0xc74] sm:$0xf0] }
 0x3a8   : > { %v7623_v58 = vld [vmem:[%s9611_s27 + $0xc18] sm:$0xf] }
 0x3a9   : > { %4170 = vmatpush.bf16.msra.mxu0 %v7664_v37  ;;  %4183 = vmatpush.bf16.msra.mxu1 %v7668_v39  ;;  %v7816_v37 = vor.u32 %v8875_v31, %v7815_v30  ;;  %v8862_v39 = vld [vmem:[%s9611_s27 + $0xd54] sm:$0xf]  ;;  %v7689_v30 = vld [vmem:[%s9611_s27 + $0xcb8] sm:$0xf0] }
 0x3aa   : > { %4196 = vmatpush.bf16.msra.mxu2 %v7672_v40  ;;  %v7820_v40 = vor.u32 %v8871_v33, %v7817_v34  ;;  %v7780_v51 = vor.u32 %v8862_v39, %v7777_v41  ;;  %v7649_v41 = vld [vmem:[%s9611_s27 + $0xc70] sm:$0xf0] }
 0x3ab   : > { %4209 = vmatpush.bf16.msra.mxu3 %v7676_v46  ;;  %v7785_v46 = vld [vmem:[%s9611_s27 + $0xd78] sm:$0xf0]  ;;  %v7652_v55 = vor.u32 %v8830_v38, %v7649_v41  ;;  %v8047_v41 = vld [vmem:[%s9611_s27 + $0xf00] sm:$0xf] }
 0x3ad   : > { %4171 = vmatpush.bf16.msra.mxu0 %v7632_v56  ;;  %4184 = vmatpush.bf16.msra.mxu1 %v7636_v61  ;;  %v7788_v56 = vor.u32 %v8863_v45, %v7785_v46  ;;  %v8855_v61 = vld [vmem:[%s9611_s27 + $0xd1c] sm:$0xf] }
 0x3ae   : > { %4197 = vmatpush.bf16.msra.mxu2 %v7640_v63  ;;  %v7753_v63 = vld [vmem:[%s9611_s27 + $0xd38] sm:$0xf0] }
 0x3af   : > { %4210 = vmatpush.bf16.msra.mxu3 %v7644_v6  ;;  %v8850_v6 = vld [vmem:[%s9611_s27 + $0xcec] sm:$0xf0]  ;;  %v7756_v47 = vor.u32 %v8855_v61, %v7753_v63  ;;  %v8831_v46 = vld [vmem:[%s9611_s27 + $0xc5c] sm:$0xf]  ;;  %v8827_v63 = vld [vmem:[%s9611_s27 + $0xc34] sm:$0xf0] }
 0x3b0   : > { %v7712_v18 = vor.u32 %v8850_v6, %v7711_v0  ;;  %v7625_v0 = vld [vmem:[%s9611_s27 + $0xc38] sm:$0xf0]  ;;  %v8940_v6 = vld [vmem:[%s9611_s27 + $0xfc4] sm:$0xf]  ;;  %v7624_v43 = vor.u32 %v8827_v63, %v7623_v58 }
 0x3b1   : > { %4172 = vmatpush.bf16.msra.mxu0 %v7600_v13  ;;  %4185 = vmatpush.bf16.msra.mxu1 %v7604_v16  ;;  %v3151_v2 = vpop.f32.mrf.mxu1  ;;  %v7721_v13 = vld [vmem:[%s9611_s27 + $0xcf8] sm:$0xf0]  ;;  %v3138_v14 = vpop.f32.mrf.mxu0  ;;  %v7679_v16 = vld [vmem:[%s9611_s27 + $0xc90] sm:$0xf] }
 0x3b2   : > { %4198 = vmatpush.bf16.msra.mxu2 %v7608_v17  ;;  %v3241_v9 = vrot.slane %v3151_v2, 6  ;;  %v7716_v17 = vor.u32 %v8846_v7, %v7713_v10  ;;  %v7680_v31 = vor.u32 %v8842_v21, %v7679_v16  ;;  %v7616_v7 = vor.u32 %v8826_v54, %v7615_v53  ;;  %v8945_v10 = vld [vmem:[%s9611_s27 + $0xfe4] sm:$0xf0]  ;;  %v8917_v53 = vld [vmem:[%s9611_s27 + $0xf0c] sm:$0xf] }
 0x3b3   : > { %4211 = vmatpush.bf16.msra.mxu3 %v7612_v32  ;;  %v8838_v32 = vld [vmem:[%s9611_s27 + $0xc94] sm:$0xf]  ;;  %v8057_v54 = vld [vmem:[%s9611_s27 + $0xf28] sm:$0xf0] }
 0x3b4   : > { %4186 = vmatmul.bf16.vlgmr.msra.gmra.mxu1 %v10775_v27  ;;  %4173 = vmatmul.bf16.vlgmr.msra.gmra.mxu0 %v10775_v27  ;;  %v3247_v15 = vsel %vm1173_vm4, %v3138_v14, %v3241_v9  ;;  %v8145_v9 = vld [vmem:[%s9611_s27 + $0xfe0] sm:$0xf0]  ;;  %v8060_v63 = vor.u32 %v8917_v53, %v8057_v54 }
 0x3b5   : > { %4217 = vmatpush.bf16.msrb.mxu0 %v7840_v25  ;;  %4230 = vmatpush.bf16.msrb.mxu1 %v7844_v22  ;;  %v7681_v25 = vld [vmem:[%s9611_s27 + $0xcb0] sm:$0xf0]  ;;  %v7724_v22 = vor.u32 %v8847_v12, %v7721_v13  ;;  %v8941_v12 = vld [vmem:[%s9611_s27 + $0xfcc] sm:$0xf] }
 0x3b6   : > { %4243 = vmatpush.bf16.msrb.mxu2 %v7848_v23  ;;  %4212 = vmatmul.bf16.vlgmr.msra.gmra.mxu3 %v10775_v27  ;;  %v8153_v13 = vld [vmem:[%s9611_s27 + $0xfe8] sm:$0xf0] }
 0x3b7   : > { %4256 = vmatpush.bf16.msrb.mxu3 %v7852_v19  ;;  %4199 = vmatmul.bf16.vlgmr.msra.gmra.mxu2 %v10775_v27  ;;  %v8156_v21 = vor.u32 %v8941_v12, %v8153_v13  ;;  %v8904_v12 = vld [vmem:[%s9611_s27 + $0xe9c] sm:$0xf0]  ;;  %v8900_v13 = vld [vmem:[%s9611_s27 + $0xe84] sm:$0xf] }
 0x3b9   : > { %4218 = vmatpush.bf16.msrb.mxu0 %v7808_v35  ;;  %4231 = vmatpush.bf16.msrb.mxu1 %v7812_v36  ;;  %v3177_v60 = vpop.f32.mrf.mxu3  ;;  %v3153_v33 = vpop.f32.mrf.mxu1  ;;  %v7684_v35 = vor.u32 %v8838_v32, %v7681_v25  ;;  %v7688_v36 = vor.u32 %v8843_v26, %v7687_v24  ;;  %v8113_v32 = vld [vmem:[%s9611_s27 + $0xfa0] sm:$0xf0]  ;;  %v8119_v25 = vld [vmem:[%s9611_s27 + $0xf88] sm:$0xf] }
 0x3ba   : > { %4244 = vmatpush.bf16.msrb.mxu2 %v7816_v37  ;;  %v3164_v1 = vpop.f32.mrf.mxu2  ;;  %v3243_v19 = vrot.slane %v3177_v60, 2  ;;  %v7647_v37 = vld [vmem:[%s9611_s27 + $0xc50] sm:$0xf]  ;;  %v8121_v60 = vld [vmem:[%s9611_s27 + $0xfa8] sm:$0xf0] }
 0x3bb   : > { %4257 = vmatpush.bf16.msrb.mxu3 %v7820_v40  ;;  %v3242_v23 = vrot.slane %v3164_v1, 4  ;;  %v7692_v40 = vor.u32 %v8839_v28, %v7689_v30  ;;  %v8932_v1 = vld [vmem:[%s9611_s27 + $0xf84] sm:$0xf]  ;;  %v8079_v28 = vld [vmem:[%s9611_s27 + $0xf40] sm:$0xf] }
 0x3bc   : > { %v8116_v26 = vor.u32 %v8932_v1, %v8113_v32  ;;  %v8928_v30 = vld [vmem:[%s9611_s27 + $0xf5c] sm:$0xf0]  ;;  %v7993_v32 = vld [vmem:[%s9611_s27 + $0xea8] sm:$0xf0] }
 0x3bd   : > { %4219 = vmatpush.bf16.msrb.mxu0 %v7776_v50  ;;  %4232 = vmatpush.bf16.msrb.mxu1 %v7780_v51  ;;  %v3248_v34 = vsel %vm1175_vm5, %v3242_v23, %v3243_v19  ;;  %v7657_v50 = vld [vmem:[%s9611_s27 + $0xc78] sm:$0xf0]  ;;  %v3140_v51 = vpop.f32.mrf.mxu0  ;;  %v8933_v23 = vld [vmem:[%s9611_s27 + $0xf8c] sm:$0xf]  ;;  %v8080_v38 = vor.u32 %v8928_v30, %v8079_v28  ;;  %v8892_v28 = vld [vmem:[%s9611_s27 + $0xe44] sm:$0xf] }
 0x3be   : > { %4245 = vmatpush.bf16.msrb.mxu2 %v7784_v29  ;;  %v3249_v39 = vsel %vm1177_vm6, %v3247_v15, %v3248_v34  ;;  %v7648_v29 = vor.u32 %v8834_v8, %v7647_v37  ;;  %v7660_v61 = vor.u32 %v8831_v46, %v7657_v50  ;;  %v8148_v15 = vor.u32 %v8940_v6, %v8145_v9  ;;  %v8081_v34 = vld [vmem:[%s9611_s27 + $0xf60] sm:$0xf0]  ;;  %v8925_v37 = vld [vmem:[%s9611_s27 + $0xf4c] sm:$0xf]  ;;  %v8055_v51 = vld [vmem:[%s9611_s27 + $0xf08] sm:$0xf] }
 0x3bf   : > { %4258 = vmatpush.bf16.msrb.mxu3 %v7788_v56  ;;  %v10828_v45 = vadd.f32 %v3249_v39, %v10675_v62  ;;  %v7656_v56 = vor.u32 %v8835_v44, %v7655_v42  ;;  %v8822_v62 = vld [vmem:[%s9611_s27 + $0xc14] sm:$0xf]  ;;  %v8124_v33 = vor.u32 %v8933_v23, %v8121_v60  ;;  %v8089_v8 = vld [vmem:[%s9611_s27 + $0xf68] sm:$0xf0]  ;;  %v8920_v42 = vld [vmem:[%s9611_s27 + $0xf1c] sm:$0xf0] }
 0x3c0   : > { %v7620_v11 = vor.u32 %v8822_v62, %v7617_v57  ;;  %v8916_v44 = vld [vmem:[%s9611_s27 + $0xf04] sm:$0xf]  ;;  %v8092_v46 = vor.u32 %v8925_v37, %v8089_v8  ;;  %v8893_v37 = vld [vmem:[%s9611_s27 + $0xe4c] sm:$0xf] }
 0x3c1   : > { %4220 = vmatpush.bf16.msrb.mxu0 %v7744_v4  ;;  %4233 = vmatpush.bf16.msrb.mxu1 %v7748_v3  ;;  %v8823_v4 = vld [vmem:[%s9611_s27 + $0xc1c] sm:$0xf]  ;;  %v3179_v2 = vpop.f32.mrf.mxu3  ;;  %v8143_v3 = vld [vmem:[%s9611_s27 + $0xfc0] sm:$0xf]  ;;  %v8049_v50 = vld [vmem:[%s9611_s27 + $0xf20] sm:$0xf0] }
 0x3c2   : > { %4246 = vmatpush.bf16.msrb.mxu2 %v7752_v5  ;;  %v3166_v59 = vpop.f32.mrf.mxu2  ;;  %v8944_v5 = vld [vmem:[%s9611_s27 + $0xfdc] sm:$0xf0]  ;;  %v7628_v14 = vor.u32 %v8823_v4, %v7625_v0  ;;  %v8052_v57 = vor.u32 %v8916_v44, %v8049_v50  ;;  %v8017_v4 = vld [vmem:[%s9611_s27 + $0xee0] sm:$0xf0]  ;;  %v8023_v0 = vld [vmem:[%s9611_s27 + $0xec8] sm:$0xf] }
 0x3c3   : > { %4259 = vmatpush.bf16.msrb.mxu3 %v7756_v47  ;;  %v8151_v47 = vld [vmem:[%s9611_s27 + $0xfc8] sm:$0xf]  ;;  %v8908_v59 = vld [vmem:[%s9611_s27 + $0xec4] sm:$0xf]  ;;  %v7961_v8 = vld [vmem:[%s9611_s27 + $0xe68] sm:$0xf0] }
 0x3c4   : > { %v8152_v16 = vor.u32 %v8945_v10, %v8151_v47  ;;  %v8913_v2 = vld [vmem:[%s9611_s27 + $0xee4] sm:$0xf0]  ;;  %v7983_v47 = vld [vmem:[%s9611_s27 + $0xe80] sm:$0xf]  ;;  %v8020_v10 = vor.u32 %v8908_v59, %v8017_v4  ;;  %v7964_v54 = vor.u32 %v8893_v37, %v7961_v8  ;;  %v8942_v59 = vld [vmem:[%s9611_s27 + $0xfd4] sm:$0xf] }
 0x3c5   : > { %4221 = vmatpush.bf16.msrb.mxu0 %v7712_v18  ;;  %4234 = vmatpush.bf16.msrb.mxu1 %v7716_v17  ;;  %v8144_v18 = vor.u32 %v8944_v5, %v8143_v3  ;;  %v8111_v17 = vld [vmem:[%s9611_s27 + $0xf80] sm:$0xf]  ;;  %v8909_v3 = vld [vmem:[%s9611_s27 + $0xecc] sm:$0xf]  ;;  %v7927_v50 = vld [vmem:[%s9611_s27 + $0xe08] sm:$0xf] }
 0x3c6   : > { %4247 = vmatpush.bf16.msrb.mxu2 %v7720_v20  ;;  %v8936_v20 = vld [vmem:[%s9611_s27 + $0xf9c] sm:$0xf0]  ;;  %v8025_v5 = vld [vmem:[%s9611_s27 + $0xee8] sm:$0xf0]  ;;  %v8918_v37 = vld [vmem:[%s9611_s27 + $0xf14] sm:$0xf] }
 0x3c7   : > { %4260 = vmatpush.bf16.msrb.mxu3 %v7724_v22  ;;  %v8937_v22 = vld [vmem:[%s9611_s27 + $0xfa4] sm:$0xf0]  ;;  %v8112_v24 = vor.u32 %v8936_v20, %v8111_v17 }
 0x3c8   : > { %v8120_v19 = vor.u32 %v8937_v22, %v8119_v25  ;;  %v7991_v17 = vld [vmem:[%s9611_s27 + $0xe88] sm:$0xf]  ;;  %v7984_v25 = vor.u32 %v8904_v12, %v7983_v47 }
 0x3c9   : > { %4222 = vmatpush.bf16.msrb.mxu0 %v7680_v31  ;;  %4235 = vmatpush.bf16.msrb.mxu1 %v7684_v35  ;;  %v8924_v31 = vld [vmem:[%s9611_s27 + $0xf44] sm:$0xf]  ;;  %v8087_v35 = vld [vmem:[%s9611_s27 + $0xf48] sm:$0xf] }
 0x3ca   : > { %4248 = vmatpush.bf16.msrb.mxu2 %v7688_v36  ;;  %v8929_v36 = vld [vmem:[%s9611_s27 + $0xf64] sm:$0xf0]  ;;  %v8084_v39 = vor.u32 %v8924_v31, %v8081_v34 }
 0x3cb   : > { %4261 = vmatpush.bf16.msrb.mxu3 %v7692_v40  ;;  %v8088_v40 = vor.u32 %v8929_v36, %v8087_v35  ;;  %v8905_v20 = vld [vmem:[%s9611_s27 + $0xea4] sm:$0xf0] }
 0x3cc   : > { %v7959_v34 = vld [vmem:[%s9611_s27 + $0xe48] sm:$0xf] }
 0x3cd   : > { %4223 = vmatpush.bf16.msrb.mxu0 %v7648_v29  ;;  %4236 = vmatpush.bf16.msrb.mxu1 %v7652_v55  ;;  %v8921_v29 = vld [vmem:[%s9611_s27 + $0xf24] sm:$0xf0]  ;;  %v8048_v55 = vor.u32 %v8920_v42, %v8047_v41  ;;  %v8888_v41 = vld [vmem:[%s9611_s27 + $0xe1c] sm:$0xf0]  ;;  %v8884_v42 = vld [vmem:[%s9611_s27 + $0xe04] sm:$0xf] }
 0x3ce   : > { %4249 = vmatpush.bf16.msrb.mxu2 %v7656_v56  ;;  %v8015_v56 = vld [vmem:[%s9611_s27 + $0xec0] sm:$0xf]  ;;  %v8056_v58 = vor.u32 %v8921_v29, %v8055_v51  ;;  %v8897_v35 = vld [vmem:[%s9611_s27 + $0xe64] sm:$0xf0]  ;;  %v4358_v51 = vrot.slane %v9905_v48, 7  ;;  %v4359_v29 = vrot.slane %v9907_v49, 6 }
 0x3cf   : > { %4262 = vmatpush.bf16.msrb.mxu3 %v7660_v61  ;;  %v8167_v48 = vld [vmem:[%s9611_s27 + $0xfd8] sm:$0xf] }
 0x3d0   : > { %v8947_v49 = vld [vmem:[%s9611_s27 + $0xff4] sm:$0xf0] }
 0x3d1   : > { %4224 = vmatpush.bf16.msrb.mxu0 %v7616_v7  ;;  %4237 = vmatpush.bf16.msrb.mxu1 %v7620_v11  ;;  %v3203_v62 = vpop.f32.mrf.mxu1  ;;  %v3190_v6 = vpop.f32.mrf.mxu0  ;;  %v8024_v11 = vor.u32 %v8913_v2, %v8023_v0  ;;  %v8943_v2 = vld [vmem:[%s9611_s27 + $0xfdc] sm:$0xf]  ;;  %v8168_v47 = vor.u32 %v8947_v49, %v8167_v48  ;;  %v7999_v48 = vld [vmem:[%s9611_s27 + $0xe90] sm:$0xf] }
 0x3d2   : > { %4250 = vmatpush.bf16.msrb.mxu2 %v7624_v43  ;;  %v3244_v61 = vrot.slane %v3203_v62, 6  ;;  %v7929_v62 = vld [vmem:[%s9611_s27 + $0xe28] sm:$0xf0] }
 0x3d3   : > { %4263 = vmatpush.bf16.msrb.mxu3 %v7628_v14  ;;  %v7985_v14 = vld [vmem:[%s9611_s27 + $0xea0] sm:$0xf0] }
 0x3d4   : > { %4238 = vmatmul.bf16.vlgmr.msrb.gmra.mxu1 %v10775_v27  ;;  %4225 = vmatmul.bf16.vlgmr.msrb.gmra.mxu0 %v10775_v27  ;;  %v3250_v9 = vsel %vm1173_vm4, %v3190_v6, %v3244_v61  ;;  %v7988_v60 = vor.u32 %v8900_v13, %v7985_v14  ;;  %v8129_v14 = vld [vmem:[%s9611_s27 + $0xfb0] sm:$0xf0] }
 0x3d5   : > { %4683 = vmatpush.bf16.msra.mxu0 %v8144_v18  ;;  %4696 = vmatpush.bf16.msra.mxu1 %v8148_v15  ;;  %v8028_v18 = vor.u32 %v8909_v3, %v8025_v5  ;;  %v8169_v3 = vld [vmem:[%s9611_s27 + $0xff8] sm:$0xf0]  ;;  %v4360_v5 = vsel %vm731_vm3, %v4359_v29, %v4358_v51  ;;  %v8914_v29 = vld [vmem:[%s9611_s27 + $0xeec] sm:$0xf0] }
 0x3d6   : > { %4709 = vmatpush.bf16.msra.mxu2 %v8152_v16  ;;  %4264 = vmatmul.bf16.vlgmr.msrb.gmra.mxu3 %v10775_v27  ;;  %v8172_v12 = vor.u32 %v8943_v2, %v8169_v3  ;;  %v10928_v13 = vpack.c.b16 %v4360_v5, %v4360_v5  ;;  %v8906_v2 = vld [vmem:[%s9611_s27 + $0xeac] sm:$0xf0]  ;;  %v8902_v3 = vld [vmem:[%s9611_s27 + $0xe94] sm:$0xf] }
 0x3d7   : > { %4722 = vmatpush.bf16.msra.mxu3 %v8156_v21  ;;  %4251 = vmatmul.bf16.vlgmr.msrb.gmra.mxu2 %v10775_v27  ;;  %v8912_v27 = vld [vmem:[%s9611_s27 + $0xedc] sm:$0xf0]  ;;  %v8901_v21 = vld [vmem:[%s9611_s27 + $0xe8c] sm:$0xf]  ;;  %v8001_v5 = vld [vmem:[%s9611_s27 + $0xeb0] sm:$0xf0] }
 0x3d8   : > { %v8016_v7 = vor.u32 %v8912_v27, %v8015_v56  ;;  %v7996_v31 = vor.u32 %v8901_v21, %v7993_v32  ;;  %v8885_v56 = vld [vmem:[%s9611_s27 + $0xe0c] sm:$0xf]  ;;  %v8946_v27 = vld [vmem:[%s9611_s27 + $0xfec] sm:$0xf0] }
 0x3d9   : > { %4684 = vmatpush.bf16.msra.mxu0 %v8112_v24  ;;  %4697 = vmatpush.bf16.msra.mxu1 %v8116_v26  ;;  %v3229_v16 = vpop.f32.mrf.mxu3  ;;  %v3205_v22 = vpop.f32.mrf.mxu1  ;;  %v7992_v24 = vor.u32 %v8905_v20, %v7991_v17  ;;  %v7951_v26 = vld [vmem:[%s9611_s27 + $0xe40] sm:$0xf]  ;;  %v7932_v6 = vor.u32 %v8885_v56, %v7929_v62  ;;  %v8137_v17 = vld [vmem:[%s9611_s27 + $0xfb8] sm:$0xf0]  ;;  %v8095_v32 = vld [vmem:[%s9611_s27 + $0xf50] sm:$0xf] }
 0x3da   : > { %4710 = vmatpush.bf16.msra.mxu2 %v8120_v19  ;;  %v3216_v43 = vpop.f32.mrf.mxu2  ;;  %v3246_v1 = vrot.slane %v3229_v16, 2  ;;  %v8896_v19 = vld [vmem:[%s9611_s27 + $0xe5c] sm:$0xf0]  ;;  %v8935_v16 = vld [vmem:[%s9611_s27 + $0xf9c] sm:$0xf] }
 0x3db   : > { %4723 = vmatpush.bf16.msra.mxu3 %v8124_v33  ;;  %v3245_v15 = vrot.slane %v3216_v43, 4  ;;  %v7953_v33 = vld [vmem:[%s9611_s27 + $0xe60] sm:$0xf0]  ;;  %v8934_v43 = vld [vmem:[%s9611_s27 + $0xf94] sm:$0xf] }
 0x3dc   : > { %v7956_v44 = vor.u32 %v8892_v28, %v7953_v33  ;;  %v8926_v22 = vld [vmem:[%s9611_s27 + $0xf54] sm:$0xf]  ;;  %v8105_v28 = vld [vmem:[%s9611_s27 + $0xf78] sm:$0xf0]  ;;  %v8039_v62 = vld [vmem:[%s9611_s27 + $0xed8] sm:$0xf] }
 0x3dd   : > { %4685 = vmatpush.bf16.msra.mxu0 %v8080_v38  ;;  %4698 = vmatpush.bf16.msra.mxu1 %v8084_v39  ;;  %v3251_v23 = vsel %vm1175_vm5, %v3245_v15, %v3246_v1  ;;  %v3192_v38 = vpop.f32.mrf.mxu0  ;;  %v7952_v39 = vor.u32 %v8896_v19, %v7951_v26  ;;  %v8939_v15 = vld [vmem:[%s9611_s27 + $0xfb4] sm:$0xf0]  ;;  %v8132_v1 = vor.u32 %v8934_v43, %v8129_v14  ;;  %v8927_v19 = vld [vmem:[%s9611_s27 + $0xf5c] sm:$0xf]  ;;  %v8033_v56 = vld [vmem:[%s9611_s27 + $0xef0] sm:$0xf0] }
 0x3de   : > { %4711 = vmatpush.bf16.msra.mxu2 %v8088_v40  ;;  %v3252_v30 = vsel %vm1177_vm6, %v3250_v9, %v3251_v23  ;;  %v7919_v40 = vld [vmem:[%s9611_s27 + $0xe00] sm:$0xf]  ;;  %v8140_v23 = vor.u32 %v8935_v16, %v8137_v17  ;;  %v8931_v26 = vld [vmem:[%s9611_s27 + $0xf74] sm:$0xf0]  ;;  %v8108_v8 = vor.u32 %v8927_v19, %v8105_v28  ;;  %v8065_v38 = vld [vmem:[%s9611_s27 + $0xf30] sm:$0xf0]  ;;  %v8000_v14 = vor.u32 %v8906_v2, %v7999_v48 }
 0x3df   : > { %4724 = vmatpush.bf16.msra.mxu3 %v8092_v46  ;;  %v10902_v36 = vadd.f32 %v3252_v30, %v10749_v52  ;;  %v7960_v46 = vor.u32 %v8897_v35, %v7959_v34  ;;  %v7921_v52 = vld [vmem:[%s9611_s27 + $0xe20] sm:$0xf0]  ;;  %v7920_v61 = vor.u32 %v8888_v41, %v7919_v40  ;;  %v8063_v34 = vld [vmem:[%s9611_s27 + $0xf10] sm:$0xf]  ;;  %v8923_v40 = vld [vmem:[%s9611_s27 + $0xf34] sm:$0xf0]  ;;  %v8004_v16 = vor.u32 %v8902_v3, %v8001_v5 }
 0x3e0   : > { %v7924_v4 = vor.u32 %v8884_v42, %v7921_v52  ;;  %v8922_v35 = vld [vmem:[%s9611_s27 + $0xf2c] sm:$0xf0]  ;;  %v8919_v41 = vld [vmem:[%s9611_s27 + $0xf1c] sm:$0xf] }
 0x3e1   : > { %4686 = vmatpush.bf16.msra.mxu0 %v8048_v55  ;;  %4699 = vmatpush.bf16.msra.mxu1 %v8052_v57  ;;  %v8889_v55 = vld [vmem:[%s9611_s27 + $0xe24] sm:$0xf0]  ;;  %v3231_v57 = vpop.f32.mrf.mxu3  ;;  %v8073_v42 = vld [vmem:[%s9611_s27 + $0xf38] sm:$0xf0] }
 0x3e2   : > { %4712 = vmatpush.bf16.msra.mxu2 %v8056_v58  ;;  %v3218_v53 = vpop.f32.mrf.mxu2  ;;  %v8159_v58 = vld [vmem:[%s9611_s27 + $0xfd0] sm:$0xf]  ;;  %v7928_v0 = vor.u32 %v8889_v55, %v7927_v50  ;;  %v8068_v50 = vor.u32 %v8918_v37, %v8065_v38  ;;  %v8076_v55 = vor.u32 %v8919_v41, %v8073_v42  ;;  %v8915_v57 = vld [vmem:[%s9611_s27 + $0xef4] sm:$0xf0]  ;;  %v8903_v43 = vld [vmem:[%s9611_s27 + $0xe9c] sm:$0xf] }
 0x3e3   : > { %4725 = vmatpush.bf16.msra.mxu3 %v8060_v63  ;;  %v8161_v63 = vld [vmem:[%s9611_s27 + $0xff0] sm:$0xf0]  ;;  %v7977_v19 = vld [vmem:[%s9611_s27 + $0xe78] sm:$0xf0] }
 0x3e4   : > { %v8164_v9 = vor.u32 %v8942_v59, %v8161_v63  ;;  %v8910_v53 = vld [vmem:[%s9611_s27 + $0xed4] sm:$0xf]  ;;  %v8887_v42 = vld [vmem:[%s9611_s27 + $0xe1c] sm:$0xf] }
 0x3e5   : > { %4687 = vmatpush.bf16.msra.mxu0 %v8016_v7  ;;  %4700 = vmatpush.bf16.msra.mxu1 %v8020_v10  ;;  %v8160_v7 = vor.u32 %v8946_v27, %v8159_v58  ;;  %v8127_v10 = vld [vmem:[%s9611_s27 + $0xf90] sm:$0xf]  ;;  %v8911_v58 = vld [vmem:[%s9611_s27 + $0xedc] sm:$0xf]  ;;  %v8036_v49 = vor.u32 %v8910_v53, %v8033_v56  ;;  %v8886_v37 = vld [vmem:[%s9611_s27 + $0xe14] sm:$0xf] }
 0x3e6   : > { %4713 = vmatpush.bf16.msra.mxu2 %v8024_v11  ;;  %v8938_v11 = vld [vmem:[%s9611_s27 + $0xfac] sm:$0xf0]  ;;  %v8041_v27 = vld [vmem:[%s9611_s27 + $0xef8] sm:$0xf0]  ;;  %v7937_v38 = vld [vmem:[%s9611_s27 + $0xe30] sm:$0xf0] }
 0x3e7   : > { %4726 = vmatpush.bf16.msra.mxu3 %v8028_v18  ;;  %v8135_v18 = vld [vmem:[%s9611_s27 + $0xf98] sm:$0xf]  ;;  %v8128_v20 = vor.u32 %v8938_v11, %v8127_v10 }
 0x3e8   : > { %v8136_v21 = vor.u32 %v8939_v15, %v8135_v18  ;;  %v8907_v10 = vld [vmem:[%s9611_s27 + $0xeb4] sm:$0xf0] }
 0x3e9   : > { %4688 = vmatpush.bf16.msra.mxu0 %v7984_v25  ;;  %4701 = vmatpush.bf16.msra.mxu1 %v7988_v60  ;;  %v8930_v25 = vld [vmem:[%s9611_s27 + $0xf6c] sm:$0xf0]  ;;  %v8097_v60 = vld [vmem:[%s9611_s27 + $0xf70] sm:$0xf0] }
 0x3ea   : > { %4714 = vmatpush.bf16.msra.mxu2 %v7992_v24  ;;  %v8103_v24 = vld [vmem:[%s9611_s27 + $0xf58] sm:$0xf]  ;;  %v8096_v30 = vor.u32 %v8930_v25, %v8095_v32 }
 0x3eb   : > { %4727 = vmatpush.bf16.msra.mxu3 %v7996_v31  ;;  %v8100_v31 = vor.u32 %v8926_v22, %v8097_v60  ;;  %v8104_v33 = vor.u32 %v8931_v26, %v8103_v24  ;;  %v7969_v22 = vld [vmem:[%s9611_s27 + $0xe70] sm:$0xf0]  ;;  %v8899_v60 = vld [vmem:[%s9611_s27 + $0xe74] sm:$0xf0]  ;;  %v8895_v26 = vld [vmem:[%s9611_s27 + $0xe5c] sm:$0xf] }
 0x3ed   : > { %4689 = vmatpush.bf16.msra.mxu0 %v7952_v39  ;;  %4702 = vmatpush.bf16.msra.mxu1 %v7956_v44  ;;  %v8071_v39 = vld [vmem:[%s9611_s27 + $0xf18] sm:$0xf]  ;;  %v8064_v44 = vor.u32 %v8922_v35, %v8063_v34  ;;  %v7935_v34 = vld [vmem:[%s9611_s27 + $0xe10] sm:$0xf] }
 0x3ee   : > { %4715 = vmatpush.bf16.msra.mxu2 %v7960_v46  ;;  %v8031_v46 = vld [vmem:[%s9611_s27 + $0xed0] sm:$0xf]  ;;  %v8072_v51 = vor.u32 %v8923_v40, %v8071_v39  ;;  %v7943_v39 = vld [vmem:[%s9611_s27 + $0xe18] sm:$0xf] }
 0x3ef   : > { %4728 = vmatpush.bf16.msra.mxu3 %v7964_v54  ;;  %v8890_v35 = vld [vmem:[%s9611_s27 + $0xe2c] sm:$0xf0]  ;;  %v8891_v40 = vld [vmem:[%s9611_s27 + $0xe34] sm:$0xf0] }
 0x3f1   : > { %4690 = vmatpush.bf16.msra.mxu0 %v7920_v61  ;;  %4703 = vmatpush.bf16.msra.mxu1 %v7924_v4  ;;  %v3669_v52 = vpop.f32.mrf.mxu1  ;;  %v3656_v59 = vpop.f32.mrf.mxu0  ;;  %v8032_v61 = vor.u32 %v8914_v29, %v8031_v46  ;;  %v8040_v4 = vor.u32 %v8915_v57, %v8039_v62  ;;  %v7936_v46 = vor.u32 %v8890_v35, %v7935_v34 }
 0x3f2   : > { %4716 = vmatpush.bf16.msra.mxu2 %v7928_v0  ;;  %v3759_v54 = vrot.slane %v3669_v52, 6  ;;  %v7940_v52 = vor.u32 %v8886_v37, %v7937_v38 }
 0x3f3   : > { %4729 = vmatpush.bf16.msra.mxu3 %v7932_v6  ;;  %v8044_v6 = vor.u32 %v8911_v58, %v8041_v27 }
 0x3f4   : > { %4704 = vmatmul.bf16.vlgmr.msra.gmra.mxu1 %v10928_v13  ;;  %4691 = vmatmul.bf16.vlgmr.msra.gmra.mxu0 %v10928_v13  ;;  %v3765_v63 = vsel %vm1173_vm4, %v3656_v59, %v3759_v54 }
 0x3f5   : > { %4735 = vmatpush.bf16.msrb.mxu0 %v8160_v7  ;;  %4748 = vmatpush.bf16.msrb.mxu1 %v8164_v9 }
 0x3f6   : > { %4761 = vmatpush.bf16.msrb.mxu2 %v8168_v47  ;;  %4730 = vmatmul.bf16.vlgmr.msra.gmra.mxu3 %v10928_v13  ;;  %v8007_v47 = vld [vmem:[%s9611_s27 + $0xe98] sm:$0xf] }
 0x3f7   : > { %4774 = vmatpush.bf16.msrb.mxu3 %v8172_v12  ;;  %4717 = vmatmul.bf16.vlgmr.msra.gmra.mxu2 %v10928_v13  ;;  %v8009_v12 = vld [vmem:[%s9611_s27 + $0xeb8] sm:$0xf0]  ;;  %v8008_v17 = vor.u32 %v8907_v10, %v8007_v47 }
 0x3f8   : > { %v8012_v25 = vor.u32 %v8903_v43, %v8009_v12 }
 0x3f9   : > { %4736 = vmatpush.bf16.msrb.mxu0 %v8128_v20  ;;  %4749 = vmatpush.bf16.msrb.mxu1 %v8132_v1  ;;  %v3695_v9 = vpop.f32.mrf.mxu3  ;;  %v3671_v18 = vpop.f32.mrf.mxu1  ;;  %v7967_v20 = vld [vmem:[%s9611_s27 + $0xe50] sm:$0xf] }
 0x3fa   : > { %4762 = vmatpush.bf16.msrb.mxu2 %v8136_v21  ;;  %v3682_v0 = vpop.f32.mrf.mxu2  ;;  %v3761_v11 = vrot.slane %v3695_v9, 2  ;;  %v8898_v1 = vld [vmem:[%s9611_s27 + $0xe6c] sm:$0xf0]  ;;  %v8894_v21 = vld [vmem:[%s9611_s27 + $0xe54] sm:$0xf]  ;;  %v3658_v28 = vpop.f32.mrf.mxu0 }
 0x3fb   : > { %4775 = vmatpush.bf16.msrb.mxu3 %v8140_v23  ;;  %v3760_v7 = vrot.slane %v3682_v0, 4  ;;  %v7975_v23 = vld [vmem:[%s9611_s27 + $0xe58] sm:$0xf] }
 0x3fd   : > { %4737 = vmatpush.bf16.msrb.mxu0 %v8096_v30  ;;  %4750 = vmatpush.bf16.msrb.mxu1 %v8100_v31  ;;  %v3766_v15 = vsel %vm1175_vm5, %v3760_v7, %v3761_v11  ;;  %v7968_v30 = vor.u32 %v8898_v1, %v7967_v20  ;;  %v7972_v31 = vor.u32 %v8894_v21, %v7969_v22 }
 0x3fe   : > { %4763 = vmatpush.bf16.msrb.mxu2 %v8104_v33  ;;  %v3767_v32 = vsel %vm1177_vm6, %v3765_v63, %v3766_v15  ;;  %v7976_v33 = vor.u32 %v8899_v60, %v7975_v23 }
 0x3ff   : > { %4776 = vmatpush.bf16.msrb.mxu3 %v8108_v8  ;;  %v10981_v24 = vadd.f32 %v3767_v32, %v10828_v45  ;;  %v7980_v45 = vor.u32 %v8895_v26, %v7977_v19 }
 0x401   : > { %4738 = vmatpush.bf16.msrb.mxu0 %v8064_v44  ;;  %4751 = vmatpush.bf16.msrb.mxu1 %v8068_v50  ;;  %v3697_v41 = vpop.f32.mrf.mxu3  ;;  %v7945_v44 = vld [vmem:[%s9611_s27 + $0xe38] sm:$0xf0]  ;;  %v7944_v50 = vor.u32 %v8891_v40, %v7943_v39 }
 0x402   : > { %4764 = vmatpush.bf16.msrb.mxu2 %v8072_v51  ;;  %v3684_v8 = vpop.f32.mrf.mxu2  ;;  %v7948_v51 = vor.u32 %v8887_v42, %v7945_v44 }
 0x403   : > { %4777 = vmatpush.bf16.msrb.mxu3 %v8076_v55 }
 0x405   : > { %4739 = vmatpush.bf16.msrb.mxu0 %v8032_v61  ;;  %4752 = vmatpush.bf16.msrb.mxu1 %v8036_v49 }
 0x406   : > { %4765 = vmatpush.bf16.msrb.mxu2 %v8040_v4 }
 0x407   : > { %4778 = vmatpush.bf16.msrb.mxu3 %v8044_v6 }
 0x409   : > { %4740 = vmatpush.bf16.msrb.mxu0 %v8000_v14  ;;  %4753 = vmatpush.bf16.msrb.mxu1 %v8004_v16 }
 0x40a   : > { %4766 = vmatpush.bf16.msrb.mxu2 %v8008_v17 }
 0x40b   : > { %4779 = vmatpush.bf16.msrb.mxu3 %v8012_v25 }
 0x40d   : > { %4741 = vmatpush.bf16.msrb.mxu0 %v7968_v30  ;;  %4754 = vmatpush.bf16.msrb.mxu1 %v7972_v31 }
 0x40e   : > { %4767 = vmatpush.bf16.msrb.mxu2 %v7976_v33 }
 0x40f   : > { %4780 = vmatpush.bf16.msrb.mxu3 %v7980_v45 }
 0x411   : > { %4742 = vmatpush.bf16.msrb.mxu0 %v7936_v46  ;;  %4755 = vmatpush.bf16.msrb.mxu1 %v7940_v52  ;;  %v3721_v29 = vpop.f32.mrf.mxu1  ;;  %v3708_v54 = vpop.f32.mrf.mxu0 }
 0x412   : > { %4768 = vmatpush.bf16.msrb.mxu2 %v7944_v50  ;;  %v3762_v53 = vrot.slane %v3721_v29, 6 }
 0x413   : > { %4781 = vmatpush.bf16.msrb.mxu3 %v7948_v51 }
 0x414   : > { %4743 = vmatmul.bf16.vlgmr.msrb.gmra.mxu0 %v10928_v13  ;;  %4756 = vmatmul.bf16.vlgmr.msrb.gmra.mxu1 %v10928_v13  ;;  %v3768_v55 = vsel %vm1173_vm4, %v3708_v54, %v3762_v53 }
 0x415   : > { %4769 = vmatmul.bf16.vlgmr.msrb.gmra.mxu2 %v10928_v13 }
 0x416   : > { %4782 = vmatmul.bf16.vlgmr.msrb.gmra.mxu3 %v10928_v13 }
 0x419   : > { %v3747_v57 = vpop.f32.mrf.mxu3  ;;  %v3723_v27 = vpop.f32.mrf.mxu1 }
 0x41a   : > { %v3734_v56 = vpop.f32.mrf.mxu2  ;;  %v3764_v58 = vrot.slane %v3747_v57, 2  ;;  %v3710_v48 = vpop.f32.mrf.mxu0 }
 0x41b   : > { %v3763_v62 = vrot.slane %v3734_v56, 4 }
 0x41d   : > { %v3769_v59 = vsel %vm1175_vm5, %v3763_v62, %v3764_v58 }
 0x41e   : > { %v3770_v61 = vsel %vm1177_vm6, %v3768_v55, %v3769_v59 }
 0x41f   : > { %v3774_v63 = vadd.f32 %v3770_v61, %v10902_v36 }
 0x421   : > { %v3749_v4 = vpop.f32.mrf.mxu3 }
 0x422   : > { %v3736_v49 = vpop.f32.mrf.mxu2 }
 0x431   : > { %v4187_v13 = vpop.f32.mrf.mxu1  ;;  %v4174_v2 = vpop.f32.mrf.mxu0 }
 0x432   : > { %v4277_v0 = vrot.slane %v4187_v13, 6 }
 0x434   : > { %v4283_v9 = vsel %vm1173_vm4, %v4174_v2, %v4277_v0 }
 0x439   : > { %v4213_v6 = vpop.f32.mrf.mxu3  ;;  %v4189_v47 = vpop.f32.mrf.mxu1 }
 0x43a   : > { %v4200_v3 = vpop.f32.mrf.mxu2  ;;  %v4279_v7 = vrot.slane %v4213_v6, 2  ;;  %v4176_v36 = vpop.f32.mrf.mxu0 }
 0x43b   : > { %v4278_v5 = vrot.slane %v4200_v3, 4 }
 0x43d   : > { %v4284_v10 = vsel %vm1175_vm5, %v4278_v5, %v4279_v7 }
 0x43e   : > { %v4285_v11 = vsel %vm1177_vm6, %v4283_v9, %v4284_v10 }
 0x43f   : > { %v4291_v43 = vadd.f32 %v4285_v11, %v10981_v24 }
 0x441   : > { %v4215_v14 = vpop.f32.mrf.mxu3 }
 0x442   : > { %v4202_v12 = vpop.f32.mrf.mxu2 }
 0x451   : > { %v4239_v18 = vpop.f32.mrf.mxu1  ;;  %v4226_v16 = vpop.f32.mrf.mxu0 }
 0x452   : > { %v4280_v15 = vrot.slane %v4239_v18, 6 }
 0x454   : > { %v4286_v32 = vsel %vm1173_vm4, %v4226_v16, %v4280_v15 }
 0x459   : > { %v4265_v1 = vpop.f32.mrf.mxu3  ;;  %v4241_v25 = vpop.f32.mrf.mxu1 }
 0x45a   : > { %v4252_v17 = vpop.f32.mrf.mxu2  ;;  %v4282_v21 = vrot.slane %v4265_v1, 2  ;;  %v4228_v26 = vpop.f32.mrf.mxu0 }
 0x45b   : > { %v4281_v20 = vrot.slane %v4252_v17, 4 }
 0x45d   : > { %v4287_v22 = vsel %vm1175_vm5, %v4281_v20, %v4282_v21 }
 0x45e   : > { %v4288_v23 = vsel %vm1177_vm6, %v4286_v32, %v4287_v22 }
 0x45f   : > { %v4292_v60 = vadd.f32 %v4288_v23, %v3774_v63 }
 0x461   : > { %v4267_v19 = vpop.f32.mrf.mxu3 }
 0x462   : > { %v4254_v24 = vpop.f32.mrf.mxu2 }
 0x471   : > { %v4705_v28 = vpop.f32.mrf.mxu1  ;;  %v4692_v31 = vpop.f32.mrf.mxu0 }
 0x472   : > { %v4795_v30 = vrot.slane %v4705_v28, 6 }
 0x474   : > { %v4801_v8 = vsel %vm1173_vm4, %v4692_v31, %v4795_v30 }
 0x479   : > { %v4731_v35 = vpop.f32.mrf.mxu3  ;;  %v4707_v45 = vpop.f32.mrf.mxu1 }
 0x47a   : > { %v4718_v33 = vpop.f32.mrf.mxu2  ;;  %v4797_v37 = vrot.slane %v4731_v35, 2  ;;  %v4694_v41 = vpop.f32.mrf.mxu0 }
 0x47b   : > { %v4796_v34 = vrot.slane %v4718_v33, 4 }
 0x47d   : > { %v4802_v38 = vsel %vm1175_vm5, %v4796_v34, %v4797_v37 }
 0x47e   : > { %v4803_v39 = vsel %vm1177_vm6, %v4801_v8, %v4802_v38 }
 0x47f   : > { %v4809_v40 = vadd.f32 %v4803_v39, %v4291_v43 }
 0x481   : > { %4811 = vst [vmem:[#allocation3] sm:$0xff] %v4809_v40  ;;  %v4733_v44 = vpop.f32.mrf.mxu3 }
 0x482   : > { %v4720_v42 = vpop.f32.mrf.mxu2 }
 0x491   : > { %v4744_v46 = vpop.f32.mrf.mxu0  ;;  %v4757_v52 = vpop.f32.mrf.mxu1 }
 0x492   : > { %v4798_v50 = vrot.slane %v4757_v52, 6 }
 0x494   : > { %v4804_v62 = vsel %vm1173_vm4, %v4744_v46, %v4798_v50 }
 0x498   : > { %v4770_v51 = vpop.f32.mrf.mxu2 }
 0x499   : > { %v4799_v29 = vrot.slane %v4770_v51, 4  ;;  %v4783_v53 = vpop.f32.mrf.mxu3  ;;  %v4746_v54 = vpop.f32.mrf.mxu0 }
 0x49a   : > { %v4800_v55 = vrot.slane %v4783_v53, 2  ;;  %v4759_v56 = vpop.f32.mrf.mxu1 }
 0x49c   : > { %v4805_v57 = vsel %vm1175_vm5, %v4799_v29, %v4800_v55 }
 0x49d   : > { %v4806_v58 = vsel %vm1177_vm6, %v4804_v62, %v4805_v57  ;;  %4816 = sbr.rel (%p8173_p1) target bundleno = 1393 (0x571), region = 88 }
 0x49e   : > { %v4810_v27 = vadd.f32 %v4806_v58, %v4292_v60 }
 0x4a0   : > { %4812 = vst [vmem:[#allocation3 + $0x8] sm:$0xff] %v4810_v27  ;;  %v4772_v59 = vpop.f32.mrf.mxu2 }
 0x4a1   : > { %v4785_v61 = vpop.f32.mrf.mxu3 }
 0x4a2   : > { %v8955_v63 = vld [vmem:[#allocation13 + $0x38] sm:$0xff]  ;;  %v8954_v13 = vld [vmem:[#allocation13 + $0x30] sm:$0xff]  ;;  %v8953_v5 = vld [vmem:[#allocation13 + $0x28] sm:$0xff] }
 0x4a3   : > { %v8963_v48 = vld [vmem:[#allocation13 + $0x78] sm:$0xff]  ;;  %5392 = vmatpush.bf16.msra.mxu0 %v8955_v63  ;;  %v8962_v0 = vld [vmem:[#allocation13 + $0x70] sm:$0xff]  ;;  %v8961_v6 = vld [vmem:[#allocation13 + $0x68] sm:$0xff] }
 0x4a4   : > { %v8971_v49 = vld [vmem:[#allocation13 + $0xb8] sm:$0xff]  ;;  %5405 = vmatpush.bf16.msra.mxu1 %v8963_v48  ;;  %v8970_v2 = vld [vmem:[#allocation13 + $0xb0] sm:$0xff]  ;;  %v8969_v7 = vld [vmem:[#allocation13 + $0xa8] sm:$0xff] }
 0x4a5   : > { %v8979_v4 = vld [vmem:[#allocation13 + $0xf8] sm:$0xff]  ;;  %5418 = vmatpush.bf16.msra.mxu2 %v8971_v49  ;;  %v8978_v3 = vld [vmem:[#allocation13 + $0xf0] sm:$0xff]  ;;  %v8977_v9 = vld [vmem:[#allocation13 + $0xe8] sm:$0xff] }
 0x4a6   : > { %5431 = vmatpush.bf16.msra.mxu3 %v8979_v4  ;;  %v8952_v47 = vld [vmem:[#allocation13 + $0x20] sm:$0xff]  ;;  %v4819_v36 = vld [vmem:[#allocation12] sm:$0xff]  ;;  %v8950_v30 = vld [vmem:[#allocation13 + $0x10] sm:$0xff] }
 0x4a7   : > { %5393 = vmatpush.bf16.msra.mxu0 %v8954_v13  ;;  %v8960_v10 = vld [vmem:[#allocation13 + $0x60] sm:$0xff]  ;;  %v8951_v12 = vld [vmem:[#allocation13 + $0x18] sm:$0xff]  ;;  %v4821_v18 = vperm.slane %v4819_v36, 0  ;;  %v4822_v15 = vperm.slane %v4819_v36, 1  ;;  %v4823_v16 = vperm.slane %v4819_v36, 2  ;;  %v4824_v17 = vperm.slane %v4819_v36, 3 }
 0x4a8   : > { %5406 = vmatpush.bf16.msra.mxu1 %v8962_v0  ;;  %v8968_v11 = vld [vmem:[#allocation13 + $0xa0] sm:$0xff]  ;;  %v8959_v14 = vld [vmem:[#allocation13 + $0x58] sm:$0xff]  ;;  %v4825_v21 = vperm.slane %v4819_v36, 4  ;;  %v4826_v32 = vperm.slane %v4819_v36, 5  ;;  %v4827_v25 = vperm.slane %v4819_v36, 6  ;;  %v4828_v24 = vperm.slane %v4819_v36, 7 }
 0x4a9   : > { %5419 = vmatpush.bf16.msra.mxu2 %v8970_v2  ;;  %v8976_v43 = vld [vmem:[#allocation13 + $0xe0] sm:$0xff]  ;;  %v8967_v20 = vld [vmem:[#allocation13 + $0x98] sm:$0xff]  ;;  %v4829_v22 = vrot.slane %v4822_v15, 6  ;;  %v4830_v23 = vrot.slane %v4823_v16, 4  ;;  %v4831_v60 = vrot.slane %v4824_v17, 2  ;;  %v8958_v31 = vld [vmem:[#allocation13 + $0x50] sm:$0xff] }
 0x4aa   : > { %5432 = vmatpush.bf16.msra.mxu3 %v8978_v3  ;;  %v8975_v1 = vld [vmem:[#allocation13 + $0xd8] sm:$0xff]  ;;  %v4832_v19 = vrot.slane %v4826_v32, 6  ;;  %v4833_v28 = vrot.slane %v4827_v25, 4  ;;  %v8966_v35 = vld [vmem:[#allocation13 + $0x90] sm:$0xff]  ;;  %v4834_v45 = vrot.slane %v4828_v24, 2  ;;  %v8949_v42 = vld [vmem:[#allocation13 + $0x8] sm:$0xff] }
 0x4ab   : > { %5394 = vmatpush.bf16.msra.mxu0 %v8953_v5  ;;  %v4817_v26 = vld [vmem:[#allocation3] sm:$0xff]  ;;  %v4835_v33 = vsel %vm1173_vm4, %v4821_v18, %v4829_v22  ;;  %v4836_v34 = vsel %vm1175_vm5, %v4830_v23, %v4831_v60  ;;  %v4818_v40 = vld [vmem:[#allocation3 + $0x8] sm:$0xff]  ;;  %v8957_v44 = vld [vmem:[#allocation13 + $0x48] sm:$0xff] }
 0x4ac   : > { %5407 = vmatpush.bf16.msra.mxu1 %v8961_v6  ;;  %v8974_v37 = vld [vmem:[#allocation13 + $0xd0] sm:$0xff]  ;;  %v4837_v8 = vsel %vm1177_vm6, %v4835_v33, %v4836_v34  ;;  %v4838_v38 = vsel %vm1173_vm4, %v4825_v21, %v4832_v19  ;;  %v4839_v41 = vsel %vm1175_vm5, %v4833_v28, %v4834_v45  ;;  %v8965_v50 = vld [vmem:[#allocation13 + $0x88] sm:$0xff]  ;;  %v8948_v54 = vld [vmem:[#allocation13] sm:$0xff] }
 0x4ad   : > { %5420 = vmatpush.bf16.msra.mxu2 %v8969_v7  ;;  %v4843_v39 = vadd.f32 %v4837_v8, %v4817_v26  ;;  %v4840_v52 = vsel %vm1177_vm6, %v4838_v38, %v4839_v41  ;;  %v8973_v51 = vld [vmem:[#allocation13 + $0xc8] sm:$0xff]  ;;  %v8956_v55 = vld [vmem:[#allocation13 + $0x40] sm:$0xff]  ;;  %v8987_v57 = vld [vmem:[#allocation13 + $0x138] sm:$0xff] }
 0x4ae   : > { %5433 = vmatpush.bf16.msra.mxu3 %v8977_v9  ;;  %v4844_v29 = vadd.f32 %v4840_v52, %v4818_v40  ;;  %v8964_v56 = vld [vmem:[#allocation13 + $0x80] sm:$0xff]  ;;  %v8995_v58 = vld [vmem:[#allocation13 + $0x178] sm:$0xff]  ;;  %v8986_v61 = vld [vmem:[#allocation13 + $0x130] sm:$0xff] }
 0x4af   : > { %5395 = vmatpush.bf16.msra.mxu0 %v8952_v47  ;;  %v4845_v46 = vmax.f32 %v4843_v39, 0.0  ;;  %v8972_v62 = vld [vmem:[#allocation13 + $0xc0] sm:$0xff]  ;;  %v9003_v27 = vld [vmem:[#allocation13 + $0x1b8] sm:$0xff]  ;;  %v8994_v63 = vld [vmem:[#allocation13 + $0x170] sm:$0xff] }
 0x4b0   : > { %5408 = vmatpush.bf16.msra.mxu1 %v8960_v10  ;;  %v4846_v53 = vmax.f32 %v4844_v29, 0.0  ;;  %v9011_v59 = vld [vmem:[#allocation13 + $0x1f8] sm:$0xff]  ;;  %v9002_v3 = vld [vmem:[#allocation13 + $0x1b0] sm:$0xff]  ;;  %v8985_v9 = vld [vmem:[#allocation13 + $0x128] sm:$0xff] }
 0x4b1   : > { %5421 = vmatpush.bf16.msra.mxu2 %v8968_v11  ;;  %4849 = vst [vmem:[#allocation1] ss:$4 sm:$0xff] %v4845_v46  ;;  %v9010_v5 = vld [vmem:[#allocation13 + $0x1f0] sm:$0xff]  ;;  %v8993_v47 = vld [vmem:[#allocation13 + $0x168] sm:$0xff]  ;;  %v8992_v36 = vld [vmem:[#allocation13 + $0x160] sm:$0xff] }
 0x4b2   : > { %5434 = vmatpush.bf16.msra.mxu3 %v8976_v43  ;;  %4851 = vst [vmem:[#allocation1 + $0x20] ss:$4 sm:$0xff] %v4846_v53  ;;  %v9001_v10 = vld [vmem:[#allocation13 + $0x1a8] sm:$0xff]  ;;  %v8984_v43 = vld [vmem:[#allocation13 + $0x120] sm:$0xff]  ;;  %v8983_v18 = vld [vmem:[#allocation13 + $0x118] sm:$0xff] }
 0x4b3   : > { %5396 = vmatpush.bf16.msra.mxu0 %v8951_v12  ;;  %v9009_v11 = vld [vmem:[#allocation13 + $0x1e8] sm:$0xff]  ;;  %v9000_v12 = vld [vmem:[#allocation13 + $0x1a0] sm:$0xff]  ;;  %v8991_v15 = vld [vmem:[#allocation13 + $0x158] sm:$0xff] }
 0x4b4   : > { %5409 = vmatpush.bf16.msra.mxu1 %v8959_v14  ;;  %v9008_v14 = vld [vmem:[#allocation13 + $0x1e0] sm:$0xff]  ;;  %v8999_v16 = vld [vmem:[#allocation13 + $0x198] sm:$0xff]  ;;  %v8998_v21 = vld [vmem:[#allocation13 + $0x190] sm:$0xff] }
 0x4b5   : > { %5422 = vmatpush.bf16.msra.mxu2 %v8967_v20  ;;  %v9007_v17 = vld [vmem:[#allocation13 + $0x1d8] sm:$0xff]  ;;  %v8982_v20 = vld [vmem:[#allocation13 + $0x110] sm:$0xff]  ;;  %v8981_v25 = vld [vmem:[#allocation13 + $0x108] sm:$0xff] }
 0x4b6   : > { %5435 = vmatpush.bf16.msra.mxu3 %v8975_v1  ;;  %v8990_v1 = vld [vmem:[#allocation13 + $0x150] sm:$0xff]  ;;  %v8989_v22 = vld [vmem:[#allocation13 + $0x148] sm:$0xff]  ;;  %v8980_v26 = vld [vmem:[#allocation13 + $0x100] sm:$0xff] }
 0x4b7   : > { %5397 = vmatpush.bf16.msra.mxu0 %v8950_v30  ;;  %v9006_v32 = vld [vmem:[#allocation13 + $0x1d0] sm:$0xff]  ;;  %v8997_v23 = vld [vmem:[#allocation13 + $0x188] sm:$0xff]  ;;  %v8988_v24 = vld [vmem:[#allocation13 + $0x140] sm:$0xff] }
 0x4b8   : > { %5410 = vmatpush.bf16.msra.mxu1 %v8958_v31  ;;  %v4854_v48 = vld.sshfl [vmem:[#allocation1 + $0x10] sm:$0xff pattern:$0x73625140]  ;;  %v4855_v49 = vld.sshfl [vmem:[#allocation1 + $0x18] sm:$0xff pattern:$0x73625140] }
 0x4b9   : > { %5423 = vmatpush.bf16.msra.mxu2 %v8966_v35  ;;  %v4870_v4 = vpack.c.bf16 %v4854_v48, %v4854_v48  ;;  %v4871_v13 = vpack.c.bf16 %v4855_v49, %v4855_v49  ;;  %v4852_v0 = vld.sshfl [vmem:[#allocation1] sm:$0xff pattern:$0x73625140]  ;;  %v4853_v2 = vld.sshfl [vmem:[#allocation1 + $0x8] sm:$0xff pattern:$0x73625140] }
 0x4ba   : > { %5436 = vmatpush.bf16.msra.mxu3 %v8974_v37  ;;  %v4868_v6 = vpack.c.bf16 %v4852_v0, %v4852_v0  ;;  %v4869_v7 = vpack.c.bf16 %v4853_v2, %v4853_v2  ;;  %v9005_v60 = vld [vmem:[#allocation13 + $0x1c8] sm:$0xff]  ;;  %v8996_v19 = vld [vmem:[#allocation13 + $0x180] sm:$0xff]  ;;  %v4857_v31 = vld.sshfl [vmem:[#allocation1 + $0x28] sm:$0xff pattern:$0x73625140] }
 0x4bb   : > { %5398 = vmatpush.bf16.msra.mxu0 %v8949_v42  ;;  %v9004_v28 = vld [vmem:[#allocation13 + $0x1c0] sm:$0xff]  ;;  %v4856_v30 = vld.sshfl [vmem:[#allocation1 + $0x20] sm:$0xff pattern:$0x73625140]  ;;  %v4873_v37 = vpack.c.bf16 %v4857_v31, %v4857_v31 }
 0x4bc   : > { %5411 = vmatpush.bf16.msra.mxu1 %v8957_v44  ;;  %v4858_v33 = vld.sshfl [vmem:[#allocation1 + $0x30] sm:$0xff pattern:$0x73625140]  ;;  %v4859_v34 = vld.sshfl [vmem:[#allocation1 + $0x38] sm:$0xff pattern:$0x73625140]  ;;  %v4872_v35 = vpack.c.bf16 %v4856_v30, %v4856_v30 }
 0x4bd   : > { %5424 = vmatpush.bf16.msra.mxu2 %v8965_v50  ;;  %v4874_v8 = vpack.c.bf16 %v4858_v33, %v4858_v33  ;;  %v4875_v45 = vpack.c.bf16 %v4859_v34, %v4859_v34  ;;  %v9131_v46 = vld [vmem:[#allocation15] ss:$0 sm:$0xff] }
 0x4be   : > { %5437 = vmatpush.bf16.msra.mxu3 %v8973_v51 }
 0x4bf   : > { %5399 = vmatpush.bf16.msra.mxu0 %v8948_v54 }
 0x4c0   : > { %5412 = vmatpush.bf16.msra.mxu1 %v8956_v55 }
 0x4c1   : > { %5425 = vmatpush.bf16.msra.mxu2 %v8964_v56 }
 0x4c2   : > { %5438 = vmatpush.bf16.msra.mxu3 %v8972_v62  ;;  %5400 = vmatmul.bf16.vlgmr.msra.gmra.mxu0 %v4868_v6 }
 0x4c3   : > { %5444 = vmatpush.bf16.msrb.mxu0 %v8987_v57  ;;  %5413 = vmatmul.bf16.vlgmr.msra.gmra.mxu1 %v4869_v7 }
 0x4c4   : > { %5457 = vmatpush.bf16.msrb.mxu1 %v8995_v58  ;;  %5426 = vmatmul.bf16.vlgmr.msra.gmra.mxu2 %v4870_v4 }
 0x4c5   : > { %5470 = vmatpush.bf16.msrb.mxu2 %v9003_v27  ;;  %5439 = vmatmul.bf16.vlgmr.msra.gmra.mxu3 %v4871_v13 }
 0x4c6   : > { %5483 = vmatpush.bf16.msrb.mxu3 %v9011_v59 }
 0x4c7   : > { %5445 = vmatpush.bf16.msrb.mxu0 %v8986_v61 }
 0x4c8   : > { %5458 = vmatpush.bf16.msrb.mxu1 %v8994_v63 }
 0x4c9   : > { %5471 = vmatpush.bf16.msrb.mxu2 %v9002_v3 }
 0x4ca   : > { %5484 = vmatpush.bf16.msrb.mxu3 %v9010_v5 }
 0x4cb   : > { %5446 = vmatpush.bf16.msrb.mxu0 %v8985_v9 }
 0x4cc   : > { %5459 = vmatpush.bf16.msrb.mxu1 %v8993_v47 }
 0x4cd   : > { %5472 = vmatpush.bf16.msrb.mxu2 %v9001_v10 }
 0x4ce   : > { %5485 = vmatpush.bf16.msrb.mxu3 %v9009_v11 }
 0x4cf   : > { %5447 = vmatpush.bf16.msrb.mxu0 %v8984_v43 }
 0x4d0   : > { %5460 = vmatpush.bf16.msrb.mxu1 %v8992_v36 }
 0x4d1   : > { %5473 = vmatpush.bf16.msrb.mxu2 %v9000_v12 }
 0x4d2   : > { %5486 = vmatpush.bf16.msrb.mxu3 %v9008_v14 }
 0x4d3   : > { %5448 = vmatpush.bf16.msrb.mxu0 %v8983_v18 }
 0x4d4   : > { %5461 = vmatpush.bf16.msrb.mxu1 %v8991_v15 }
 0x4d5   : > { %5474 = vmatpush.bf16.msrb.mxu2 %v8999_v16 }
 0x4d6   : > { %5487 = vmatpush.bf16.msrb.mxu3 %v9007_v17 }
 0x4d7   : > { %5449 = vmatpush.bf16.msrb.mxu0 %v8982_v20 }
 0x4d8   : > { %5462 = vmatpush.bf16.msrb.mxu1 %v8990_v1 }
 0x4d9   : > { %5475 = vmatpush.bf16.msrb.mxu2 %v8998_v21 }
 0x4da   : > { %5488 = vmatpush.bf16.msrb.mxu3 %v9006_v32 }
 0x4db   : > { %5450 = vmatpush.bf16.msrb.mxu0 %v8981_v25 }
 0x4dc   : > { %5463 = vmatpush.bf16.msrb.mxu1 %v8989_v22 }
 0x4dd   : > { %5476 = vmatpush.bf16.msrb.mxu2 %v8997_v23 }
 0x4de   : > { %5489 = vmatpush.bf16.msrb.mxu3 %v9005_v60 }
 0x4df   : > { %5451 = vmatpush.bf16.msrb.mxu0 %v8980_v26 }
 0x4e0   : > { %5464 = vmatpush.bf16.msrb.mxu1 %v8988_v24 }
 0x4e1   : > { %5477 = vmatpush.bf16.msrb.mxu2 %v8996_v19 }
 0x4e2   : > { %5490 = vmatpush.bf16.msrb.mxu3 %v9004_v28  ;;  %5452 = vmatmul.bf16.vlgmr.msrb.gmra.mxu0 %v4872_v35 }
 0x4e3   : > { %5465 = vmatmul.bf16.vlgmr.msrb.gmra.mxu1 %v4873_v37 }
 0x4e4   : > { %5478 = vmatmul.bf16.vlgmr.msrb.gmra.mxu2 %v4874_v8 }
 0x4e5   : > { %5491 = vmatmul.bf16.vlgmr.msrb.gmra.mxu3 %v4875_v45 }
 0x53f   : > { %v5401_v38 = vpop.f32.mrf.mxu0 }
 0x540   : > { %v5414_v39 = vpop.f32.mrf.mxu1  ;;  %v5402_v51 = vadd.f32 %v9131_v46, %v5401_v38 }
 0x542   : > { %v5415_v29 = vadd.f32 %v5414_v39, %v5402_v51 }
 0x547   : > { %v5427_v40 = vpop.f32.mrf.mxu2  ;;  %v5403_v42 = vpop.f32.mrf.mxu0 }
 0x548   : > { %v5440_v41 = vpop.f32.mrf.mxu3  ;;  %v5416_v44 = vpop.f32.mrf.mxu1  ;;  %v5428_v53 = vadd.f32 %v5427_v40, %v5415_v29 }
 0x54a   : > { %v5441_v54 = vadd.f32 %v5440_v41, %v5428_v53 }
 0x54f   : > { %v5429_v52 = vpop.f32.mrf.mxu2 }
 0x550   : > { %v5442_v50 = vpop.f32.mrf.mxu3 }
 0x55f   : > { %v5453_v55 = vpop.f32.mrf.mxu0 }
 0x560   : > { %v5466_v56 = vpop.f32.mrf.mxu1  ;;  %v5454_v62 = vadd.f32 %v5453_v55, %v5441_v54 }
 0x562   : > { %v5467_v57 = vadd.f32 %v5466_v56, %v5454_v62 }
 0x567   : > { %v5479_v58 = vpop.f32.mrf.mxu2  ;;  %v5455_v61 = vpop.f32.mrf.mxu0 }
 0x568   : > { %v5492_v27 = vpop.f32.mrf.mxu3  ;;  %v5480_v59 = vadd.f32 %v5479_v58, %v5467_v57  ;;  %v5468_v63 = vpop.f32.mrf.mxu1 }
 0x56a   : > { %v5493_v48 = vadd.f32 %v5492_v27, %v5480_v59 }
 0x56c   : > { %5496 = vst [vmem:[#allocation16] sm:$0x3] %v5493_v48 }
 0x56f   : > { %v5481_v49 = vpop.f32.mrf.mxu2 }
 0x570   : > { %v5494_v4 = vpop.f32.mrf.mxu3 }
 0x571 PF: > { %p9080_p3 = scmp.eq.s32.totalorder %s9511_s12, 1  ;;  %s9441_s27 = smov [#allocation16]  }
 0x572   : > { %s5503_s25 = sshll.u32 %s9441_s27, 4  ;;  %s5505_s30 = sshll.u32 %s11046_s8, 4  ;;  %s5504_s25 = int_to_ptr.vmem [resolvable:$true] %s5503_s25  ;;  %s5506_s30 = int_to_ptr.hbm [resolvable:$true] %s5505_s30 }
 0x573   : > { %9041 = dma.vmem_to_hbm [thread:$0]  (%p9080_p3), %s5504_s25, 32, %s5506_s30, [#allocation6]  }
 0x574   : > { %9407 = dma.done.wait (%p9080_p3), [#allocation6], 32  }
 0x575   : > { %9409 = vsyncadd (%p9080_p3), [#allocation6], 4294967264 }
 0x576 PF: > { %p22_p4 = scmp.ge.s32.totalorder %s9557_s21, 4   ;;  %s11051_s27 = smov %s9416_s28 }
 0x577   : > { %s11052_s28 = smov %s9420_s29  ;;  %s11053_s29 = smov %s9569_s15 }
 0x578   : > { %s11054_s30 = smov %s9557_s21  ;;  %24 = sbr.rel (!%p22_p4) target bundleno = 7 (0x7), region = 133 }
 0x57d   :  { %5519 = vsyncpa [#allocation5], 1 }
 0x57e   :  { %5521 = vsyncpa [#allocation5 + $0x1], 1 }
 0x57f   :  { %5522 = vsyncpa [#allocation8], 1 }
 0x580   :  { %5523 = vsyncpa [#allocation11], 1 }
 0x581   :  { %5525 = vsyncpa [#allocation11 + $0x1], 1 }
 0x582   :  { %5526 = vsyncpa [#allocation14], 1 }
 0x583   :  { %5527 = vsyncpa [#allocation6], 1 }
 0x584   :  { %5529 = vsyncpa [#allocation6 + $0x1], 1 }

</bundles_post_ra>
